<compile_context>
chip_gen: v7x
topology: tpu7x:2x2x1
jax: 0.10.0
libtpu: 0.0.40
codegen_flags: <defaults>
</compile_context>

<pallas_src>
import functools

import jax
import jax.numpy as jnp
from jax import lax
from jax.experimental import pallas as pl
from jax.experimental.pallas import tpu as pltpu

LN_EPS = 1e-5  # torch.nn.LayerNorm default


def _round_up(n, m):
    return ((n + m - 1) // m) * m


def _device_kind():
    try:
        return jax.devices()[0].device_kind.lower()
    except Exception:
        return ""


def _mxu_align():
    # v6e / v7x MXUs are 2x256x256 -> pad contraction/output dims to 256.
    # v2..v5 MXUs are 128x128 tiles -> 128 alignment is already native.
    kind = _device_kind()
    for old in ("v2", "v3", "v4", "v5"):
        if old in kind:
            return 128
    return 256


def _physical_vmem_bytes():
    try:
        return int(pltpu.get_tpu_info().vmem_capacity_bytes)
    except Exception:
        kind = _device_kind()
        return (64 if "v7" in kind else 128) * 1024 * 1024


# ---------------------------------------------------------------------------
# Kernel
# ---------------------------------------------------------------------------
def _ffn_kernel(x_ref, w1_ref, w2_ref, p_ref, o_ref, *, dim_model, dim_p, hid_p):
    """One tile of tokens: x_ref (T, dim_p); weights/params fully resident."""
    x_f32 = x_ref[...].astype(jnp.float32)                 # (T, dim_p) residual path

    params = p_ref[...]                                    # (8, W) packed f32 slab
    b1 = params[0:1, :hid_p]                               # (1, hid_p)
    b2 = params[1:2, :dim_p]                               # (1, dim_p)
    gamma = params[2:3, :dim_p]
    beta = params[3:4, :dim_p]

    # fc1 + ReLU : bf16 operands on the MXU, f32 accumulation.
    h = jnp.dot(x_f32.astype(jnp.bfloat16), w1_ref[...],
                preferred_element_type=jnp.float32) + b1
    h = jnp.maximum(h, 0.0)

    # fc2 : bf16 operands, f32 accumulation.
    y = jnp.dot(h.astype(jnp.bfloat16), w2_ref[...],
                preferred_element_type=jnp.float32) + b2

    # dropout(p=0.0) is identity; residual add in f32.
    y = y + x_f32

    # LayerNorm over the *true* dim_model lanes.  Padded lanes of y are exactly 0
    # (x / w1 / w2 / b1 / b2 pads are zero), so plain sums divided by dim_model are
    # exact and var = E[y^2] - mean^2 needs no lane mask.  Padded output lanes become
    # (-mean)*rsqrt*0 + 0 = 0 (gamma/beta pads are zero) and are sliced off host-side.
    inv_d = jnp.float32(1.0 / dim_model)
    mean = jnp.sum(y, axis=-1, keepdims=True) * inv_d
    ex2 = jnp.sum(y * y, axis=-1, keepdims=True) * inv_d
    var = jnp.maximum(ex2 - mean * mean, 0.0)
    out = (y - mean) * lax.rsqrt(var + LN_EPS) * gamma + beta

    o_ref[...] = out.astype(o_ref.dtype)


# ---------------------------------------------------------------------------
# Host-side helpers
# ---------------------------------------------------------------------------
def prepare_ffn_params(w1, b1, w2, b2, gamma, beta, *, align=None):
    """Pad + cast the weights once.  Hoist this out of the per-call path (or let jit
    constant-fold it) so each forward pass does not re-read/convert the weights."""
    dim_model, hidden = w1.shape
    if align is None:
        align = _mxu_align()
    dim_p = _round_up(dim_model, align)
    hid_p = _round_up(hidden, align)

    w1p = jnp.pad(w1, ((0, dim_p - dim_model), (0, hid_p - hidden))).astype(jnp.bfloat16)
    w2p = jnp.pad(w2, ((0, hid_p - hidden), (0, dim_p - dim_model))).astype(jnp.bfloat16)

    W = max(dim_p, hid_p)
    params = jnp.zeros((8, W), jnp.float32)
    params = params.at[0, :hidden].set(b1)
    params = params.at[1, :dim_model].set(b2)
    params = params.at[2, :dim_model].set(gamma)
    params = params.at[3, :dim_model].set(beta)

    return dict(w1p=w1p, w2p=w2p, params=params,
                dim_model=dim_model, hidden=hidden, dim_p=dim_p, hid_p=hid_p)


def _vmem_footprint(tile_rows, dim_p, hid_p):
    weights = 2 * dim_p * hid_p * 2                       # w1 + w2, bf16, single-buffered
    params = 8 * max(dim_p, hid_p) * 4
    io = 2 * (tile_rows * dim_p * 4) * 2                  # x + out tiles, double-buffered
    live = tile_rows * hid_p * 4 + tile_rows * hid_p * 2 + tile_rows * dim_p * 4
    return weights + params + io + live


def _pick_tile_rows(rows, dim_p, hid_p, requested, vmem_budget):
    rows128 = _round_up(rows, 128)
    tile = max(128, min(_round_up(requested, 128), rows128))
    # Make sure the 'parallel' row axis has >= 2 steps when possible so v7x's two
    # TensorCores both get work.
    if rows128 >= 256:
        tile = min(tile, _round_up(rows128 // 2, 128))
    while tile > 128 and _vmem_footprint(tile, dim_p, hid_p) > vmem_budget:
        tile -= 128
    return tile


def _resident_spec(shape, single_buffer):
    """Constant-index block: single-buffer it when supported (halves its VMEM cost)."""
    index_map = lambda i: (0,) * len(shape)
    if single_buffer:
        try:
            return pl.BlockSpec(shape, index_map, pipeline_mode=pl.Buffered(1))
        except Exception:
            pass
    return pl.BlockSpec(shape, index_map)


def position_wise_feed_forward(x, w1, b1, w2, b2, gamma, beta, *,
                               tile_rows=512, prepared=None):
    """x: (batch, seq, dim_model) float32.  w1:(dim, hid), w2:(hid, dim)."""
    batch, seq, dim_model = x.shape
    if prepared is None:
        prepared = prepare_ffn_params(w1, b1, w2, b2, gamma, beta)
    dim_p = prepared["dim_p"]
    hid_p = prepared["hid_p"]
    hidden = prepared["hidden"]

    rows = batch * seq
    phys = _physical_vmem_bytes()
    budget = max(32 << 20, phys - (16 << 20))              # headroom for compiler scratch
    tile_rows = _pick_tile_rows(rows, dim_p, hid_p, tile_rows, budget)
    rows_p = _round_up(rows, tile_rows)
    vmem_limit = int(min(budget, max(_vmem_footprint(tile_rows, dim_p, hid_p) + (8 << 20),
                                     32 << 20)))

    # Activation layout prep: only pad when actually needed (skips an extra HBM pass
    # in the common aligned case).
    x2d = x.reshape(rows, dim_model)
    needs_pad = (rows_p != rows) or (dim_p != dim_model)
    if needs_pad:
        x2d = jnp.pad(x2d, ((0, rows_p - rows), (0, dim_p - dim_model)))

    grid = (rows_p // tile_rows,)
    kernel = functools.partial(_ffn_kernel, dim_model=dim_model, dim_p=dim_p, hid_p=hid_p)

    cost = pl.CostEstimate(
        flops=4 * rows * dim_model * hidden,               # two matmuls
        transcendentals=0,
        bytes_accessed=(rows_p * dim_p * 2) * 4            # x in + out
                       + (prepared["w1p"].size + prepared["w2p"].size) * 2
                       + prepared["params"].size * 4,
    )

    def run(single_buffer_weights):
        W = max(dim_p, hid_p)
        return pl.pallas_call(
            kernel,
            out_shape=jax.ShapeDtypeStruct((rows_p, dim_p), x.dtype),
            grid_spec=pltpu.PrefetchScalarGridSpec(
                num_scalar_prefetch=0,
                grid=grid,
                in_specs=[
                    pl.BlockSpec((tile_rows, dim_p), lambda i: (i, 0)),        # x tile
                    _resident_spec((dim_p, hid_p), single_buffer_weights),      # w1 (bf16)
                    _resident_spec((hid_p, dim_p), single_buffer_weights),      # w2 (bf16)
                    _resident_spec((8, W), single_buffer_weights),               # b1/b2/g/b
                ],
                out_specs=pl.BlockSpec((tile_rows, dim_p), lambda i: (i, 0)),
            ),
            compiler_params=pltpu.CompilerParams(
                dimension_semantics=("parallel",),
                vmem_limit_bytes=vmem_limit,
            ),
            cost_estimate=cost,
        )(x2d, prepared["w1p"], prepared["w2p"], prepared["params"])

    try:
        out2d = run(True)
    except Exception:
        # Fallback if this jax build rejects pl.Buffered(1) on constant-index blocks.
        out2d = run(False)

    if needs_pad:
        out2d = out2d[:rows, :dim_model]
    return out2d.reshape(batch, seq, dim_model)


# ---------------------------------------------------------------------------
# Reference + test
# ---------------------------------------------------------------------------
def reference_ffn(x, w1, b1, w2, b2, gamma, beta):
    h = jnp.maximum(x @ w1 + b1, 0.0)
    y = h @ w2 + b2
    y = y + x
    mean = jnp.mean(y, axis=-1, keepdims=True)
    var = jnp.mean((y - mean) ** 2, axis=-1, keepdims=True)
    return (y - mean) * lax.rsqrt(var + LN_EPS) * gamma + beta


if __name__ == "__main__":
    batch, seq, dim_model, hidden = 2, 8, 32, 64

    key = jax.random.PRNGKey(0)
    kx, kw1, kb1, kw2, kb2 = jax.random.split(key, 5)

    x = jax.random.normal(kx, (batch, seq, dim_model), dtype=jnp.float32)

    # Deterministic PyTorch-Linear-style init (uniform in +/- 1/sqrt(fan_in)).
    lim1 = 1.0 / jnp.sqrt(jnp.float32(dim_model))
    lim2 = 1.0 / jnp.sqrt(jnp.float32(hidden))
    w1 = jax.random.uniform(kw1, (dim_model, hidden), jnp.float32, -lim1, lim1)
    b1 = jax.random.uniform(kb1, (hidden,), jnp.float32, -lim1, lim1)
    w2 = jax.random.uniform(kw2, (hidden, dim_model), jnp.float32, -lim2, lim2)
    b2 = jax.random.uniform(kb2, (dim_model,), jnp.float32, -lim2, lim2)
    gamma = jnp.ones((dim_model,), jnp.float32)   # LayerNorm weight init
    beta = jnp.zeros((dim_model,), jnp.float32)   # LayerNorm bias init

    # Weight pad + bf16 cast hoisted out of the per-call path.
    prepared = prepare_ffn_params(w1, b1, w2, b2, gamma, beta)

    out = position_wise_feed_forward(x, w1, b1, w2, b2, gamma, beta, prepared=prepared)
    out = jax.block_until_ready(out)

    ref = reference_ffn(x, w1, b1, w2, b2, gamma, beta)
    assert out.shape == (batch, seq, dim_model)
    # bf16 matmul operands with f32 accumulation -> slightly looser tolerance.
    assert jnp.allclose(out, ref, atol=2e-2, rtol=2e-2), "mismatch vs reference"

    print("KERNEL_OK")
</pallas_src>

<mosaic_0001>
module attributes {stable_mosaic.version = 11 : i64} {
  func.func @_ffn_kernel(%arg0: i32, %arg1: memref<128x256xf32, #tpu.memory_space<vmem>>, %arg2: memref<256x256xbf16, #tpu.memory_space<vmem>>, %arg3: memref<256x256xbf16, #tpu.memory_space<vmem>>, %arg4: memref<8x256xf32, #tpu.memory_space<vmem>>, %arg5: memref<128x256xf32, #tpu.memory_space<vmem>>) attributes {dimension_semantics = [#tpu.dimension_semantics<parallel>], iteration_bounds = array<i64: 1>, scalar_prefetch = 0 : i64, scratch_operands = 0 : i64, tpu.core_type = #tpu.core_type<tc>, window_params = [{transform_indices = @transform_0, window_bounds = array<i64: 128, 256>}, {pipeline_mode = #tpu.pipeline_mode<synchronous>, transform_indices = @transform_1, window_bounds = array<i64: 256, 256>}, {pipeline_mode = #tpu.pipeline_mode<synchronous>, transform_indices = @transform_2, window_bounds = array<i64: 256, 256>}, {pipeline_mode = #tpu.pipeline_mode<synchronous>, transform_indices = @transform_3, window_bounds = array<i64: 8, 256>}, {transform_indices = @transform_4, window_bounds = array<i64: 128, 256>}]} {
    %c0 = arith.constant 0 : index
    %c0_0 = arith.constant 0 : index
    %0 = vector.load %arg1[%c0, %c0_0] : memref<128x256xf32, #tpu.memory_space<vmem>>, vector<128x256xf32>
    %c0_1 = arith.constant 0 : index
    %c0_2 = arith.constant 0 : index
    %1 = vector.load %arg4[%c0_1, %c0_2] : memref<8x256xf32, #tpu.memory_space<vmem>>, vector<8x256xf32>
    %2 = vector.extract_strided_slice %1 {offsets = [0, 0], sizes = [1, 256], strides = [1, 1]} : vector<8x256xf32> to vector<1x256xf32>
    %3 = vector.extract_strided_slice %1 {offsets = [1, 0], sizes = [1, 256], strides = [1, 1]} : vector<8x256xf32> to vector<1x256xf32>
    %4 = vector.extract_strided_slice %1 {offsets = [2, 0], sizes = [1, 256], strides = [1, 1]} : vector<8x256xf32> to vector<1x256xf32>
    %5 = vector.extract_strided_slice %1 {offsets = [3, 0], sizes = [1, 256], strides = [1, 1]} : vector<8x256xf32> to vector<1x256xf32>
    %6 = arith.truncf %0 : vector<128x256xf32> to vector<128x256xbf16>
    %c0_3 = arith.constant 0 : index
    %c0_4 = arith.constant 0 : index
    %7 = vector.load %arg2[%c0_3, %c0_4] : memref<256x256xbf16, #tpu.memory_space<vmem>>, vector<256x256xbf16>
    %cst = arith.constant dense<0.000000e+00> : vector<128x256xf32>
    %8 = tpu.matmul %6, %7, %cst {dimension_numbers = #tpu.dot_dimension_numbers<[1], [0], [0], [1], [0, 0, 1, 1], [], []>} : vector<128x256xbf16>, vector<256x256xbf16>, vector<128x256xf32> -> vector<128x256xf32>
    %9 = vector.broadcast %2 : vector<1x256xf32> to vector<128x256xf32>
    %10 = arith.addf %8, %9 : vector<128x256xf32>
    %cst_5 = arith.constant 0.000000e+00 : f32
    %11 = vector.broadcast %cst_5 : f32 to vector<128x256xf32>
    %12 = arith.maximumf %10, %11 : vector<128x256xf32>
    %13 = arith.truncf %12 : vector<128x256xf32> to vector<128x256xbf16>
    %c0_6 = arith.constant 0 : index
    %c0_7 = arith.constant 0 : index
    %14 = vector.load %arg3[%c0_6, %c0_7] : memref<256x256xbf16, #tpu.memory_space<vmem>>, vector<256x256xbf16>
    %cst_8 = arith.constant dense<0.000000e+00> : vector<128x256xf32>
    %15 = tpu.matmul %13, %14, %cst_8 {dimension_numbers = #tpu.dot_dimension_numbers<[1], [0], [0], [1], [0, 0, 1, 1], [], []>} : vector<128x256xbf16>, vector<256x256xbf16>, vector<128x256xf32> -> vector<128x256xf32>
    %16 = vector.broadcast %3 : vector<1x256xf32> to vector<128x256xf32>
    %17 = arith.addf %15, %16 : vector<128x256xf32>
    %18 = arith.addf %17, %0 : vector<128x256xf32>
    %cst_9 = arith.constant dense<0.000000e+00> : vector<128xf32>
    %19 = vector.multi_reduction <add>, %18, %cst_9 [1] : vector<128x256xf32> to vector<128xf32>
    %20 = vector.shape_cast %19 : vector<128xf32> to vector<128x1xf32>
    %cst_10 = arith.constant 3.125000e-02 : f32
    %21 = vector.broadcast %cst_10 : f32 to vector<128x1xf32>
    %22 = arith.mulf %20, %21 : vector<128x1xf32>
    %23 = arith.mulf %18, %18 : vector<128x256xf32>
    %cst_11 = arith.constant dense<0.000000e+00> : vector<128xf32>
    %24 = vector.multi_reduction <add>, %23, %cst_11 [1] : vector<128x256xf32> to vector<128xf32>
    %25 = vector.shape_cast %24 : vector<128xf32> to vector<128x1xf32>
    %cst_12 = arith.constant 3.125000e-02 : f32
    %26 = vector.broadcast %cst_12 : f32 to vector<128x1xf32>
    %27 = arith.mulf %25, %26 : vector<128x1xf32>
    %28 = arith.mulf %22, %22 : vector<128x1xf32>
    %29 = arith.subf %27, %28 : vector<128x1xf32>
    %cst_13 = arith.constant 0.000000e+00 : f32
    %30 = vector.broadcast %cst_13 : f32 to vector<128x1xf32>
    %31 = arith.maximumf %29, %30 : vector<128x1xf32>
    %32 = vector.broadcast %22 : vector<128x1xf32> to vector<128x256xf32>
    %33 = arith.subf %18, %32 : vector<128x256xf32>
    %cst_14 = arith.constant 9.99999974E-6 : f32
    %34 = vector.broadcast %cst_14 : f32 to vector<128x1xf32>
    %35 = arith.addf %31, %34 : vector<128x1xf32>
    %36 = math.rsqrt %35 : vector<128x1xf32>
    %37 = vector.broadcast %36 : vector<128x1xf32> to vector<128x256xf32>
    %38 = arith.mulf %33, %37 : vector<128x256xf32>
    %39 = vector.broadcast %4 : vector<1x256xf32> to vector<128x256xf32>
    %40 = arith.mulf %38, %39 : vector<128x256xf32>
    %41 = vector.broadcast %5 : vector<1x256xf32> to vector<128x256xf32>
    %42 = arith.addf %40, %41 : vector<128x256xf32>
    %c0_15 = arith.constant 0 : index
    %c0_16 = arith.constant 0 : index
    %43 = vector.load %arg5[%c0_15, %c0_16] : memref<128x256xf32, #tpu.memory_space<vmem>>, vector<128x256xf32>
    tpu.vector_store %arg5[%c0_15, %c0_16], %42 {strides = array<i32>} : memref<128x256xf32, #tpu.memory_space<vmem>>, vector<128x256xf32>,
    return
  }
  func.func @transform_0(%arg0: i32) -> (i32, i32) {
    %c0_i32 = arith.constant 0 : i32
    %c0_i32_0 = arith.constant 0 : i32
    return %arg0, %c0_i32 : i32, i32
  }
  func.func @transform_1(%arg0: i32) -> (i32, i32) {
    %c0_i32 = arith.constant 0 : i32
    %c0_i32_0 = arith.constant 0 : i32
    %c0_i32_1 = arith.constant 0 : i32
    return %c0_i32, %c0_i32_0 : i32, i32
  }
  func.func @transform_2(%arg0: i32) -> (i32, i32) {
    %c0_i32 = arith.constant 0 : i32
    %c0_i32_0 = arith.constant 0 : i32
    %c0_i32_1 = arith.constant 0 : i32
    return %c0_i32, %c0_i32_0 : i32, i32
  }
  func.func @transform_3(%arg0: i32) -> (i32, i32) {
    %c0_i32 = arith.constant 0 : i32
    %c0_i32_0 = arith.constant 0 : i32
    %c0_i32_1 = arith.constant 0 : i32
    return %c0_i32, %c0_i32_0 : i32, i32
  }
  func.func @transform_4(%arg0: i32) -> (i32, i32) {
    %c0_i32 = arith.constant 0 : i32
    %c0_i32_0 = arith.constant 0 : i32
    return %arg0, %c0_i32 : i32, i32
  }
}

module attributes {stable_mosaic.version = 11 : i64} {
  func.func @_ffn_kernel(%arg0: i32, %arg1: memref<128x256xf32, #tpu.memory_space<vmem>>, %arg2: memref<256x256xbf16, #tpu.memory_space<vmem>>, %arg3: memref<256x256xbf16, #tpu.memory_space<vmem>>, %arg4: memref<8x256xf32, #tpu.memory_space<vmem>>, %arg5: memref<128x256xf32, #tpu.memory_space<vmem>>) attributes {dimension_semantics = [#tpu.dimension_semantics<parallel>], iteration_bounds = array<i64: 1>, scalar_prefetch = 0 : i64, scratch_operands = 0 : i64, tpu.core_type = #tpu.core_type<tc>, window_params = [{transform_indices = @transform_0, window_bounds = array<i64: 128, 256>}, {pipeline_mode = #tpu.pipeline_mode<synchronous>, transform_indices = @transform_1, window_bounds = array<i64: 256, 256>}, {pipeline_mode = #tpu.pipeline_mode<synchronous>, transform_indices = @transform_2, window_bounds = array<i64: 256, 256>}, {pipeline_mode = #tpu.pipeline_mode<synchronous>, transform_indices = @transform_3, window_bounds = array<i64: 8, 256>}, {transform_indices = @transform_4, window_bounds = array<i64: 128, 256>}]} {
    %c0 = arith.constant 0 : index
    %c0_0 = arith.constant 0 : index
    %0 = vector.load %arg1[%c0, %c0_0] : memref<128x256xf32, #tpu.memory_space<vmem>>, vector<128x256xf32>
    %c0_1 = arith.constant 0 : index
    %c0_2 = arith.constant 0 : index
    %1 = vector.load %arg4[%c0_1, %c0_2] : memref<8x256xf32, #tpu.memory_space<vmem>>, vector<8x256xf32>
    %2 = vector.extract_strided_slice %1 {offsets = [0, 0], sizes = [1, 256], strides = [1, 1]} : vector<8x256xf32> to vector<1x256xf32>
    %3 = vector.extract_strided_slice %1 {offsets = [1, 0], sizes = [1, 256], strides = [1, 1]} : vector<8x256xf32> to vector<1x256xf32>
    %4 = vector.extract_strided_slice %1 {offsets = [2, 0], sizes = [1, 256], strides = [1, 1]} : vector<8x256xf32> to vector<1x256xf32>
    %5 = vector.extract_strided_slice %1 {offsets = [3, 0], sizes = [1, 256], strides = [1, 1]} : vector<8x256xf32> to vector<1x256xf32>
    %6 = arith.truncf %0 : vector<128x256xf32> to vector<128x256xbf16>
    %c0_3 = arith.constant 0 : index
    %c0_4 = arith.constant 0 : index
    %7 = vector.load %arg2[%c0_3, %c0_4] : memref<256x256xbf16, #tpu.memory_space<vmem>>, vector<256x256xbf16>
    %cst = arith.constant dense<0.000000e+00> : vector<128x256xf32>
    %8 = tpu.matmul %6, %7, %cst {dimension_numbers = #tpu.dot_dimension_numbers<[1], [0], [0], [1], [0, 0, 1, 1], [], []>} : vector<128x256xbf16>, vector<256x256xbf16>, vector<128x256xf32> -> vector<128x256xf32>
    %9 = vector.broadcast %2 : vector<1x256xf32> to vector<128x256xf32>
    %10 = arith.addf %8, %9 : vector<128x256xf32>
    %cst_5 = arith.constant 0.000000e+00 : f32
    %11 = vector.broadcast %cst_5 : f32 to vector<128x256xf32>
    %12 = arith.maximumf %10, %11 : vector<128x256xf32>
    %13 = arith.truncf %12 : vector<128x256xf32> to vector<128x256xbf16>
    %c0_6 = arith.constant 0 : index
    %c0_7 = arith.constant 0 : index
    %14 = vector.load %arg3[%c0_6, %c0_7] : memref<256x256xbf16, #tpu.memory_space<vmem>>, vector<256x256xbf16>
    %cst_8 = arith.constant dense<0.000000e+00> : vector<128x256xf32>
    %15 = tpu.matmul %13, %14, %cst_8 {dimension_numbers = #tpu.dot_dimension_numbers<[1], [0], [0], [1], [0, 0, 1, 1], [], []>} : vector<128x256xbf16>, vector<256x256xbf16>, vector<128x256xf32> -> vector<128x256xf32>
    %16 = vector.broadcast %3 : vector<1x256xf32> to vector<128x256xf32>
    %17 = arith.addf %15, %16 : vector<128x256xf32>
    %18 = arith.addf %17, %0 : vector<128x256xf32>
    %cst_9 = arith.constant dense<0.000000e+00> : vector<128xf32>
    %19 = vector.multi_reduction <add>, %18, %cst_9 [1] : vector<128x256xf32> to vector<128xf32>
    %20 = vector.shape_cast %19 : vector<128xf32> to vector<128x1xf32>
    %cst_10 = arith.constant 3.125000e-02 : f32
    %21 = vector.broadcast %cst_10 : f32 to vector<128x1xf32>
    %22 = arith.mulf %20, %21 : vector<128x1xf32>
    %23 = arith.mulf %18, %18 : vector<128x256xf32>
    %cst_11 = arith.constant dense<0.000000e+00> : vector<128xf32>
    %24 = vector.multi_reduction <add>, %23, %cst_11 [1] : vector<128x256xf32> to vector<128xf32>
    %25 = vector.shape_cast %24 : vector<128xf32> to vector<128x1xf32>
    %cst_12 = arith.constant 3.125000e-02 : f32
    %26 = vector.broadcast %cst_12 : f32 to vector<128x1xf32>
    %27 = arith.mulf %25, %26 : vector<128x1xf32>
    %28 = arith.mulf %22, %22 : vector<128x1xf32>
    %29 = arith.subf %27, %28 : vector<128x1xf32>
    %cst_13 = arith.constant 0.000000e+00 : f32
    %30 = vector.broadcast %cst_13 : f32 to vector<128x1xf32>
    %31 = arith.maximumf %29, %30 : vector<128x1xf32>
    %32 = vector.broadcast %22 : vector<128x1xf32> to vector<128x256xf32>
    %33 = arith.subf %18, %32 : vector<128x256xf32>
    %cst_14 = arith.constant 9.99999974E-6 : f32
    %34 = vector.broadcast %cst_14 : f32 to vector<128x1xf32>
    %35 = arith.addf %31, %34 : vector<128x1xf32>
    %36 = math.rsqrt %35 : vector<128x1xf32>
    %37 = vector.broadcast %36 : vector<128x1xf32> to vector<128x256xf32>
    %38 = arith.mulf %33, %37 : vector<128x256xf32>
    %39 = vector.broadcast %4 : vector<1x256xf32> to vector<128x256xf32>
    %40 = arith.mulf %38, %39 : vector<128x256xf32>
    %41 = vector.broadcast %5 : vector<1x256xf32> to vector<128x256xf32>
    %42 = arith.addf %40, %41 : vector<128x256xf32>
    %c0_15 = arith.constant 0 : index
    %c0_16 = arith.constant 0 : index
    %43 = vector.load %arg5[%c0_15, %c0_16] : memref<128x256xf32, #tpu.memory_space<vmem>>, vector<128x256xf32>
    tpu.vector_store %arg5[%c0_15, %c0_16], %42 {strides = array<i32>} : memref<128x256xf32, #tpu.memory_space<vmem>>, vector<128x256xf32>,
    return
  }
  func.func @transform_0(%arg0: i32) -> (i32, i32) {
    %c0_i32 = arith.constant 0 : i32
    %c0_i32_0 = arith.constant 0 : i32
    return %arg0, %c0_i32 : i32, i32
  }
  func.func @transform_1(%arg0: i32) -> (i32, i32) {
    %c0_i32 = arith.constant 0 : i32
    %c0_i32_0 = arith.constant 0 : i32
    %c0_i32_1 = arith.constant 0 : i32
    return %c0_i32, %c0_i32_0 : i32, i32
  }
  func.func @transform_2(%arg0: i32) -> (i32, i32) {
    %c0_i32 = arith.constant 0 : i32
    %c0_i32_0 = arith.constant 0 : i32
    %c0_i32_1 = arith.constant 0 : i32
    return %c0_i32, %c0_i32_0 : i32, i32
  }
  func.func @transform_3(%arg0: i32) -> (i32, i32) {
    %c0_i32 = arith.constant 0 : i32
    %c0_i32_0 = arith.constant 0 : i32
    %c0_i32_1 = arith.constant 0 : i32
    return %c0_i32, %c0_i32_0 : i32, i32
  }
  func.func @transform_4(%arg0: i32) -> (i32, i32) {
    %c0_i32 = arith.constant 0 : i32
    %c0_i32_0 = arith.constant 0 : i32
    return %arg0, %c0_i32 : i32, i32
  }
}

</mosaic_0001>

<bundles_post_ra>
// kernel: tpu_custom_call.1
= control target key start
LH: loop header
LB: loop body
LE: loop exit
PB: predicated region body
PF: predicated region fallthrough
CT: control target
= control target key end

     0   :  { %9 = vsyncpa [#allocation3], 0  ;;  %s2259_s0 = inlined_call_operand.hbm [shape: f32[128,256], index: 0, kind: input, shape index: {}]   ;;  %s2260_s1 = inlined_call_operand.hbm [shape: bf16[256,256], index: 1, kind: input, shape index: {}]   ;;  %s2261_s2 = inlined_call_operand.hbm [shape: bf16[256,256], index: 2, kind: input, shape index: {}]   ;;  %s2262_s3 = inlined_call_operand.hbm [shape: f32[8,256], index: 3, kind: input, shape index: {}]   ;;  %s2263_s4 = inlined_call_operand.hbm [shape: f32[128,256], index: 4, kind: output, shape index: {}]  }
   0x1   :  { %10 = vsyncpa [#allocation6], 0 }
   0x2   :  { %11 = vsyncpa [#allocation9], 0 }
   0x3   :  { %12 = vsyncpa [#allocation4], 0  ;;  %s1581_s15 = smov [#allocation5]   ;;  %s1463_s19 = scalar_lea.hbm %s2260_s1, 4096 }
   0x4   :  { %s30_s16 = sshll.u32 %s1581_s15, 4  ;;  %p1464_p0 = scmp.ne.s32.totalorder %s2260_s1, %s1463_s19  ;;  %s31_s16 = int_to_ptr.vmem [resolvable:$true] %s30_s16 }
   0x5   :  { %p1467_p1 = scmp.lt.u32.totalorder %s1463_s19, %s2260_s1 }
   0x7   :  { %p1469_p2 = pnand %p1467_p1, %p1464_p0 }
   0x9   :  { %1472 = shalt.err (!%p1469_p2)
}
   0xa   :  { %s1473_s24 = scalar_lea.vmem %s31_s16, 4096  ;;  %p1478_p4 = scmp.lt.s32.totalorder %s31_s16, %s31_s16 }
   0xb   :  { %p1474_p3 = scmp.ne.s32.totalorder %s31_s16, %s1473_s24  ;;  %p1479_p5 = scmp.lt.s32.totalorder %s1473_s24, %s1473_s24 }
   0xd   :  { %p1480_p6 = por %p1479_p5, %p1478_p4 }
   0xf   :  { %p1481_p7 = pnand %p1480_p6, %p1474_p3 }
  0x11   :  { %1484 = shalt.err (!%p1481_p7)
}
  0x12   :  { %s1582_s25 = smov 128   ;;  %s1583_s26 = smov 8  }
  0x13   :  { %36 = dma.hbm_to_vmem [thread:$0]  %s2260_s1, 4096, %s31_s16, [#allocation6], %s1582_s25, %s1582_s25, %s1583_s26  }
  0x14   :  { %s1584_s29 = smov [#allocation2]   ;;  %s1485_s7 = scalar_lea.hbm %s2259_s0, 4096 }
  0x15   :  { %s18_s30 = sshll.u32 %s1584_s29, 4  ;;  %p1486_p8 = scmp.ne.s32.totalorder %s2259_s0, %s1485_s7  ;;  %s19_s30 = int_to_ptr.vmem [resolvable:$true] %s18_s30 }
  0x16   :  { %p1489_p9 = scmp.lt.u32.totalorder %s1485_s7, %s2259_s0 }
  0x18   :  { %p1491_p10 = pnand %p1489_p9, %p1486_p8 }
  0x1a   :  { %1494 = shalt.err (!%p1491_p10)
}
  0x1b   :  { %s1495_s12 = scalar_lea.vmem %s19_s30, 4096  ;;  %p1500_p12 = scmp.lt.s32.totalorder %s19_s30, %s19_s30 }
  0x1c   :  { %p1496_p11 = scmp.ne.s32.totalorder %s19_s30, %s1495_s12  ;;  %p1501_p13 = scmp.lt.s32.totalorder %s1495_s12, %s1495_s12 }
  0x1e   :  { %p1502_p0 = por %p1501_p13, %p1500_p12 }
  0x20   :  { %p1503_p1 = pnand %p1502_p0, %p1496_p11 }
  0x22   :  { %1506 = shalt.err (!%p1503_p1)
}
  0x23   :  { %s1585_s1 = smov 256   ;;  %s1586_s13 = smov 16  }
  0x24   :  { %24 = dma.hbm_to_vmem [thread:$0]  %s2259_s0, 4096, %s19_s30, [#allocation3], %s1585_s1, %s1585_s1, %s1586_s13  }
  0x25   :  { %s1587_s16 = smov [#allocation7]   ;;  %s1588_s18 = smov [#allocation8]  }
  0x26   :  { %s42_s17 = sshll.u32 %s1587_s16, 4  ;;  %s55_s19 = sshll.u32 %s1588_s18, 4  ;;  %s43_s17 = int_to_ptr.vmem [resolvable:$true] %s42_s17  ;;  %s56_s19 = int_to_ptr.vmem [resolvable:$true] %s55_s19 }
  0x27   :  { %s1507_s22 = scalar_lea.hbm %s2261_s2, 4096 }
  0x28   :  { %p1508_p2 = scmp.ne.s32.totalorder %s2261_s2, %s1507_s22  ;;  %p1511_p3 = scmp.lt.u32.totalorder %s1507_s22, %s2261_s2 }
  0x2a   :  { %p1513_p4 = pnand %p1511_p3, %p1508_p2 }
  0x2c   :  { %1516 = shalt.err (!%p1513_p4)
}
  0x2d   :  { %s1517_s0 = scalar_lea.vmem %s43_s17, 4096  ;;  %p1522_p6 = scmp.lt.s32.totalorder %s43_s17, %s43_s17 }
  0x2e   :  { %p1518_p5 = scmp.ne.s32.totalorder %s43_s17, %s1517_s0  ;;  %p1523_p7 = scmp.lt.s32.totalorder %s1517_s0, %s1517_s0 }
  0x30   :  { %p1524_p8 = por %p1523_p7, %p1522_p6 }
  0x32   :  { %p1525_p9 = pnand %p1524_p8, %p1518_p5 }
  0x34   :  { %1528 = shalt.err (!%p1525_p9)
}
  0x35   :  { %48 = dma.hbm_to_vmem [thread:$0]  %s2261_s2, 4096, %s43_s17, [#allocation6], %s1582_s25, %s1582_s25, %s1583_s26  }
  0x36   :  { %s1529_s7 = scalar_lea.hbm %s2262_s3, 256 }
  0x37   :  { %p1530_p10 = scmp.ne.s32.totalorder %s2262_s3, %s1529_s7  ;;  %p1533_p11 = scmp.lt.u32.totalorder %s1529_s7, %s2262_s3 }
  0x39   :  { %p1535_p12 = pnand %p1533_p11, %p1530_p10 }
  0x3b   :  { %1538 = shalt.err (!%p1535_p12)
}
  0x3c   :  { %s1539_s12 = scalar_lea.vmem %s56_s19, 256  ;;  %p1544_p0 = scmp.lt.s32.totalorder %s56_s19, %s56_s19 }
  0x3d   :  { %p1540_p13 = scmp.ne.s32.totalorder %s56_s19, %s1539_s12  ;;  %p1545_p1 = scmp.lt.s32.totalorder %s1539_s12, %s1539_s12 }
  0x3f   :  { %p1546_p2 = por %p1545_p1, %p1544_p0 }
  0x41   :  { %p1547_p3 = pnand %p1546_p2, %p1540_p13 }
  0x43   :  { %1550 = shalt.err (!%p1547_p3)
}
  0x44   :  { %58 = dma.hbm_to_vmem [thread:$0]  %s2262_s3, 256, %s56_s19, [#allocation9]  }
  0x45   :  { %1573 = dma.done.wait [#allocation3], 4096  }
  0x46   :  { %1574 = vsyncadd [#allocation3], 4294963200 }
  0x47   :  { %1575 = dma.done.wait [#allocation6], 8192  }
  0x48   :  { %1576 = vsyncadd [#allocation6], 4294959104 }
  0x49   :  { %1577 = dma.done.wait [#allocation9], 256  }
  0x4a   :  { %1578 = vsyncadd [#allocation9], 4294967040  ;;  %v1335_v0 = vld [vmem:[#allocation5 + $0x4] ss:$8 sps:$4 sm:$0xff]   ;;  %v1337_v1 = vld [vmem:[#allocation5] ss:$8 sps:$4 sm:$0xff]  }
  0x4b   :  { %321 = vmatprep.subr.bf16.mxu0 %v1335_v0  ;;  %v1338_v2 = vld [vmem:[#allocation5 + $0x14] ss:$8 sps:$4 sm:$0xff]   ;;  %v1340_v3 = vld [vmem:[#allocation5 + $0x10] ss:$8 sps:$4 sm:$0xff]   ;;  %v1341_v4 = vld [vmem:[#allocation5 + $0x24] ss:$8 sps:$4 sm:$0xff]  }
  0x4c   :  { %322 = vmatpush1.bf16.msra.mxu0 %v1337_v1  ;;  %v1343_v5 = vld [vmem:[#allocation5 + $0x20] ss:$8 sps:$4 sm:$0xff]   ;;  %v1344_v6 = vld [vmem:[#allocation5 + $0x34] ss:$8 sps:$4 sm:$0xff]   ;;  %v1346_v7 = vld [vmem:[#allocation5 + $0x30] ss:$8 sps:$4 sm:$0xff]  }
  0x4d   :  { %323 = vmatprep.subr.bf16.mxu0 %v1338_v2  ;;  %v1347_v8 = vld [vmem:[#allocation5 + $0x44] ss:$8 sps:$4 sm:$0xff]   ;;  %v1349_v9 = vld [vmem:[#allocation5 + $0x40] ss:$8 sps:$4 sm:$0xff]   ;;  %v1350_v10 = vld [vmem:[#allocation5 + $0x54] ss:$8 sps:$4 sm:$0xff]  }
  0x4e   :  { %v1352_v11 = vld [vmem:[#allocation5 + $0x50] ss:$8 sps:$4 sm:$0xff]   ;;  %v1353_v12 = vld [vmem:[#allocation5 + $0x64] ss:$8 sps:$4 sm:$0xff]   ;;  %v1355_v16 = vld [vmem:[#allocation5 + $0x60] ss:$8 sps:$4 sm:$0xff]  }
  0x4f   :  { %v1672_v13 = vld [vmem:[#allocation2 + $0x8] sm:$0xff]  ;;  %v1674_v14 = vld [vmem:[#allocation2 + $0x18] sm:$0xff]  ;;  %v1678_v50 = vld [vmem:[#allocation2] sm:$0xff]  ;;  %s1589_s3 = smov [#allocation10]  }
  0x50   :  { %324 = vmatpush1.bf16.msra.mxu0 %v1340_v3  ;;  %v106_v15 = vpack.c.bf16 %v1674_v14, %v1672_v13  ;;  %v1356_v17 = vld [vmem:[#allocation5 + $0x74] ss:$8 sps:$4 sm:$0xff]   ;;  %v1358_v18 = vld [vmem:[#allocation5 + $0x70] ss:$8 sps:$4 sm:$0xff]   ;;  %v1359_v19 = vld [vmem:[#allocation5 + $0x84] ss:$8 sps:$4 sm:$0xff]  }
  0x51   :  { %325 = vmatprep.subr.bf16.mxu0 %v1341_v4  ;;  %v1361_v20 = vld [vmem:[#allocation5 + $0x80] ss:$8 sps:$4 sm:$0xff]   ;;  %v1362_v21 = vld [vmem:[#allocation5 + $0x94] ss:$8 sps:$4 sm:$0xff]   ;;  %v1383_v22 = vld [vmem:[#allocation7 + $0x4] ss:$8 sps:$4 sm:$0xff]  }
  0x52   :  { %353 = vmatprep.mubr.bf16.mxu0 %v106_v15  ;;  %v1385_v23 = vld [vmem:[#allocation7] ss:$8 sps:$4 sm:$0xff]   ;;  %v1364_v24 = vld [vmem:[#allocation5 + $0x90] ss:$8 sps:$4 sm:$0xff]   ;;  %682 = vmatprep.subr.bf16.mxu1 %v1383_v22  ;;  %v1386_v25 = vld [vmem:[#allocation7 + $0x14] ss:$8 sps:$4 sm:$0xff]  }
  0x53   :  { %v1365_v26 = vld [vmem:[#allocation5 + $0xa4] ss:$8 sps:$4 sm:$0xff]   ;;  %683 = vmatpush1.bf16.msra.mxu1 %v1385_v23  ;;  %v1388_v27 = vld [vmem:[#allocation7 + $0x10] ss:$8 sps:$4 sm:$0xff]   ;;  %v1367_v29 = vld [vmem:[#allocation5 + $0xa0] ss:$8 sps:$4 sm:$0xff]  }
  0x54   :  { %326 = vmatpush1.bf16.msra.mxu0 %v1343_v5  ;;  %684 = vmatprep.subr.bf16.mxu1 %v1386_v25  ;;  %v1389_v28 = vld [vmem:[#allocation7 + $0x24] ss:$8 sps:$4 sm:$0xff]   ;;  %v1368_v30 = vld [vmem:[#allocation5 + $0xb4] ss:$8 sps:$4 sm:$0xff]   ;;  %v1391_v31 = vld [vmem:[#allocation7 + $0x20] ss:$8 sps:$4 sm:$0xff]  }
  0x55   :  { %327 = vmatprep.subr.bf16.mxu0 %v1344_v6  ;;  %v1392_v32 = vld [vmem:[#allocation7 + $0x34] ss:$8 sps:$4 sm:$0xff]   ;;  %v1370_v33 = vld [vmem:[#allocation5 + $0xb0] ss:$8 sps:$4 sm:$0xff]   ;;  %v1371_v34 = vld [vmem:[#allocation5 + $0xc4] ss:$8 sps:$4 sm:$0xff]  }
  0x56   :  { %v1394_v35 = vld [vmem:[#allocation7 + $0x30] ss:$8 sps:$4 sm:$0xff]   ;;  %v1395_v36 = vld [vmem:[#allocation7 + $0x44] ss:$8 sps:$4 sm:$0xff]   ;;  %v1373_v37 = vld [vmem:[#allocation5 + $0xc0] ss:$8 sps:$4 sm:$0xff]  }
  0x57   :  { %685 = vmatpush1.bf16.msra.mxu1 %v1388_v27  ;;  %v1374_v38 = vld [vmem:[#allocation5 + $0xd4] ss:$8 sps:$4 sm:$0xff]   ;;  %v1397_v39 = vld [vmem:[#allocation7 + $0x40] ss:$8 sps:$4 sm:$0xff]   ;;  %v1376_v41 = vld [vmem:[#allocation5 + $0xd0] ss:$8 sps:$4 sm:$0xff]  }
  0x58   :  { %328 = vmatpush1.bf16.msra.mxu0 %v1346_v7  ;;  %686 = vmatprep.subr.bf16.mxu1 %v1389_v28  ;;  %v1398_v40 = vld [vmem:[#allocation7 + $0x54] ss:$8 sps:$4 sm:$0xff]   ;;  %v1400_v42 = vld [vmem:[#allocation7 + $0x50] ss:$8 sps:$4 sm:$0xff]   ;;  %v1377_v43 = vld [vmem:[#allocation5 + $0xe4] ss:$8 sps:$4 sm:$0xff]  }
  0x59   :  { %329 = vmatprep.subr.bf16.mxu0 %v1347_v8  ;;  %v1401_v44 = vld [vmem:[#allocation7 + $0x64] ss:$8 sps:$4 sm:$0xff]   ;;  %v1379_v45 = vld [vmem:[#allocation5 + $0xe0] ss:$8 sps:$4 sm:$0xff]   ;;  %v1380_v47 = vld [vmem:[#allocation5 + $0xf4] ss:$8 sps:$4 sm:$0xff]  }
  0x5a   :  { %v1403_v46 = vld [vmem:[#allocation7 + $0x60] ss:$8 sps:$4 sm:$0xff]   ;;  %v1404_v48 = vld [vmem:[#allocation7 + $0x74] ss:$8 sps:$4 sm:$0xff]   ;;  %v1382_v49 = vld [vmem:[#allocation5 + $0xf0] ss:$8 sps:$4 sm:$0xff]  }
  0x5b   :  { %687 = vmatpush1.bf16.msra.mxu1 %v1391_v31  ;;  %v1680_v51 = vld [vmem:[#allocation2 + $0x10] sm:$0xff]  ;;  %v1682_v53 = vld [vmem:[#allocation2 + $0x28] sm:$0xff]  ;;  %v1684_v54 = vld [vmem:[#allocation2 + $0x38] sm:$0xff]  ;;  %s1248_s26 = sshll.u32 %s1589_s3, 4  ;;  %s1249_s26 = int_to_ptr.vmem [resolvable:$true] %s1248_s26 }
  0x5c   :  { %330 = vmatpush1.bf16.msra.mxu0 %v1349_v9  ;;  %688 = vmatprep.subr.bf16.mxu1 %v1392_v32  ;;  %v1406_v52 = vld [vmem:[#allocation7 + $0x70] ss:$8 sps:$4 sm:$0xff]   ;;  %v1407_v55 = vld [vmem:[#allocation7 + $0x84] ss:$8 sps:$4 sm:$0xff]   ;;  %v105_v56 = vpack.c.bf16 %v1680_v51, %v1678_v50  ;;  %v108_v57 = vpack.c.bf16 %v1684_v54, %v1682_v53  ;;  %v1409_v58 = vld [vmem:[#allocation7 + $0x80] ss:$8 sps:$4 sm:$0xff]   ;;  %p1556_p5 = scmp.lt.s32.totalorder %s1249_s26, %s1249_s26 }
  0x5d   :  { %331 = vmatprep.subr.bf16.mxu0 %v1350_v10  ;;  %v1410_v59 = vld [vmem:[#allocation7 + $0x94] ss:$8 sps:$4 sm:$0xff]   ;;  %v1690_v60 = vld [vmem:[#allocation2 + $0x20] sm:$0xff]  ;;  %v1412_v62 = vld [vmem:[#allocation7 + $0x90] ss:$8 sps:$4 sm:$0xff]   ;;  %s1551_s14 = scalar_lea.vmem %s1249_s26, 4096 }
  0x5e   :  { %v1692_v61 = vld [vmem:[#allocation2 + $0x30] sm:$0xff]  ;;  %v1694_v63 = vld [vmem:[#allocation2 + $0x48] sm:$0xff]  ;;  %v1696_v0 = vld [vmem:[#allocation2 + $0x58] sm:$0xff]  ;;  %p1552_p4 = scmp.ne.s32.totalorder %s1249_s26, %s1551_s14  ;;  %p1557_p6 = scmp.lt.s32.totalorder %s1551_s14, %s1551_s14 }
  0x5f   :  { %689 = vmatpush1.bf16.msra.mxu1 %v1394_v35  ;;  %v1413_v1 = vld [vmem:[#allocation7 + $0xa4] ss:$8 sps:$4 sm:$0xff]   ;;  %v107_v2 = vpack.c.bf16 %v1692_v61, %v1690_v60  ;;  %v110_v3 = vpack.c.bf16 %v1696_v0, %v1694_v63  ;;  %v1415_v4 = vld [vmem:[#allocation7 + $0xa0] ss:$8 sps:$4 sm:$0xff]   ;;  %v1416_v5 = vld [vmem:[#allocation7 + $0xb4] ss:$8 sps:$4 sm:$0xff]  }
  0x60   :  { %332 = vmatpush1.bf16.msra.mxu0 %v1352_v11  ;;  %690 = vmatprep.subr.bf16.mxu1 %v1395_v36  ;;  %v1702_v6 = vld [vmem:[#allocation2 + $0x40] sm:$0xff]  ;;  %v1704_v7 = vld [vmem:[#allocation2 + $0x50] sm:$0xff]  ;;  %v1706_v9 = vld [vmem:[#allocation2 + $0x68] sm:$0xff]  ;;  %p1558_p7 = por %p1557_p6, %p1556_p5 }
  0x61   :  { %333 = vmatprep.subr.bf16.mxu0 %v1353_v12  ;;  %v1418_v8 = vld [vmem:[#allocation7 + $0xb0] ss:$8 sps:$4 sm:$0xff]   ;;  %v1419_v11 = vld [vmem:[#allocation7 + $0xc4] ss:$8 sps:$4 sm:$0xff]   ;;  %v109_v12 = vpack.c.bf16 %v1704_v7, %v1702_v6 }
  0x62   :  { %v1708_v10 = vld [vmem:[#allocation2 + $0x78] sm:$0xff]  ;;  %v1728_v25 = vld [vmem:[#allocation2 + $0x90] sm:$0xff]  ;;  %v1742_v32 = vld [vmem:[#allocation2 + $0xc8] sm:$0xff]  ;;  %p1559_p8 = pnand %p1558_p7, %p1552_p4 }
  0x63   :  { %691 = vmatpush1.bf16.msra.mxu1 %v1397_v39  ;;  %v112_v15 = vpack.c.bf16 %v1708_v10, %v1706_v9  ;;  %v1732_v27 = vld [vmem:[#allocation2 + $0xb8] sm:$0xff]  ;;  %v1740_v31 = vld [vmem:[#allocation2 + $0xb0] sm:$0xff]  ;;  %v1750_v36 = vld [vmem:[#allocation2 + $0xc0] sm:$0xff] }
  0x64   :  { %334 = vmatpush1.bf16.msra.mxu0 %v1355_v16  ;;  %692 = vmatprep.subr.bf16.mxu1 %v1398_v40  ;;  %v1421_v16 = vld [vmem:[#allocation7 + $0xc0] ss:$8 sps:$4 sm:$0xff]   ;;  %v1756_v39 = vld [vmem:[#allocation2 + $0xf8] sm:$0xff] }
  0x65   :  { %335 = vmatprep.subr.bf16.mxu0 %v1356_v17  ;;  %v1422_v17 = vld [vmem:[#allocation7 + $0xd4] ss:$8 sps:$4 sm:$0xff]  }
  0x67   :  { %693 = vmatpush1.bf16.msra.mxu1 %v1400_v42  ;;  %v1762_v42 = vld [vmem:[#allocation2 + $0xe0] sm:$0xff] }
  0x68   :  { %336 = vmatpush1.bf16.msra.mxu0 %v1358_v18  ;;  %694 = vmatprep.subr.bf16.mxu1 %v1401_v44  ;;  %v1714_v18 = vld [vmem:[#allocation2 + $0x60] sm:$0xff] }
  0x69   :  { %337 = vmatprep.subr.bf16.mxu0 %v1359_v19  ;;  %v1716_v19 = vld [vmem:[#allocation2 + $0x70] sm:$0xff] }
  0x6a   :  { %v111_v22 = vpack.c.bf16 %v1716_v19, %v1714_v18 }
  0x6b   :  { %695 = vmatpush1.bf16.msra.mxu1 %v1403_v46  ;;  %v1425_v46 = vld [vmem:[#allocation7 + $0xe4] ss:$8 sps:$4 sm:$0xff]  }
  0x6c   :  { %338 = vmatpush1.bf16.msra.mxu0 %v1361_v20  ;;  %696 = vmatprep.subr.bf16.mxu1 %v1404_v48  ;;  %v1718_v20 = vld [vmem:[#allocation2 + $0x88] sm:$0xff]  ;;  %v1428_v48 = vld [vmem:[#allocation7 + $0xf4] ss:$8 sps:$4 sm:$0xff]  }
  0x6d   :  { %339 = vmatprep.subr.bf16.mxu0 %v1362_v21  ;;  %v1720_v21 = vld [vmem:[#allocation2 + $0x98] sm:$0xff] }
  0x6e   :  { %v114_v23 = vpack.c.bf16 %v1720_v21, %v1718_v20 }
  0x6f   :  { %697 = vmatpush1.bf16.msra.mxu1 %v1406_v52  ;;  %v153_v52 = vlaneseq }
  0x70   :  { %340 = vmatpush1.bf16.msra.mxu0 %v1364_v24  ;;  %698 = vmatprep.subr.bf16.mxu1 %v1407_v55  ;;  %v1726_v24 = vld [vmem:[#allocation2 + $0x80] sm:$0xff] }
  0x71   :  { %341 = vmatprep.subr.bf16.mxu0 %v1365_v26  ;;  %v1730_v26 = vld [vmem:[#allocation2 + $0xa8] sm:$0xff]  ;;  %v113_v28 = vpack.c.bf16 %v1728_v25, %v1726_v24  ;;  %v1768_v55 = vshrl.u32 %v153_v52, 7 }
  0x73   :  { %699 = vmatpush1.bf16.msra.mxu1 %v1409_v58  ;;  %v1773_v58 = vld [vmem:[#allocation8 + $0x8] sm:$0xff] }
  0x74   :  { %342 = vmatpush1.bf16.msra.mxu0 %v1367_v29  ;;  %700 = vmatprep.subr.bf16.mxu1 %v1410_v59  ;;  %v116_v29 = vpack.c.bf16 %v1732_v27, %v1730_v26 }
  0x75   :  { %343 = vmatprep.subr.bf16.mxu0 %v1368_v30  ;;  %v1738_v30 = vld [vmem:[#allocation2 + $0xa0] sm:$0xff] }
  0x77   :  { %701 = vmatpush1.bf16.msra.mxu1 %v1412_v62 }
  0x78   :  { %344 = vmatpush1.bf16.msra.mxu0 %v1370_v33  ;;  %702 = vmatprep.subr.bf16.mxu1 %v1413_v1  ;;  %v1744_v33 = vld [vmem:[#allocation2 + $0xd8] sm:$0xff] }
  0x79   :  { %345 = vmatprep.subr.bf16.mxu0 %v1371_v34  ;;  %v115_v34 = vpack.c.bf16 %v1740_v31, %v1738_v30  ;;  %v118_v35 = vpack.c.bf16 %v1744_v33, %v1742_v32 }
  0x7b   :  { %703 = vmatpush1.bf16.msra.mxu1 %v1415_v4 }
  0x7c   :  { %346 = vmatpush1.bf16.msra.mxu0 %v1373_v37  ;;  %704 = vmatprep.subr.bf16.mxu1 %v1416_v5  ;;  %v1752_v37 = vld [vmem:[#allocation2 + $0xd0] sm:$0xff] }
  0x7d   :  { %347 = vmatprep.subr.bf16.mxu0 %v1374_v38  ;;  %v1754_v38 = vld [vmem:[#allocation2 + $0xe8] sm:$0xff]  ;;  %v117_v40 = vpack.c.bf16 %v1752_v37, %v1750_v36 }
  0x7f   :  { %705 = vmatpush1.bf16.msra.mxu1 %v1418_v8 }
  0x80   :  { %348 = vmatpush1.bf16.msra.mxu0 %v1376_v41  ;;  %706 = vmatprep.subr.bf16.mxu1 %v1419_v11  ;;  %v120_v41 = vpack.c.bf16 %v1756_v39, %v1754_v38 }
  0x81   :  { %349 = vmatprep.subr.bf16.mxu0 %v1377_v43  ;;  %v1764_v43 = vld [vmem:[#allocation2 + $0xf0] sm:$0xff] }
  0x82   :  { %v119_v44 = vpack.c.bf16 %v1764_v43, %v1762_v42 }
  0x83   :  { %707 = vmatpush1.bf16.msra.mxu1 %v1421_v16 }
  0x84   :  { %350 = vmatpush1.bf16.msra.mxu0 %v1379_v45  ;;  %708 = vmatprep.subr.bf16.mxu1 %v1422_v17  ;;  %v1424_v45 = vld [vmem:[#allocation7 + $0xd0] ss:$8 sps:$4 sm:$0xff]  }
  0x85   :  { %351 = vmatprep.subr.bf16.mxu0 %v1380_v47  ;;  %v1427_v47 = vld [vmem:[#allocation7 + $0xe0] ss:$8 sps:$4 sm:$0xff]  }
  0x87   :  { %709 = vmatpush1.bf16.msra.mxu1 %v1424_v45 }
  0x88   :  { %352 = vmatpush1.bf16.msra.mxu0 %v1382_v49  ;;  %710 = vmatprep.subr.bf16.mxu1 %v1425_v46  ;;  %v1430_v49 = vld [vmem:[#allocation7 + $0xf0] ss:$8 sps:$4 sm:$0xff]  }
  0x8b   :  { %354 = vmatmul.mubr.bf16.vlgmr.msra.gmra.mrb[0].mxu0 %v105_v56  ;;  %711 = vmatpush1.bf16.msra.mxu1 %v1427_v47  ;;  %v155_v56 = vsub.s32 0, %v1768_v55 }
  0x8c   :  { %363 = vmatprep.mubr.bf16.mxu0 %v108_v57  ;;  %712 = vmatprep.subr.bf16.mxu1 %v1428_v48  ;;  %v1771_v57 = vld [vmem:[#allocation8] sm:$0xff] }
  0x8d   :  { %v1776_v59 = vrot.slane %v1771_v57, %v155_v56  ;;  %v1779_v62 = vrot.slane %v1773_v58, %v155_v56 }
  0x8f   :  { %713 = vmatpush1.bf16.msra.mxu1 %v1430_v49 }
  0x93   :  { %364 = vmatmul.mubr.bf16.gmra.mrb[4].mxu0 %v107_v2 }
  0x94   :  { %373 = vmatprep.mubr.bf16.mxu0 %v110_v3 }
  0x9b   :  { %374 = vmatmul.mubr.bf16.gmra.mrb[8].mxu0 %v109_v12 }
  0x9c   :  { %383 = vmatprep.mubr.bf16.mxu0 %v112_v15 }
  0xa3   :  { %384 = vmatmul.mubr.bf16.gmra.mrb[12].mxu0 %v111_v22 }
  0xa4   :  { %393 = vmatprep.mubr.bf16.mxu0 %v114_v23 }
  0xab   :  { %394 = vmatmul.mubr.bf16.gmra.mrb[16].mxu0 %v113_v28 }
  0xac   :  { %403 = vmatprep.mubr.bf16.mxu0 %v116_v29 }
  0xb3   :  { %404 = vmatmul.mubr.bf16.gmra.mrb[20].mxu0 %v115_v34 }
  0xb4   :  { %413 = vmatprep.mubr.bf16.mxu0 %v118_v35 }
  0xbb   :  { %414 = vmatmul.mubr.bf16.gmra.mrb[24].mxu0 %v117_v40 }
  0xbc   :  { %423 = vmatprep.mubr.bf16.mxu0 %v120_v41 }
  0xc3   :  { %424 = vmatmul.mubr.bf16.gmra.mrb[28].mxu0 %v119_v44 }
 0x15e   :  { %v355_v1 = vpop.f32.mrb[0].mxu0 }
 0x15f   :  { %v356_v2 = vadd.f32 %v355_v1, %v1776_v59  ;;  %v357_v3 = vpop.f32.mrb[1].mxu0 }
 0x160   :  { %v358_v4 = vadd.f32 %v357_v3, %v1779_v62  ;;  %v359_v5 = vpop.f32.mrb[2].mxu0 }
 0x161   :  { %v360_v8 = vadd.f32 %v359_v5, %v1776_v59  ;;  %v361_v11 = vpop.f32.mrb[3].mxu0  ;;  %v434_v15 = vmax.f32 %v356_v2, 0.0 }
 0x162   :  { %v362_v12 = vadd.f32 %v361_v11, %v1779_v62  ;;  %v435_v17 = vmax.f32 %v358_v4, 0.0 }
 0x163   :  { %v436_v16 = vmax.f32 %v360_v8, 0.0 }
 0x164   :  { %v437_v22 = vmax.f32 %v362_v12, 0.0 }
 0x165   :  { %v466_v23 = vpack.c.bf16 %v436_v16, %v434_v15 }
 0x166   :  { %v365_v28 = vpop.f32.mrb[4].mxu0  ;;  %v467_v29 = vpack.c.bf16 %v437_v22, %v435_v17 }
 0x167   :  { %v366_v34 = vadd.f32 %v365_v28, %v1776_v59  ;;  %v367_v35 = vpop.f32.mrb[5].mxu0 }
 0x168   :  { %v368_v40 = vadd.f32 %v367_v35, %v1779_v62  ;;  %v369_v41 = vpop.f32.mrb[6].mxu0  ;;  %714 = vmatprep.mubr.bf16.mxu1 %v467_v29 }
 0x169   :  { %v370_v44 = vadd.f32 %v369_v41, %v1776_v59  ;;  %v371_v45 = vpop.f32.mrb[7].mxu0  ;;  %715 = vmatmul.mubr.bf16.vlgmr.msra.gmra.mrb[0].mxu1 %v466_v23  ;;  %v438_v47 = vmax.f32 %v366_v34, 0.0 }
 0x16a   :  { %v372_v46 = vadd.f32 %v371_v45, %v1779_v62  ;;  %v439_v49 = vmax.f32 %v368_v40, 0.0 }
 0x16b   :  { %v440_v48 = vmax.f32 %v370_v44, 0.0 }
 0x16c   :  { %v441_v52 = vmax.f32 %v372_v46, 0.0 }
 0x16d   :  { %v468_v56 = vpack.c.bf16 %v440_v48, %v438_v47 }
 0x16e   :  { %v469_v1 = vpack.c.bf16 %v441_v52, %v439_v49  ;;  %v375_v2 = vpop.f32.mrb[8].mxu0 }
 0x16f   :  { %v376_v3 = vadd.f32 %v375_v2, %v1776_v59  ;;  %v377_v4 = vpop.f32.mrb[9].mxu0 }
 0x170   :  { %v378_v5 = vadd.f32 %v377_v4, %v1779_v62  ;;  %v379_v8 = vpop.f32.mrb[10].mxu0  ;;  %724 = vmatprep.mubr.bf16.mxu1 %v469_v1 }
 0x171   :  { %v442_v11 = vmax.f32 %v376_v3, 0.0  ;;  %v380_v12 = vadd.f32 %v379_v8, %v1776_v59  ;;  %v381_v15 = vpop.f32.mrb[11].mxu0  ;;  %725 = vmatmul.mubr.bf16.gmra.mrb[4].mxu1 %v468_v56 }
 0x172   :  { %v443_v16 = vmax.f32 %v378_v5, 0.0  ;;  %v382_v17 = vadd.f32 %v381_v15, %v1779_v62 }
 0x173   :  { %v444_v22 = vmax.f32 %v380_v12, 0.0 }
 0x174   :  { %v445_v23 = vmax.f32 %v382_v17, 0.0 }
 0x175   :  { %v470_v28 = vpack.c.bf16 %v444_v22, %v442_v11 }
 0x176   :  { %v471_v29 = vpack.c.bf16 %v445_v23, %v443_v16  ;;  %v385_v34 = vpop.f32.mrb[12].mxu0 }
 0x177   :  { %v386_v35 = vadd.f32 %v385_v34, %v1776_v59  ;;  %v387_v40 = vpop.f32.mrb[13].mxu0 }
 0x178   :  { %v388_v41 = vadd.f32 %v387_v40, %v1779_v62  ;;  %v389_v44 = vpop.f32.mrb[14].mxu0  ;;  %734 = vmatprep.mubr.bf16.mxu1 %v471_v29 }
 0x179   :  { %v446_v45 = vmax.f32 %v386_v35, 0.0  ;;  %v390_v46 = vadd.f32 %v389_v44, %v1776_v59  ;;  %v391_v47 = vpop.f32.mrb[15].mxu0  ;;  %735 = vmatmul.mubr.bf16.gmra.mrb[8].mxu1 %v470_v28 }
 0x17a   :  { %v447_v48 = vmax.f32 %v388_v41, 0.0  ;;  %v392_v49 = vadd.f32 %v391_v47, %v1779_v62 }
 0x17b   :  { %v448_v52 = vmax.f32 %v390_v46, 0.0 }
 0x17c   :  { %v449_v56 = vmax.f32 %v392_v49, 0.0 }
 0x17d   :  { %v472_v1 = vpack.c.bf16 %v448_v52, %v446_v45 }
 0x17e   :  { %v473_v2 = vpack.c.bf16 %v449_v56, %v447_v48  ;;  %v395_v3 = vpop.f32.mrb[16].mxu0 }
 0x17f   :  { %v396_v4 = vadd.f32 %v395_v3, %v1776_v59  ;;  %v397_v5 = vpop.f32.mrb[17].mxu0 }
 0x180   :  { %v398_v8 = vadd.f32 %v397_v5, %v1779_v62  ;;  %v399_v11 = vpop.f32.mrb[18].mxu0  ;;  %744 = vmatprep.mubr.bf16.mxu1 %v473_v2 }
 0x181   :  { %v450_v12 = vmax.f32 %v396_v4, 0.0  ;;  %v400_v15 = vadd.f32 %v399_v11, %v1776_v59  ;;  %v401_v16 = vpop.f32.mrb[19].mxu0  ;;  %745 = vmatmul.mubr.bf16.gmra.mrb[12].mxu1 %v472_v1 }
 0x182   :  { %v451_v17 = vmax.f32 %v398_v8, 0.0  ;;  %v402_v22 = vadd.f32 %v401_v16, %v1779_v62 }
 0x183   :  { %v452_v23 = vmax.f32 %v400_v15, 0.0 }
 0x184   :  { %v453_v28 = vmax.f32 %v402_v22, 0.0 }
 0x185   :  { %v474_v29 = vpack.c.bf16 %v452_v23, %v450_v12 }
 0x186   :  { %v475_v34 = vpack.c.bf16 %v453_v28, %v451_v17  ;;  %v405_v35 = vpop.f32.mrb[20].mxu0 }
 0x187   :  { %v406_v40 = vadd.f32 %v405_v35, %v1776_v59  ;;  %v407_v41 = vpop.f32.mrb[21].mxu0 }
 0x188   :  { %v408_v44 = vadd.f32 %v407_v41, %v1779_v62  ;;  %v409_v45 = vpop.f32.mrb[22].mxu0  ;;  %754 = vmatprep.mubr.bf16.mxu1 %v475_v34 }
 0x189   :  { %v454_v46 = vmax.f32 %v406_v40, 0.0  ;;  %v410_v47 = vadd.f32 %v409_v45, %v1776_v59  ;;  %v411_v48 = vpop.f32.mrb[23].mxu0  ;;  %755 = vmatmul.mubr.bf16.gmra.mrb[16].mxu1 %v474_v29 }
 0x18a   :  { %v455_v49 = vmax.f32 %v408_v44, 0.0  ;;  %v412_v52 = vadd.f32 %v411_v48, %v1779_v62 }
 0x18b   :  { %v456_v56 = vmax.f32 %v410_v47, 0.0 }
 0x18c   :  { %v457_v1 = vmax.f32 %v412_v52, 0.0 }
 0x18d   :  { %v476_v2 = vpack.c.bf16 %v456_v56, %v454_v46 }
 0x18e   :  { %v477_v3 = vpack.c.bf16 %v457_v1, %v455_v49  ;;  %v415_v4 = vpop.f32.mrb[24].mxu0 }
 0x18f   :  { %v416_v5 = vadd.f32 %v415_v4, %v1776_v59  ;;  %v417_v8 = vpop.f32.mrb[25].mxu0 }
 0x190   :  { %v418_v11 = vadd.f32 %v417_v8, %v1779_v62  ;;  %v419_v12 = vpop.f32.mrb[26].mxu0  ;;  %764 = vmatprep.mubr.bf16.mxu1 %v477_v3 }
 0x191   :  { %v458_v15 = vmax.f32 %v416_v5, 0.0  ;;  %v420_v16 = vadd.f32 %v419_v12, %v1776_v59  ;;  %v421_v17 = vpop.f32.mrb[27].mxu0  ;;  %765 = vmatmul.mubr.bf16.gmra.mrb[20].mxu1 %v476_v2  ;;  %v516_v5 = vsub.s32 1, %v1768_v55 }
 0x192   :  { %v459_v22 = vmax.f32 %v418_v11, 0.0  ;;  %v422_v23 = vadd.f32 %v421_v17, %v1779_v62 }
 0x193   :  { %v460_v28 = vmax.f32 %v420_v16, 0.0  ;;  %v1815_v8 = vrot.slane %v1771_v57, %v516_v5  ;;  %v1818_v11 = vrot.slane %v1773_v58, %v516_v5 }
 0x194   :  { %v461_v29 = vmax.f32 %v422_v23, 0.0 }
 0x195   :  { %v478_v34 = vpack.c.bf16 %v460_v28, %v458_v15 }
 0x196   :  { %v479_v35 = vpack.c.bf16 %v461_v29, %v459_v22  ;;  %v425_v40 = vpop.f32.mrb[28].mxu0 }
 0x197   :  { %v426_v41 = vadd.f32 %v425_v40, %v1776_v59  ;;  %v427_v44 = vpop.f32.mrb[29].mxu0 }
 0x198   :  { %v428_v45 = vadd.f32 %v427_v44, %v1779_v62  ;;  %v429_v46 = vpop.f32.mrb[30].mxu0  ;;  %774 = vmatprep.mubr.bf16.mxu1 %v479_v35 }
 0x199   :  { %v462_v47 = vmax.f32 %v426_v41, 0.0  ;;  %v430_v48 = vadd.f32 %v429_v46, %v1776_v59  ;;  %v431_v49 = vpop.f32.mrb[31].mxu0  ;;  %775 = vmatmul.mubr.bf16.gmra.mrb[24].mxu1 %v478_v34 }
 0x19a   :  { %v463_v52 = vmax.f32 %v428_v45, 0.0  ;;  %v432_v56 = vadd.f32 %v431_v49, %v1779_v62 }
 0x19b   :  { %v464_v1 = vmax.f32 %v430_v48, 0.0 }
 0x19c   :  { %v465_v2 = vmax.f32 %v432_v56, 0.0 }
 0x19d   :  { %v480_v3 = vpack.c.bf16 %v464_v1, %v462_v47 }
 0x19e   :  { %v481_v4 = vpack.c.bf16 %v465_v2, %v463_v52 }
 0x1a0   :  { %784 = vmatprep.mubr.bf16.mxu1 %v481_v4 }
 0x1a1   :  { %785 = vmatmul.mubr.bf16.gmra.mrb[28].mxu1 %v480_v3 }
 0x23c   :  { %v716_v59 = vpop.f32.mrb[0].mxu1 }
 0x23d   :  { %v717_v12 = vadd.f32 %v716_v59, %v1815_v8  ;;  %v718_v15 = vpop.f32.mrb[1].mxu1 }
 0x23e   :  { %v719_v62 = vadd.f32 %v718_v15, %v1818_v11  ;;  %v720_v16 = vpop.f32.mrb[2].mxu1 }
 0x23f   :  { %v1823_v17 = vadd.f32 %v717_v12, %v1678_v50  ;;  %v721_v22 = vadd.f32 %v720_v16, %v1815_v8  ;;  %v722_v23 = vpop.f32.mrb[3].mxu1 }
 0x240   :  { %v1827_v28 = vadd.f32 %v719_v62, %v1672_v13  ;;  %v723_v29 = vadd.f32 %v722_v23, %v1818_v11 }
 0x241   :  { %v1831_v34 = vadd.f32 %v721_v22, %v1680_v51  ;;  %v891_v51 = vmul.f32 %v1823_v17, %v1823_v17 }
 0x242   :  { %v1834_v35 = vadd.f32 %v723_v29, %v1674_v14  ;;  %v827_v40 = vadd.f32 %v1827_v28, %v1823_v17  ;;  %v892_v14 = vmul.f32 %v1827_v28, %v1827_v28 }
 0x243   :  { %v893_v50 = vmul.f32 %v1831_v34, %v1831_v34 }
 0x244   :  { %v726_v41 = vpop.f32.mrb[4].mxu1  ;;  %828 = vadd.xlane.f32.xlu0 %v827_v40  ;;  %v894_v13 = vmul.f32 %v1834_v35, %v1834_v35  ;;  %v830_v49 = vadd.f32 %v1834_v35, %v1831_v34  ;;  %v923_v5 = vadd.f32 %v892_v14, %v891_v51 }
 0x245   :  { %v727_v44 = vadd.f32 %v726_v41, %v1815_v8  ;;  %v728_v45 = vpop.f32.mrb[5].mxu1 }
 0x246   :  { %v729_v46 = vadd.f32 %v728_v45, %v1818_v11  ;;  %v730_v47 = vpop.f32.mrb[6].mxu1  ;;  %v926_v48 = vadd.f32 %v894_v13, %v893_v50 }
 0x247   :  { %v1851_v52 = vadd.f32 %v727_v44, %v1690_v60  ;;  %v731_v56 = vadd.f32 %v730_v47, %v1815_v8  ;;  %v732_v1 = vpop.f32.mrb[7].mxu1 }
 0x248   :  { %v1855_v2 = vadd.f32 %v729_v46, %v1682_v53  ;;  %v733_v3 = vadd.f32 %v732_v1, %v1818_v11  ;;  %927 = vadd.xlane.f32.xlu1 %v926_v48  ;;  %831 = vadd.xlane.f32.xlu0 %v830_v49 }
 0x249   :  { %v1859_v4 = vadd.f32 %v731_v56, %v1692_v61  ;;  %v895_v12 = vmul.f32 %v1851_v52, %v1851_v52 }
 0x24a   :  { %v1862_v59 = vadd.f32 %v733_v3, %v1684_v54  ;;  %v833_v60 = vadd.f32 %v1855_v2, %v1851_v52  ;;  %v896_v53 = vmul.f32 %v1855_v2, %v1855_v2 }
 0x24b   :  { %v897_v16 = vmul.f32 %v1859_v4, %v1859_v4 }
 0x24c   :  { %v736_v15 = vpop.f32.mrb[8].mxu1  ;;  %834 = vadd.xlane.f32.xlu1 %v833_v60  ;;  %924 = vadd.xlane.f32.xlu0 %v923_v5  ;;  %v898_v54 = vmul.f32 %v1862_v59, %v1862_v59  ;;  %v836_v29 = vadd.f32 %v1862_v59, %v1859_v4  ;;  %v929_v40 = vadd.f32 %v896_v53, %v895_v12 }
 0x24d   :  { %v737_v62 = vadd.f32 %v736_v15, %v1815_v8  ;;  %v738_v61 = vpop.f32.mrb[9].mxu1 }
 0x24e   :  { %v739_v22 = vadd.f32 %v738_v61, %v1818_v11  ;;  %v740_v23 = vpop.f32.mrb[10].mxu1  ;;  %v932_v14 = vadd.f32 %v898_v54, %v897_v16 }
 0x24f   :  { %v1879_v50 = vadd.f32 %v737_v62, %v1702_v6  ;;  %v741_v41 = vadd.f32 %v740_v23, %v1815_v8  ;;  %v742_v13 = vpop.f32.mrb[11].mxu1 }
 0x250   :  { %v1883_v44 = vadd.f32 %v739_v22, %v1694_v63  ;;  %v743_v45 = vadd.f32 %v742_v13, %v1818_v11  ;;  %837 = vadd.xlane.f32.xlu1 %v836_v29  ;;  %930 = vadd.xlane.f32.xlu0 %v929_v40 }
 0x251   :  { %v1887_v51 = vadd.f32 %v741_v41, %v1704_v7  ;;  %v899_v47 = vmul.f32 %v1879_v50, %v1879_v50 }
 0x252   :  { %v1890_v46 = vadd.f32 %v743_v45, %v1696_v0  ;;  %v839_v6 = vadd.f32 %v1883_v44, %v1879_v50  ;;  %v900_v63 = vmul.f32 %v1883_v44, %v1883_v44 }
 0x253   :  { %v901_v56 = vmul.f32 %v1887_v51, %v1887_v51 }
 0x254   :  { %v746_v48 = vpop.f32.mrb[12].mxu1  ;;  %933 = vadd.xlane.f32.xlu1 %v932_v14  ;;  %840 = vadd.xlane.f32.xlu0 %v839_v6  ;;  %v902_v0 = vmul.f32 %v1890_v46, %v1890_v46  ;;  %v842_v5 = vadd.f32 %v1890_v46, %v1887_v51  ;;  %v935_v60 = vadd.f32 %v900_v63, %v899_v47 }
 0x255   :  { %v747_v49 = vadd.f32 %v746_v48, %v1815_v8  ;;  %v748_v7 = vpop.f32.mrb[13].mxu1 }
 0x256   :  { %v749_v1 = vadd.f32 %v748_v7, %v1818_v11  ;;  %v750_v3 = vpop.f32.mrb[14].mxu1  ;;  %v938_v54 = vadd.f32 %v902_v0, %v901_v56 }
 0x257   :  { %v1907_v12 = vadd.f32 %v747_v49, %v1714_v18  ;;  %v751_v53 = vadd.f32 %v750_v3, %v1815_v8  ;;  %v752_v15 = vpop.f32.mrb[15].mxu1 }
 0x258   :  { %v1911_v62 = vadd.f32 %v749_v1, %v1706_v9  ;;  %v753_v61 = vadd.f32 %v752_v15, %v1818_v11  ;;  %843 = vadd.xlane.f32.xlu1 %v842_v5  ;;  %936 = vadd.xlane.f32.xlu0 %v935_v60 }
 0x259   :  { %v1915_v16 = vadd.f32 %v751_v53, %v1716_v19  ;;  %v903_v23 = vmul.f32 %v1907_v12, %v1907_v12 }
 0x25a   :  { %v1918_v22 = vadd.f32 %v753_v61, %v1708_v10  ;;  %v845_v18 = vadd.f32 %v1911_v62, %v1907_v12  ;;  %v904_v9 = vmul.f32 %v1911_v62, %v1911_v62 }
 0x25b   :  { %v905_v41 = vmul.f32 %v1915_v16, %v1915_v16 }
 0x25c   :  { %v756_v29 = vpop.f32.mrb[16].mxu1  ;;  %939 = vadd.xlane.f32.xlu1 %v938_v54  ;;  %846 = vadd.xlane.f32.xlu0 %v845_v18  ;;  %v906_v10 = vmul.f32 %v1918_v22, %v1918_v22  ;;  %v848_v14 = vadd.f32 %v1918_v22, %v1915_v16  ;;  %v941_v6 = vadd.f32 %v904_v9, %v903_v23 }
 0x25d   :  { %v757_v40 = vadd.f32 %v756_v29, %v1815_v8  ;;  %v758_v19 = vpop.f32.mrb[17].mxu1 }
 0x25e   :  { %v759_v13 = vadd.f32 %v758_v19, %v1818_v11  ;;  %v760_v45 = vpop.f32.mrb[18].mxu1  ;;  %v944_v0 = vadd.f32 %v906_v10, %v905_v41 }
 0x25f   :  { %v1935_v47 = vadd.f32 %v757_v40, %v1726_v24  ;;  %v761_v63 = vadd.f32 %v760_v45, %v1815_v8  ;;  %v762_v48 = vpop.f32.mrb[19].mxu1 }
 0x260   :  { %v1939_v49 = vadd.f32 %v759_v13, %v1718_v20  ;;  %v763_v7 = vadd.f32 %v762_v48, %v1818_v11  ;;  %849 = vadd.xlane.f32.xlu1 %v848_v14  ;;  %942 = vadd.xlane.f32.xlu0 %v941_v6 }
 0x261   :  { %v1943_v56 = vadd.f32 %v761_v63, %v1728_v25  ;;  %v907_v3 = vmul.f32 %v1935_v47, %v1935_v47 }
 0x262   :  { %v1946_v1 = vadd.f32 %v763_v7, %v1720_v21  ;;  %v851_v24 = vadd.f32 %v1939_v49, %v1935_v47  ;;  %v908_v20 = vmul.f32 %v1939_v49, %v1939_v49 }
 0x263   :  { %v909_v53 = vmul.f32 %v1943_v56, %v1943_v56 }
 0x264   :  { %v766_v5 = vpop.f32.mrb[20].mxu1  ;;  %945 = vadd.xlane.f32.xlu1 %v944_v0  ;;  %852 = vadd.xlane.f32.xlu0 %v851_v24  ;;  %v910_v21 = vmul.f32 %v1946_v1, %v1946_v1  ;;  %v854_v54 = vadd.f32 %v1946_v1, %v1943_v56  ;;  %v947_v18 = vadd.f32 %v908_v20, %v907_v3 }
 0x265   :  { %v767_v60 = vadd.f32 %v766_v5, %v1815_v8  ;;  %v768_v25 = vpop.f32.mrb[21].mxu1 }
 0x266   :  { %v769_v15 = vadd.f32 %v768_v25, %v1818_v11  ;;  %v770_v61 = vpop.f32.mrb[22].mxu1  ;;  %v950_v10 = vadd.f32 %v910_v21, %v909_v53 }
 0x267   :  { %v1963_v23 = vadd.f32 %v767_v60, %v1738_v30  ;;  %v771_v9 = vadd.f32 %v770_v61, %v1815_v8  ;;  %v772_v29 = vpop.f32.mrb[23].mxu1 }
 0x268   :  { %v1967_v40 = vadd.f32 %v769_v15, %v1730_v26  ;;  %v773_v19 = vadd.f32 %v772_v29, %v1818_v11  ;;  %855 = vadd.xlane.f32.xlu1 %v854_v54  ;;  %948 = vadd.xlane.f32.xlu0 %v947_v18 }
 0x269   :  { %v1971_v41 = vadd.f32 %v771_v9, %v1740_v31  ;;  %v911_v45 = vmul.f32 %v1963_v23, %v1963_v23 }
 0x26a   :  { %v1974_v13 = vadd.f32 %v773_v19, %v1732_v27  ;;  %v857_v30 = vadd.f32 %v1967_v40, %v1963_v23  ;;  %v912_v26 = vmul.f32 %v1967_v40, %v1967_v40 }
 0x26b   :  { %v913_v63 = vmul.f32 %v1971_v41, %v1971_v41 }
 0x26c   :  { %v776_v14 = vpop.f32.mrb[24].mxu1  ;;  %951 = vadd.xlane.f32.xlu1 %v950_v10  ;;  %858 = vadd.xlane.f32.xlu0 %v857_v30  ;;  %v914_v27 = vmul.f32 %v1974_v13, %v1974_v13  ;;  %v860_v0 = vadd.f32 %v1974_v13, %v1971_v41  ;;  %v953_v24 = vadd.f32 %v912_v26, %v911_v45 }
 0x26d   :  { %v777_v6 = vadd.f32 %v776_v14, %v1815_v8  ;;  %v778_v31 = vpop.f32.mrb[25].mxu1 }
 0x26e   :  { %v779_v48 = vadd.f32 %v778_v31, %v1818_v11  ;;  %v780_v7 = vpop.f32.mrb[26].mxu1  ;;  %v956_v21 = vadd.f32 %v914_v27, %v913_v63 }
 0x26f   :  { %v1991_v3 = vadd.f32 %v777_v6, %v1750_v36  ;;  %v781_v20 = vadd.f32 %v780_v7, %v1815_v8  ;;  %v782_v5 = vpop.f32.mrb[27].mxu1 }
 0x270   :  { %v1995_v60 = vadd.f32 %v779_v48, %v1742_v32  ;;  %v783_v25 = vadd.f32 %v782_v5, %v1818_v11  ;;  %861 = vadd.xlane.f32.xlu1 %v860_v0  ;;  %954 = vadd.xlane.f32.xlu0 %v953_v24 }
 0x271   :  { %v1999_v53 = vadd.f32 %v781_v20, %v1752_v37  ;;  %v915_v61 = vmul.f32 %v1991_v3, %v1991_v3 }
 0x272   :  { %v2002_v15 = vadd.f32 %v783_v25, %v1744_v33  ;;  %v863_v36 = vadd.f32 %v1995_v60, %v1991_v3  ;;  %v916_v32 = vmul.f32 %v1995_v60, %v1995_v60 }
 0x273   :  { %v917_v9 = vmul.f32 %v1999_v53, %v1999_v53 }
 0x274   :  { %v786_v54 = vpop.f32.mrb[28].mxu1  ;;  %957 = vadd.xlane.f32.xlu1 %v956_v21  ;;  %864 = vadd.xlane.f32.xlu0 %v863_v36  ;;  %v918_v33 = vmul.f32 %v2002_v15, %v2002_v15  ;;  %v866_v10 = vadd.f32 %v2002_v15, %v1999_v53  ;;  %v959_v30 = vadd.f32 %v916_v32, %v915_v61 }
 0x275   :  { %v787_v18 = vadd.f32 %v786_v54, %v1815_v8  ;;  %v788_v37 = vpop.f32.mrb[29].mxu1 }
 0x276   :  { %v789_v29 = vadd.f32 %v788_v37, %v1818_v11  ;;  %v790_v19 = vpop.f32.mrb[30].mxu1  ;;  %v962_v27 = vadd.f32 %v918_v33, %v917_v9 }
 0x277   :  { %v2019_v45 = vadd.f32 %v787_v18, %v1762_v42  ;;  %v791_v26 = vadd.f32 %v790_v19, %v1815_v8  ;;  %v792_v14 = vpop.f32.mrb[31].mxu1 }
 0x278   :  { %v2023_v6 = vadd.f32 %v789_v29, %v1754_v38  ;;  %v793_v31 = vadd.f32 %v792_v14, %v1818_v11  ;;  %867 = vadd.xlane.f32.xlu1 %v866_v10  ;;  %960 = vadd.xlane.f32.xlu0 %v959_v30 }
 0x279   :  { %v2027_v63 = vadd.f32 %v791_v26, %v1764_v43  ;;  %v919_v8 = vmul.f32 %v2019_v45, %v2019_v45 }
 0x27a   :  { %v2030_v48 = vadd.f32 %v793_v31, %v1756_v39  ;;  %v869_v42 = vadd.f32 %v2023_v6, %v2019_v45  ;;  %v920_v38 = vmul.f32 %v2023_v6, %v2023_v6 }
 0x27b   :  { %v921_v7 = vmul.f32 %v2027_v63, %v2027_v63 }
 0x27c   :  { %963 = vadd.xlane.f32.xlu1 %v962_v27  ;;  %870 = vadd.xlane.f32.xlu0 %v869_v42  ;;  %v872_v11 = vadd.f32 %v2030_v48, %v2027_v63  ;;  %v965_v43 = vadd.f32 %v920_v38, %v919_v8  ;;  %v922_v39 = vmul.f32 %v2030_v48, %v2030_v48 }
 0x27e   :  { %v968_v0 = vadd.f32 %v922_v39, %v921_v7 }
 0x280   :  { %873 = vadd.xlane.f32.xlu1 %v872_v11  ;;  %966 = vadd.xlane.f32.xlu0 %v965_v43 }
 0x284   :  { %969 = vadd.xlane.f32.xlu1 %v968_v0 }
 0x2d1   :  { %v829_v24 = vpop.xlane.xlu0 %828 }
 0x2d2   :  { %v2044_v25 = vmul.f32 0.03125, %v829_v24 }
 0x2d4   :  { %v987_v37 = vmul.f32 %v2044_v25, %v2044_v25 }
 0x2d5   :  { %v928_v20 = vpop.xlane.xlu1 %927  ;;  %v832_v5 = vpop.xlane.xlu0 %831 }
 0x2d6   :  { %v876_v21 = vmul.f32 0.03125, %v832_v5  ;;  %v972_v36 = vmul.f32 0.03125, %v928_v20  ;;  %v1133_v20 = vsub.s32 2, %v1768_v55  ;;  %v1173_v5 = vsub.s32 3, %v1768_v55 }
 0x2d8   :  { %v988_v61 = vmul.f32 %v876_v21, %v876_v21 }
 0x2d9   :  { %v835_v32 = vpop.xlane.xlu1 %834  ;;  %v925_v54 = vpop.xlane.xlu0 %924 }
 0x2da   :  { %v1004_v18 = vsub.f32 %v972_v36, %v988_v61  ;;  %v971_v9 = vmul.f32 0.03125, %v925_v54  ;;  %v2048_v33 = vmul.f32 0.03125, %v835_v32 }
 0x2dc   :  { %v1020_v29 = vmax.f32 %v1004_v18, 0.0  ;;  %v1003_v19 = vsub.f32 %v971_v9, %v987_v37  ;;  %v989_v42 = vmul.f32 %v2048_v33, %v2048_v33 }
 0x2dd   :  { %v838_v10 = vpop.xlane.xlu1 %837  ;;  %v931_v30 = vpop.xlane.xlu0 %930 }
 0x2de   :  { %v1068_v26 = vadd.f32 1e-05, %v1020_v29  ;;  %v1019_v14 = vmax.f32 %v1003_v19, 0.0  ;;  %v2050_v31 = vmul.f32 0.03125, %v838_v10  ;;  %v973_v27 = vmul.f32 0.03125, %v931_v30 }
 0x2df   :  { %v2065_v19 = vrot.slane %v1771_v57, %v1133_v20  ;;  %v2068_v10 = vrot.slane %v1771_v57, %v1173_v5 }
 0x2e0   :  { %1431 = vrsqrt.f32 %v1068_v26  ;;  %v1067_v8 = vadd.f32 1e-05, %v1019_v14  ;;  %v1005_v38 = vsub.f32 %v973_v27, %v989_v42  ;;  %v990_v7 = vmul.f32 %v2050_v31, %v2050_v31 }
 0x2e1   :  { %v934_v11 = vpop.xlane.xlu1 %933  ;;  %v841_v43 = vpop.xlane.xlu0 %840  ;;  %v2071_v26 = vrot.slane %v1773_v58, %v1133_v20  ;;  %v2074_v14 = vrot.slane %v1773_v58, %v1173_v5  ;;  %v1037_v27 = vsub.f32 %v1831_v34, %v876_v21  ;;  %v1038_v42 = vsub.f32 %v1834_v35, %v876_v21 }
 0x2e2   :  { %1433 = vrsqrt.f32 %v1067_v8  ;;  %v974_v39 = vmul.f32 0.03125, %v934_v11  ;;  %v2056_v0 = vmul.f32 0.03125, %v841_v43  ;;  %v1021_v24 = vmax.f32 %v1005_v38, 0.0 }
 0x2e3   :  { %v1036_v58 = vsub.f32 %v1827_v28, %v2044_v25 }
 0x2e4   :  { %v1006_v36 = vsub.f32 %v974_v39, %v990_v7  ;;  %v1069_v61 = vadd.f32 1e-05, %v1021_v24  ;;  %v991_v9 = vmul.f32 %v2056_v0, %v2056_v0  ;;  %v1035_v39 = vsub.f32 %v1823_v17, %v2044_v25 }
 0x2e5   :  { %v844_v32 = vpop.xlane.xlu1 %843  ;;  %v937_v54 = vpop.xlane.xlu0 %936  ;;  %v1039_v17 = vsub.f32 %v1851_v52, %v2048_v33 }
 0x2e6   :  { %v1022_v18 = vmax.f32 %v1006_v36, 0.0  ;;  %v2060_v37 = vmul.f32 0.03125, %v844_v32  ;;  %v975_v29 = vmul.f32 0.03125, %v937_v54  ;;  %1435 = vrsqrt.f32 %v1069_v61 }
 0x2e8   :  { %v1070_v30 = vadd.f32 1e-05, %v1022_v18  ;;  %v1007_v55 = vsub.f32 %v975_v29, %v991_v9  ;;  %v992_v57 = vmul.f32 %v2060_v37, %v2060_v37 }
 0x2e9   :  { %v940_v8 = vpop.xlane.xlu1 %939  ;;  %v847_v38 = vpop.xlane.xlu0 %846 }
 0x2ea   :  { %v1432_v11 = vpop.eup %1431  ;;  %1437 = vrsqrt.f32 %v1070_v30  ;;  %v1023_v43 = vmax.f32 %v1007_v55, 0.0  ;;  %v976_v7 = vmul.f32 0.03125, %v940_v8  ;;  %v2084_v21 = vmul.f32 0.03125, %v847_v38 }
 0x2eb   :  { %v1101_v24 = vmul.f32 %v1432_v11, %v1037_v27  ;;  %v1102_v20 = vmul.f32 %v1432_v11, %v1038_v42  ;;  %v1040_v42 = vsub.f32 %v1855_v2, %v2048_v33  ;;  %v1041_v2 = vsub.f32 %v1859_v4, %v2050_v31 }
 0x2ec   :  { %v1434_v34 = vpop.eup %1433  ;;  %v1071_v5 = vadd.f32 1e-05, %v1023_v43  ;;  %v1008_v35 = vsub.f32 %v976_v7, %v992_v57  ;;  %v993_v38 = vmul.f32 %v2084_v21, %v2084_v21  ;;  %v1042_v33 = vsub.f32 %v1862_v59, %v2050_v31 }
 0x2ed   :  { %v1141_v36 = vmul.f32 %v2065_v19, %v1101_v24  ;;  %v1142_v61 = vmul.f32 %v2071_v26, %v1102_v20  ;;  %v1099_v32 = vmul.f32 %v1434_v34, %v1035_v39  ;;  %v1100_v54 = vmul.f32 %v1434_v34, %v1036_v58  ;;  %v850_v18 = vpop.xlane.xlu1 %849  ;;  %v943_v9 = vpop.xlane.xlu0 %942 }
 0x2ee   :  { %1439 = vrsqrt.f32 %v1071_v5  ;;  %v1024_v28 = vmax.f32 %v1008_v35, 0.0  ;;  %v2090_v25 = vmul.f32 0.03125, %v850_v18  ;;  %v977_v52 = vmul.f32 0.03125, %v943_v9 }
 0x2ef   :  { %v1181_v29 = vadd.f32 %v2068_v10, %v1141_v36  ;;  %v1182_v30 = vadd.f32 %v2074_v14, %v1142_v61  ;;  %v1139_v55 = vmul.f32 %v2065_v19, %v1099_v32  ;;  %v1140_v27 = vmul.f32 %v2071_v26, %v1100_v54 }
 0x2f0   :  { %v1072_v8 = vadd.f32 1e-05, %v1024_v28  ;;  %v1436_v11 = vpop.eup %1435  ;;  %v1009_v20 = vsub.f32 %v977_v52, %v993_v38  ;;  %v994_v34 = vmul.f32 %v2090_v25, %v2090_v25  ;;  %v1043_v31 = vsub.f32 %v1879_v50, %v2056_v0 }
 0x2f1   :  { %1213 = vst [vmem:[#allocation10 + $0x10] sm:$0xff] %v1181_v29  ;;  %1214 = vst [vmem:[#allocation10 + $0x18] sm:$0xff] %v1182_v30  ;;  %v1179_v43 = vadd.f32 %v2068_v10, %v1139_v55  ;;  %v1180_v57 = vadd.f32 %v2074_v14, %v1140_v27  ;;  %v946_v7 = vpop.xlane.xlu1 %945  ;;  %v853_v39 = vpop.xlane.xlu0 %852  ;;  %v1103_v58 = vmul.f32 %v1436_v11, %v1039_v17 }
 0x2f2   :  { %v1104_v24 = vmul.f32 %v1436_v11, %v1040_v42  ;;  %1441 = vrsqrt.f32 %v1072_v8  ;;  %v978_v5 = vmul.f32 0.03125, %v946_v7  ;;  %v1025_v32 = vmax.f32 %v1009_v20, 0.0 }
 0x2f3   :  { %1211 = vst [vmem:[#allocation10] sm:$0xff] %v1179_v43  ;;  %1212 = vst [vmem:[#allocation10 + $0x8] sm:$0xff] %v1180_v57  ;;  %v1143_v36 = vmul.f32 %v2065_v19, %v1103_v58  ;;  %v2110_v54 = vmul.f32 0.03125, %v853_v39  ;;  %v1044_v42 = vsub.f32 %v1883_v44, %v2056_v0  ;;  %v1045_v44 = vsub.f32 %v1887_v51, %v2060_v37 }
 0x2f4   :  { %v1438_v35 = vpop.eup %1437  ;;  %v1144_v61 = vmul.f32 %v2071_v26, %v1104_v24  ;;  %v1010_v17 = vsub.f32 %v978_v5, %v994_v34  ;;  %v1073_v30 = vadd.f32 1e-05, %v1025_v32 }
 0x2f5   :  { %v1105_v18 = vmul.f32 %v1438_v35, %v1041_v2  ;;  %v1106_v9 = vmul.f32 %v1438_v35, %v1042_v33  ;;  %v856_v28 = vpop.xlane.xlu1 %855  ;;  %v949_v4 = vpop.xlane.xlu0 %948  ;;  %v1183_v29 = vadd.f32 %v2068_v10, %v1143_v36  ;;  %v995_v11 = vmul.f32 %v2110_v54, %v2110_v54 }
 0x2f6   :  { %v1184_v59 = vadd.f32 %v2074_v14, %v1144_v61  ;;  %v1026_v8 = vmax.f32 %v1010_v17, 0.0  ;;  %1443 = vrsqrt.f32 %v1073_v30  ;;  %v2120_v52 = vmul.f32 0.03125, %v856_v28 }
 0x2f7   :  { %v1145_v55 = vmul.f32 %v2065_v19, %v1105_v18  ;;  %v1146_v27 = vmul.f32 %v2071_v26, %v1106_v9  ;;  %1215 = vst [vmem:[#allocation10 + $0x20] sm:$0xff] %v1183_v29  ;;  %v979_v43 = vmul.f32 0.03125, %v949_v4  ;;  %v1046_v2 = vsub.f32 %v1890_v46, %v2060_v37 }
 0x2f8   :  { %v1440_v38 = vpop.eup %1439  ;;  %1216 = vst [vmem:[#allocation10 + $0x28] sm:$0xff] %v1184_v59  ;;  %v1074_v0 = vadd.f32 1e-05, %v1026_v8  ;;  %v996_v61 = vmul.f32 %v2120_v52, %v2120_v52 }
 0x2f9   :  { %v1185_v50 = vadd.f32 %v2068_v10, %v1145_v55  ;;  %v1186_v57 = vadd.f32 %v2074_v14, %v1146_v27  ;;  %v1107_v7 = vmul.f32 %v1440_v38, %v1043_v31  ;;  %v1108_v39 = vmul.f32 %v1440_v38, %v1044_v42  ;;  %v952_v58 = vpop.xlane.xlu1 %951  ;;  %v859_v24 = vpop.xlane.xlu0 %858 }
 0x2fa   :  { %v1011_v20 = vsub.f32 %v979_v43, %v995_v11  ;;  %v980_v5 = vmul.f32 0.03125, %v952_v58  ;;  %1445 = vrsqrt.f32 %v1074_v0  ;;  %v2134_v32 = vmul.f32 0.03125, %v859_v24 }
 0x2fb   :  { %1217 = vst [vmem:[#allocation10 + $0x30] sm:$0xff] %v1185_v50  ;;  %1218 = vst [vmem:[#allocation10 + $0x38] sm:$0xff] %v1186_v57  ;;  %v1147_v33 = vmul.f32 %v2065_v19, %v1107_v7  ;;  %v1148_v34 = vmul.f32 %v2071_v26, %v1108_v39  ;;  %v1047_v38 = vsub.f32 %v1907_v12, %v2084_v21 }
 0x2fc   :  { %v1442_v35 = vpop.eup %1441  ;;  %v1027_v36 = vmax.f32 %v1011_v20, 0.0  ;;  %v1012_v4 = vsub.f32 %v980_v5, %v996_v61  ;;  %v997_v55 = vmul.f32 %v2134_v32, %v2134_v32  ;;  %v1048_v11 = vsub.f32 %v1911_v62, %v2084_v21 }
 0x2fd   :  { %v1187_v51 = vadd.f32 %v2068_v10, %v1147_v33  ;;  %v1188_v18 = vadd.f32 %v2074_v14, %v1148_v34  ;;  %v1109_v9 = vmul.f32 %v1442_v35, %v1045_v44  ;;  %v1110_v17 = vmul.f32 %v1442_v35, %v1046_v2  ;;  %v862_v46 = vpop.xlane.xlu1 %861  ;;  %v955_v37 = vpop.xlane.xlu0 %954 }
 0x2fe   :  { %v1075_v28 = vadd.f32 1e-05, %v1027_v36  ;;  %v2140_v31 = vmul.f32 0.03125, %v862_v46  ;;  %v1028_v30 = vmax.f32 %v1012_v4, 0.0  ;;  %v981_v27 = vmul.f32 0.03125, %v955_v37 }
 0x2ff   :  { %1219 = vst [vmem:[#allocation10 + $0x40] sm:$0xff] %v1187_v51  ;;  %1220 = vst [vmem:[#allocation10 + $0x48] sm:$0xff] %v1188_v18  ;;  %v1149_v29 = vmul.f32 %v2065_v19, %v1109_v9  ;;  %v1150_v59 = vmul.f32 %v2071_v26, %v1110_v17  ;;  %v1049_v20 = vsub.f32 %v1915_v16, %v2090_v25 }
 0x300   :  { %1447 = vrsqrt.f32 %v1075_v28  ;;  %v1444_v57 = vpop.eup %1443  ;;  %v1076_v7 = vadd.f32 1e-05, %v1028_v30  ;;  %v1013_v39 = vsub.f32 %v981_v27, %v997_v55  ;;  %v998_v58 = vmul.f32 %v2140_v31, %v2140_v31 }
 0x301   :  { %v1189_v42 = vadd.f32 %v2068_v10, %v1149_v29  ;;  %v1190_v8 = vadd.f32 %v2074_v14, %v1150_v59  ;;  %v958_v43 = vpop.xlane.xlu1 %957  ;;  %v865_v50 = vpop.xlane.xlu0 %864  ;;  %v1111_v44 = vmul.f32 %v1444_v57, %v1047_v38  ;;  %v1112_v0 = vmul.f32 %v1444_v57, %v1048_v11 }
 0x302   :  { %v982_v24 = vmul.f32 0.03125, %v958_v43  ;;  %1449 = vrsqrt.f32 %v1076_v7  ;;  %v1029_v12 = vmax.f32 %v1013_v39, 0.0  ;;  %v1050_v62 = vsub.f32 %v1918_v22, %v2090_v25 }
 0x303   :  { %1221 = vst [vmem:[#allocation10 + $0x50] sm:$0xff] %v1189_v42  ;;  %1222 = vst [vmem:[#allocation10 + $0x58] sm:$0xff] %v1190_v8  ;;  %v1151_v21 = vmul.f32 %v2065_v19, %v1111_v44  ;;  %v1152_v33 = vmul.f32 %v2071_v26, %v1112_v0  ;;  %v2158_v34 = vmul.f32 0.03125, %v865_v50  ;;  %v1051_v22 = vsub.f32 %v1935_v47, %v2110_v54 }
 0x304   :  { %v1014_v2 = vsub.f32 %v982_v24, %v998_v58  ;;  %v1446_v36 = vpop.eup %1445  ;;  %v1077_v61 = vadd.f32 1e-05, %v1029_v12  ;;  %v1052_v25 = vsub.f32 %v1939_v49, %v2110_v54  ;;  %v1053_v43 = vsub.f32 %v1943_v56, %v2120_v52 }
 0x305   :  { %v868_v5 = vpop.xlane.xlu1 %867  ;;  %v961_v35 = vpop.xlane.xlu0 %960  ;;  %v1191_v16 = vadd.f32 %v2068_v10, %v1151_v21  ;;  %v1192_v9 = vadd.f32 %v2074_v14, %v1152_v33  ;;  %v1113_v17 = vmul.f32 %v1446_v36, %v1049_v20  ;;  %v1114_v46 = vmul.f32 %v1446_v36, %v1050_v62 }
 0x306   :  { %v1030_v51 = vmax.f32 %v1014_v2, 0.0  ;;  %v2160_v18 = vmul.f32 0.03125, %v868_v5  ;;  %1451 = vrsqrt.f32 %v1077_v61  ;;  %v999_v29 = vmul.f32 %v2158_v34, %v2158_v34 }
 0x307   :  { %1223 = vst [vmem:[#allocation10 + $0x60] sm:$0xff] %v1191_v16  ;;  %1224 = vst [vmem:[#allocation10 + $0x68] sm:$0xff] %v1192_v9  ;;  %v1153_v28 = vmul.f32 %v2065_v19, %v1113_v17  ;;  %v1154_v4 = vmul.f32 %v2071_v26, %v1114_v46  ;;  %v983_v59 = vmul.f32 0.03125, %v961_v35  ;;  %v1054_v7 = vsub.f32 %v1946_v1, %v2120_v52 }
 0x308   :  { %v1078_v37 = vadd.f32 1e-05, %v1030_v51  ;;  %v1000_v47 = vmul.f32 %v2160_v18, %v2160_v18  ;;  %v1055_v5 = vsub.f32 %v1963_v23, %v2134_v32  ;;  %v1056_v35 = vsub.f32 %v1967_v40, %v2134_v32 }
 0x309   :  { %v964_v30 = vpop.xlane.xlu1 %963  ;;  %v871_v55 = vpop.xlane.xlu0 %870  ;;  %v1193_v42 = vadd.f32 %v2068_v10, %v1153_v28  ;;  %v1194_v8 = vadd.f32 %v2074_v14, %v1154_v4  ;;  %v1015_v50 = vsub.f32 %v983_v59, %v999_v29  ;;  %v1057_v9 = vsub.f32 %v1971_v41, %v2140_v31 }
 0x30a   :  { %v1448_v27 = vpop.eup %1447  ;;  %1453 = vrsqrt.f32 %v1078_v37  ;;  %v984_v49 = vmul.f32 0.03125, %v964_v30  ;;  %v2174_v54 = vmul.f32 0.03125, %v871_v55  ;;  %v1058_v23 = vsub.f32 %v1974_v13, %v2140_v31 }
 0x30b   :  { %v1115_v38 = vmul.f32 %v1448_v27, %v1051_v22  ;;  %v1116_v11 = vmul.f32 %v1448_v27, %v1052_v25  ;;  %1225 = vst [vmem:[#allocation10 + $0x70] sm:$0xff] %v1193_v42  ;;  %1226 = vst [vmem:[#allocation10 + $0x78] sm:$0xff] %v1194_v8  ;;  %v1031_v12 = vmax.f32 %v1015_v50, 0.0 }
 0x30c   :  { %v1016_v57 = vsub.f32 %v984_v49, %v1000_v47  ;;  %v1001_v44 = vmul.f32 %v2174_v54, %v2174_v54  ;;  %v1450_v20 = vpop.eup %1449 }
 0x30d   :  { %v1155_v39 = vmul.f32 %v2065_v19, %v1115_v38  ;;  %v1156_v58 = vmul.f32 %v2071_v26, %v1116_v11  ;;  %v874_v24 = vpop.xlane.xlu1 %873  ;;  %v967_v0 = vpop.xlane.xlu0 %966  ;;  %v1117_v1 = vmul.f32 %v1450_v20, %v1053_v43  ;;  %v1118_v52 = vmul.f32 %v1450_v20, %v1054_v7 }
 0x30e   :  { %v1032_v2 = vmax.f32 %v1016_v57, 0.0  ;;  %v2186_v56 = vmul.f32 0.03125, %v874_v24  ;;  %v985_v62 = vmul.f32 0.03125, %v967_v0  ;;  %v1079_v36 = vadd.f32 1e-05, %v1031_v12 }
 0x30f   :  { %v1195_v21 = vadd.f32 %v2068_v10, %v1155_v39  ;;  %v1196_v33 = vadd.f32 %v2074_v14, %v1156_v58  ;;  %v1157_v51 = vmul.f32 %v2065_v19, %v1117_v1  ;;  %v1158_v16 = vmul.f32 %v2071_v26, %v1118_v52 }
 0x310   :  { %v1080_v61 = vadd.f32 1e-05, %v1032_v2  ;;  %v1017_v17 = vsub.f32 %v985_v62, %v1001_v44  ;;  %v1452_v22 = vpop.eup %1451  ;;  %1455 = vrsqrt.f32 %v1079_v36  ;;  %v1002_v40 = vmul.f32 %v2186_v56, %v2186_v56 }
 0x311   :  { %1227 = vst [vmem:[#allocation10 + $0x80] sm:$0xff] %v1195_v21  ;;  %1228 = vst [vmem:[#allocation10 + $0x88] sm:$0xff] %v1196_v33  ;;  %v970_v46 = vpop.xlane.xlu1 %969  ;;  %v1197_v25 = vadd.f32 %v2068_v10, %v1157_v51  ;;  %v1198_v37 = vadd.f32 %v2074_v14, %v1158_v16  ;;  %v1119_v28 = vmul.f32 %v1452_v22, %v1055_v5 }
 0x312   :  { %v986_v32 = vmul.f32 0.03125, %v970_v46  ;;  %v1120_v4 = vmul.f32 %v1452_v22, %v1056_v35  ;;  %1457 = vrsqrt.f32 %v1080_v61  ;;  %v1033_v41 = vmax.f32 %v1017_v17, 0.0 }
 0x313   :  { %1229 = vst [vmem:[#allocation10 + $0x90] sm:$0xff] %v1197_v25  ;;  %1230 = vst [vmem:[#allocation10 + $0x98] sm:$0xff] %v1198_v37  ;;  %v1159_v30 = vmul.f32 %v2065_v19, %v1119_v28  ;;  %v1059_v57 = vsub.f32 %v1991_v3, %v2158_v34  ;;  %v1060_v7 = vsub.f32 %v1995_v60, %v2158_v34 }
 0x314   :  { %v1454_v29 = vpop.eup %1453  ;;  %v1018_v59 = vsub.f32 %v986_v32, %v1002_v40  ;;  %v1160_v13 = vmul.f32 %v2071_v26, %v1120_v4  ;;  %v1081_v27 = vadd.f32 1e-05, %v1033_v41  ;;  %v1061_v58 = vsub.f32 %v1999_v53, %v2160_v18 }
 0x315   :  { %v1121_v31 = vmul.f32 %v1454_v29, %v1057_v9  ;;  %v1122_v55 = vmul.f32 %v1454_v29, %v1058_v23  ;;  %v1199_v49 = vadd.f32 %v2068_v10, %v1159_v30  ;;  %v1062_v24 = vsub.f32 %v2002_v15, %v2160_v18 }
 0x316   :  { %v1034_v47 = vmax.f32 %v1018_v59, 0.0  ;;  %v1200_v42 = vadd.f32 %v2074_v14, %v1160_v13  ;;  %1459 = vrsqrt.f32 %v1081_v27  ;;  %v1063_v3 = vsub.f32 %v2019_v45, %v2174_v54 }
 0x317   :  { %v1161_v8 = vmul.f32 %v2065_v19, %v1121_v31  ;;  %v1162_v38 = vmul.f32 %v2071_v26, %v1122_v55  ;;  %1231 = vst [vmem:[#allocation10 + $0xa0] sm:$0xff] %v1199_v49  ;;  %v1064_v60 = vsub.f32 %v2023_v6, %v2174_v54  ;;  %v1065_v1 = vsub.f32 %v2027_v63, %v2186_v56 }
 0x318   :  { %v1082_v11 = vadd.f32 1e-05, %v1034_v47  ;;  %1232 = vst [vmem:[#allocation10 + $0xa8] sm:$0xff] %v1200_v42  ;;  %v1066_v52 = vsub.f32 %v2030_v48, %v2186_v56 }
 0x319   :  { %v1201_v43 = vadd.f32 %v2068_v10, %v1161_v8  ;;  %v1202_v50 = vadd.f32 %v2074_v14, %v1162_v38 }
 0x31a   :  { %1461 = vrsqrt.f32 %v1082_v11  ;;  %v1456_v39 = vpop.eup %1455 }
 0x31b   :  { %1233 = vst [vmem:[#allocation10 + $0xb0] sm:$0xff] %v1201_v43  ;;  %1234 = vst [vmem:[#allocation10 + $0xb8] sm:$0xff] %v1202_v50  ;;  %v1123_v44 = vmul.f32 %v1456_v39, %v1059_v57  ;;  %v1124_v0 = vmul.f32 %v1456_v39, %v1060_v7 }
 0x31c   :  { %v1458_v20 = vpop.eup %1457 }
 0x31d   :  { %v1163_v12 = vmul.f32 %v2065_v19, %v1123_v44  ;;  %v1164_v2 = vmul.f32 %v2071_v26, %v1124_v0  ;;  %v1125_v62 = vmul.f32 %v1458_v20, %v1061_v58  ;;  %v1126_v21 = vmul.f32 %v1458_v20, %v1062_v24 }
 0x31f   :  { %v1203_v53 = vadd.f32 %v2068_v10, %v1163_v12  ;;  %v1204_v34 = vadd.f32 %v2074_v14, %v1164_v2  ;;  %v1165_v15 = vmul.f32 %v2065_v19, %v1125_v62  ;;  %v1166_v18 = vmul.f32 %v2071_v26, %v1126_v21 }
 0x320   :  { %v1460_v33 = vpop.eup %1459 }
 0x321   :  { %1235 = vst [vmem:[#allocation10 + $0xc0] sm:$0xff] %v1203_v53  ;;  %1236 = vst [vmem:[#allocation10 + $0xc8] sm:$0xff] %v1204_v34  ;;  %v1205_v45 = vadd.f32 %v2068_v10, %v1165_v15  ;;  %v1206_v6 = vadd.f32 %v2074_v14, %v1166_v18  ;;  %v1127_v54 = vmul.f32 %v1460_v33, %v1063_v3 }
 0x322   :  { %v1128_v5 = vmul.f32 %v1460_v33, %v1064_v60 }
 0x323   :  { %1237 = vst [vmem:[#allocation10 + $0xd0] sm:$0xff] %v1205_v45  ;;  %1238 = vst [vmem:[#allocation10 + $0xd8] sm:$0xff] %v1206_v6  ;;  %v1167_v36 = vmul.f32 %v2065_v19, %v1127_v54 }
 0x324   :  { %v1462_v35 = vpop.eup %1461  ;;  %v1168_v61 = vmul.f32 %v2071_v26, %v1128_v5 }
 0x325   :  { %v1129_v51 = vmul.f32 %v1462_v35, %v1065_v1  ;;  %v1130_v63 = vmul.f32 %v1462_v35, %v1066_v52  ;;  %v1207_v48 = vadd.f32 %v2068_v10, %v1167_v36 }
 0x326   :  { %v1208_v56 = vadd.f32 %v2074_v14, %v1168_v61 }
 0x327   :  { %v1169_v16 = vmul.f32 %v2065_v19, %v1129_v51  ;;  %v1170_v9 = vmul.f32 %v2071_v26, %v1130_v63  ;;  %1239 = vst [vmem:[#allocation10 + $0xe0] sm:$0xff] %v1207_v48 }
 0x328   :  { %1240 = vst [vmem:[#allocation10 + $0xe8] sm:$0xff] %v1208_v56 }
 0x329   :  { %v1209_v17 = vadd.f32 %v2068_v10, %v1169_v16  ;;  %v1210_v46 = vadd.f32 %v2074_v14, %v1170_v9 }
 0x32b   :  { %1241 = vst [vmem:[#allocation10 + $0xf0] sm:$0xff] %v1209_v17  ;;  %1242 = vst [vmem:[#allocation10 + $0xf8] sm:$0xff] %v1210_v46 }
 0x32c   :  { %1562 = shalt.err (!%p1559_p8)
}
 0x32d   :  { %s1563_s17 = scalar_lea.hbm %s2263_s4, 4096 }
 0x32e   :  { %p1564_p9 = scmp.ne.s32.totalorder %s2263_s4, %s1563_s17  ;;  %p1567_p10 = scmp.lt.u32.totalorder %s1563_s17, %s2263_s4 }
 0x330   :  { %p1569_p11 = pnand %p1567_p10, %p1564_p9 }
 0x332   :  { %1572 = shalt.err (!%p1569_p11)
}
 0x333   :  { %1254 = dma.vmem_to_hbm [thread:$0]  %s1249_s26, 4096, %s2263_s4, [#allocation4], %s1585_s1, %s1585_s1, %s1586_s13  }
 0x334   :  { %1579 = dma.done.wait [#allocation4], 4096  }
 0x335   :  { %1580 = vsyncadd [#allocation4], 4294963200 }
 0x336   :  { %1258 = vsyncpa [#allocation3], 1 }
 0x337   :  { %1259 = vsyncpa [#allocation6], 1 }
 0x338   :  { %1260 = vsyncpa [#allocation9], 1 }
 0x339   :  { %1261 = vsyncpa [#allocation4], 1 }

// kernel: tpu_custom_call.1
= control target key start
LH: loop header
LB: loop body
LE: loop exit
PB: predicated region body
PF: predicated region fallthrough
CT: control target
= control target key end

     0   :  { %9 = vsyncpa [#allocation3], 0  ;;  %s2259_s0 = inlined_call_operand.hbm [shape: f32[128,256], index: 0, kind: input, shape index: {}]   ;;  %s2260_s1 = inlined_call_operand.hbm [shape: bf16[256,256], index: 1, kind: input, shape index: {}]   ;;  %s2261_s2 = inlined_call_operand.hbm [shape: bf16[256,256], index: 2, kind: input, shape index: {}]   ;;  %s2262_s3 = inlined_call_operand.hbm [shape: f32[8,256], index: 3, kind: input, shape index: {}]   ;;  %s2263_s4 = inlined_call_operand.hbm [shape: f32[128,256], index: 4, kind: output, shape index: {}]  }
   0x1   :  { %10 = vsyncpa [#allocation6], 0 }
   0x2   :  { %11 = vsyncpa [#allocation9], 0 }
   0x3   :  { %12 = vsyncpa [#allocation4], 0  ;;  %s1581_s15 = smov [#allocation5]   ;;  %s1463_s19 = scalar_lea.hbm %s2260_s1, 4096 }
   0x4   :  { %s30_s16 = sshll.u32 %s1581_s15, 4  ;;  %p1464_p0 = scmp.ne.s32.totalorder %s2260_s1, %s1463_s19  ;;  %s31_s16 = int_to_ptr.vmem [resolvable:$true] %s30_s16 }
   0x5   :  { %p1467_p1 = scmp.lt.u32.totalorder %s1463_s19, %s2260_s1 }
   0x7   :  { %p1469_p2 = pnand %p1467_p1, %p1464_p0 }
   0x9   :  { %1472 = shalt.err (!%p1469_p2)
}
   0xa   :  { %s1473_s24 = scalar_lea.vmem %s31_s16, 4096  ;;  %p1478_p4 = scmp.lt.s32.totalorder %s31_s16, %s31_s16 }
   0xb   :  { %p1474_p3 = scmp.ne.s32.totalorder %s31_s16, %s1473_s24  ;;  %p1479_p5 = scmp.lt.s32.totalorder %s1473_s24, %s1473_s24 }
   0xd   :  { %p1480_p6 = por %p1479_p5, %p1478_p4 }
   0xf   :  { %p1481_p7 = pnand %p1480_p6, %p1474_p3 }
  0x11   :  { %1484 = shalt.err (!%p1481_p7)
}
  0x12   :  { %s1582_s25 = smov 128   ;;  %s1583_s26 = smov 8  }
  0x13   :  { %36 = dma.hbm_to_vmem [thread:$0]  %s2260_s1, 4096, %s31_s16, [#allocation6], %s1582_s25, %s1582_s25, %s1583_s26  }
  0x14   :  { %s1584_s29 = smov [#allocation2]   ;;  %s1485_s7 = scalar_lea.hbm %s2259_s0, 4096 }
  0x15   :  { %s18_s30 = sshll.u32 %s1584_s29, 4  ;;  %p1486_p8 = scmp.ne.s32.totalorder %s2259_s0, %s1485_s7  ;;  %s19_s30 = int_to_ptr.vmem [resolvable:$true] %s18_s30 }
  0x16   :  { %p1489_p9 = scmp.lt.u32.totalorder %s1485_s7, %s2259_s0 }
  0x18   :  { %p1491_p10 = pnand %p1489_p9, %p1486_p8 }
  0x1a   :  { %1494 = shalt.err (!%p1491_p10)
}
  0x1b   :  { %s1495_s12 = scalar_lea.vmem %s19_s30, 4096  ;;  %p1500_p12 = scmp.lt.s32.totalorder %s19_s30, %s19_s30 }
  0x1c   :  { %p1496_p11 = scmp.ne.s32.totalorder %s19_s30, %s1495_s12  ;;  %p1501_p13 = scmp.lt.s32.totalorder %s1495_s12, %s1495_s12 }
  0x1e   :  { %p1502_p0 = por %p1501_p13, %p1500_p12 }
  0x20   :  { %p1503_p1 = pnand %p1502_p0, %p1496_p11 }
  0x22   :  { %1506 = shalt.err (!%p1503_p1)
}
  0x23   :  { %s1585_s1 = smov 256   ;;  %s1586_s13 = smov 16  }
  0x24   :  { %24 = dma.hbm_to_vmem [thread:$0]  %s2259_s0, 4096, %s19_s30, [#allocation3], %s1585_s1, %s1585_s1, %s1586_s13  }
  0x25   :  { %s1587_s16 = smov [#allocation7]   ;;  %s1588_s18 = smov [#allocation8]  }
  0x26   :  { %s42_s17 = sshll.u32 %s1587_s16, 4  ;;  %s55_s19 = sshll.u32 %s1588_s18, 4  ;;  %s43_s17 = int_to_ptr.vmem [resolvable:$true] %s42_s17  ;;  %s56_s19 = int_to_ptr.vmem [resolvable:$true] %s55_s19 }
  0x27   :  { %s1507_s22 = scalar_lea.hbm %s2261_s2, 4096 }
  0x28   :  { %p1508_p2 = scmp.ne.s32.totalorder %s2261_s2, %s1507_s22  ;;  %p1511_p3 = scmp.lt.u32.totalorder %s1507_s22, %s2261_s2 }
  0x2a   :  { %p1513_p4 = pnand %p1511_p3, %p1508_p2 }
  0x2c   :  { %1516 = shalt.err (!%p1513_p4)
}
  0x2d   :  { %s1517_s0 = scalar_lea.vmem %s43_s17, 4096  ;;  %p1522_p6 = scmp.lt.s32.totalorder %s43_s17, %s43_s17 }
  0x2e   :  { %p1518_p5 = scmp.ne.s32.totalorder %s43_s17, %s1517_s0  ;;  %p1523_p7 = scmp.lt.s32.totalorder %s1517_s0, %s1517_s0 }
  0x30   :  { %p1524_p8 = por %p1523_p7, %p1522_p6 }
  0x32   :  { %p1525_p9 = pnand %p1524_p8, %p1518_p5 }
  0x34   :  { %1528 = shalt.err (!%p1525_p9)
}
  0x35   :  { %48 = dma.hbm_to_vmem [thread:$0]  %s2261_s2, 4096, %s43_s17, [#allocation6], %s1582_s25, %s1582_s25, %s1583_s26  }
  0x36   :  { %s1529_s7 = scalar_lea.hbm %s2262_s3, 256 }
  0x37   :  { %p1530_p10 = scmp.ne.s32.totalorder %s2262_s3, %s1529_s7  ;;  %p1533_p11 = scmp.lt.u32.totalorder %s1529_s7, %s2262_s3 }
  0x39   :  { %p1535_p12 = pnand %p1533_p11, %p1530_p10 }
  0x3b   :  { %1538 = shalt.err (!%p1535_p12)
}
  0x3c   :  { %s1539_s12 = scalar_lea.vmem %s56_s19, 256  ;;  %p1544_p0 = scmp.lt.s32.totalorder %s56_s19, %s56_s19 }
  0x3d   :  { %p1540_p13 = scmp.ne.s32.totalorder %s56_s19, %s1539_s12  ;;  %p1545_p1 = scmp.lt.s32.totalorder %s1539_s12, %s1539_s12 }
  0x3f   :  { %p1546_p2 = por %p1545_p1, %p1544_p0 }
  0x41   :  { %p1547_p3 = pnand %p1546_p2, %p1540_p13 }
  0x43   :  { %1550 = shalt.err (!%p1547_p3)
}
  0x44   :  { %58 = dma.hbm_to_vmem [thread:$0]  %s2262_s3, 256, %s56_s19, [#allocation9]  }
  0x45   :  { %1573 = dma.done.wait [#allocation3], 4096  }
  0x46   :  { %1574 = vsyncadd [#allocation3], 4294963200 }
  0x47   :  { %1575 = dma.done.wait [#allocation6], 8192  }
  0x48   :  { %1576 = vsyncadd [#allocation6], 4294959104 }
  0x49   :  { %1577 = dma.done.wait [#allocation9], 256  }
  0x4a   :  { %1578 = vsyncadd [#allocation9], 4294967040  ;;  %v1335_v0 = vld [vmem:[#allocation5 + $0x4] ss:$8 sps:$4 sm:$0xff]   ;;  %v1337_v1 = vld [vmem:[#allocation5] ss:$8 sps:$4 sm:$0xff]  }
  0x4b   :  { %321 = vmatprep.subr.bf16.mxu0 %v1335_v0  ;;  %v1338_v2 = vld [vmem:[#allocation5 + $0x14] ss:$8 sps:$4 sm:$0xff]   ;;  %v1340_v3 = vld [vmem:[#allocation5 + $0x10] ss:$8 sps:$4 sm:$0xff]   ;;  %v1341_v4 = vld [vmem:[#allocation5 + $0x24] ss:$8 sps:$4 sm:$0xff]  }
  0x4c   :  { %322 = vmatpush1.bf16.msra.mxu0 %v1337_v1  ;;  %v1343_v5 = vld [vmem:[#allocation5 + $0x20] ss:$8 sps:$4 sm:$0xff]   ;;  %v1344_v6 = vld [vmem:[#allocation5 + $0x34] ss:$8 sps:$4 sm:$0xff]   ;;  %v1346_v7 = vld [vmem:[#allocation5 + $0x30] ss:$8 sps:$4 sm:$0xff]  }
  0x4d   :  { %323 = vmatprep.subr.bf16.mxu0 %v1338_v2  ;;  %v1347_v8 = vld [vmem:[#allocation5 + $0x44] ss:$8 sps:$4 sm:$0xff]   ;;  %v1349_v9 = vld [vmem:[#allocation5 + $0x40] ss:$8 sps:$4 sm:$0xff]   ;;  %v1350_v10 = vld [vmem:[#allocation5 + $0x54] ss:$8 sps:$4 sm:$0xff]  }
  0x4e   :  { %v1352_v11 = vld [vmem:[#allocation5 + $0x50] ss:$8 sps:$4 sm:$0xff]   ;;  %v1353_v12 = vld [vmem:[#allocation5 + $0x64] ss:$8 sps:$4 sm:$0xff]   ;;  %v1355_v16 = vld [vmem:[#allocation5 + $0x60] ss:$8 sps:$4 sm:$0xff]  }
  0x4f   :  { %v1672_v13 = vld [vmem:[#allocation2 + $0x8] sm:$0xff]  ;;  %v1674_v14 = vld [vmem:[#allocation2 + $0x18] sm:$0xff]  ;;  %v1678_v50 = vld [vmem:[#allocation2] sm:$0xff]  ;;  %s1589_s3 = smov [#allocation10]  }
  0x50   :  { %324 = vmatpush1.bf16.msra.mxu0 %v1340_v3  ;;  %v106_v15 = vpack.c.bf16 %v1674_v14, %v1672_v13  ;;  %v1356_v17 = vld [vmem:[#allocation5 + $0x74] ss:$8 sps:$4 sm:$0xff]   ;;  %v1358_v18 = vld [vmem:[#allocation5 + $0x70] ss:$8 sps:$4 sm:$0xff]   ;;  %v1359_v19 = vld [vmem:[#allocation5 + $0x84] ss:$8 sps:$4 sm:$0xff]  }
  0x51   :  { %325 = vmatprep.subr.bf16.mxu0 %v1341_v4  ;;  %v1361_v20 = vld [vmem:[#allocation5 + $0x80] ss:$8 sps:$4 sm:$0xff]   ;;  %v1362_v21 = vld [vmem:[#allocation5 + $0x94] ss:$8 sps:$4 sm:$0xff]   ;;  %v1383_v22 = vld [vmem:[#allocation7 + $0x4] ss:$8 sps:$4 sm:$0xff]  }
  0x52   :  { %353 = vmatprep.mubr.bf16.mxu0 %v106_v15  ;;  %v1385_v23 = vld [vmem:[#allocation7] ss:$8 sps:$4 sm:$0xff]   ;;  %v1364_v24 = vld [vmem:[#allocation5 + $0x90] ss:$8 sps:$4 sm:$0xff]   ;;  %682 = vmatprep.subr.bf16.mxu1 %v1383_v22  ;;  %v1386_v25 = vld [vmem:[#allocation7 + $0x14] ss:$8 sps:$4 sm:$0xff]  }
  0x53   :  { %v1365_v26 = vld [vmem:[#allocation5 + $0xa4] ss:$8 sps:$4 sm:$0xff]   ;;  %683 = vmatpush1.bf16.msra.mxu1 %v1385_v23  ;;  %v1388_v27 = vld [vmem:[#allocation7 + $0x10] ss:$8 sps:$4 sm:$0xff]   ;;  %v1367_v29 = vld [vmem:[#allocation5 + $0xa0] ss:$8 sps:$4 sm:$0xff]  }
  0x54   :  { %326 = vmatpush1.bf16.msra.mxu0 %v1343_v5  ;;  %684 = vmatprep.subr.bf16.mxu1 %v1386_v25  ;;  %v1389_v28 = vld [vmem:[#allocation7 + $0x24] ss:$8 sps:$4 sm:$0xff]   ;;  %v1368_v30 = vld [vmem:[#allocation5 + $0xb4] ss:$8 sps:$4 sm:$0xff]   ;;  %v1391_v31 = vld [vmem:[#allocation7 + $0x20] ss:$8 sps:$4 sm:$0xff]  }
  0x55   :  { %327 = vmatprep.subr.bf16.mxu0 %v1344_v6  ;;  %v1392_v32 = vld [vmem:[#allocation7 + $0x34] ss:$8 sps:$4 sm:$0xff]   ;;  %v1370_v33 = vld [vmem:[#allocation5 + $0xb0] ss:$8 sps:$4 sm:$0xff]   ;;  %v1371_v34 = vld [vmem:[#allocation5 + $0xc4] ss:$8 sps:$4 sm:$0xff]  }
  0x56   :  { %v1394_v35 = vld [vmem:[#allocation7 + $0x30] ss:$8 sps:$4 sm:$0xff]   ;;  %v1395_v36 = vld [vmem:[#allocation7 + $0x44] ss:$8 sps:$4 sm:$0xff]   ;;  %v1373_v37 = vld [vmem:[#allocation5 + $0xc0] ss:$8 sps:$4 sm:$0xff]  }
  0x57   :  { %685 = vmatpush1.bf16.msra.mxu1 %v1388_v27  ;;  %v1374_v38 = vld [vmem:[#allocation5 + $0xd4] ss:$8 sps:$4 sm:$0xff]   ;;  %v1397_v39 = vld [vmem:[#allocation7 + $0x40] ss:$8 sps:$4 sm:$0xff]   ;;  %v1376_v41 = vld [vmem:[#allocation5 + $0xd0] ss:$8 sps:$4 sm:$0xff]  }
  0x58   :  { %328 = vmatpush1.bf16.msra.mxu0 %v1346_v7  ;;  %686 = vmatprep.subr.bf16.mxu1 %v1389_v28  ;;  %v1398_v40 = vld [vmem:[#allocation7 + $0x54] ss:$8 sps:$4 sm:$0xff]   ;;  %v1400_v42 = vld [vmem:[#allocation7 + $0x50] ss:$8 sps:$4 sm:$0xff]   ;;  %v1377_v43 = vld [vmem:[#allocation5 + $0xe4] ss:$8 sps:$4 sm:$0xff]  }
  0x59   :  { %329 = vmatprep.subr.bf16.mxu0 %v1347_v8  ;;  %v1401_v44 = vld [vmem:[#allocation7 + $0x64] ss:$8 sps:$4 sm:$0xff]   ;;  %v1379_v45 = vld [vmem:[#allocation5 + $0xe0] ss:$8 sps:$4 sm:$0xff]   ;;  %v1380_v47 = vld [vmem:[#allocation5 + $0xf4] ss:$8 sps:$4 sm:$0xff]  }
  0x5a   :  { %v1403_v46 = vld [vmem:[#allocation7 + $0x60] ss:$8 sps:$4 sm:$0xff]   ;;  %v1404_v48 = vld [vmem:[#allocation7 + $0x74] ss:$8 sps:$4 sm:$0xff]   ;;  %v1382_v49 = vld [vmem:[#allocation5 + $0xf0] ss:$8 sps:$4 sm:$0xff]  }
  0x5b   :  { %687 = vmatpush1.bf16.msra.mxu1 %v1391_v31  ;;  %v1680_v51 = vld [vmem:[#allocation2 + $0x10] sm:$0xff]  ;;  %v1682_v53 = vld [vmem:[#allocation2 + $0x28] sm:$0xff]  ;;  %v1684_v54 = vld [vmem:[#allocation2 + $0x38] sm:$0xff]  ;;  %s1248_s26 = sshll.u32 %s1589_s3, 4  ;;  %s1249_s26 = int_to_ptr.vmem [resolvable:$true] %s1248_s26 }
  0x5c   :  { %330 = vmatpush1.bf16.msra.mxu0 %v1349_v9  ;;  %688 = vmatprep.subr.bf16.mxu1 %v1392_v32  ;;  %v1406_v52 = vld [vmem:[#allocation7 + $0x70] ss:$8 sps:$4 sm:$0xff]   ;;  %v1407_v55 = vld [vmem:[#allocation7 + $0x84] ss:$8 sps:$4 sm:$0xff]   ;;  %v105_v56 = vpack.c.bf16 %v1680_v51, %v1678_v50  ;;  %v108_v57 = vpack.c.bf16 %v1684_v54, %v1682_v53  ;;  %v1409_v58 = vld [vmem:[#allocation7 + $0x80] ss:$8 sps:$4 sm:$0xff]   ;;  %p1556_p5 = scmp.lt.s32.totalorder %s1249_s26, %s1249_s26 }
  0x5d   :  { %331 = vmatprep.subr.bf16.mxu0 %v1350_v10  ;;  %v1410_v59 = vld [vmem:[#allocation7 + $0x94] ss:$8 sps:$4 sm:$0xff]   ;;  %v1690_v60 = vld [vmem:[#allocation2 + $0x20] sm:$0xff]  ;;  %v1412_v62 = vld [vmem:[#allocation7 + $0x90] ss:$8 sps:$4 sm:$0xff]   ;;  %s1551_s14 = scalar_lea.vmem %s1249_s26, 4096 }
  0x5e   :  { %v1692_v61 = vld [vmem:[#allocation2 + $0x30] sm:$0xff]  ;;  %v1694_v63 = vld [vmem:[#allocation2 + $0x48] sm:$0xff]  ;;  %v1696_v0 = vld [vmem:[#allocation2 + $0x58] sm:$0xff]  ;;  %p1552_p4 = scmp.ne.s32.totalorder %s1249_s26, %s1551_s14  ;;  %p1557_p6 = scmp.lt.s32.totalorder %s1551_s14, %s1551_s14 }
  0x5f   :  { %689 = vmatpush1.bf16.msra.mxu1 %v1394_v35  ;;  %v1413_v1 = vld [vmem:[#allocation7 + $0xa4] ss:$8 sps:$4 sm:$0xff]   ;;  %v107_v2 = vpack.c.bf16 %v1692_v61, %v1690_v60  ;;  %v110_v3 = vpack.c.bf16 %v1696_v0, %v1694_v63  ;;  %v1415_v4 = vld [vmem:[#allocation7 + $0xa0] ss:$8 sps:$4 sm:$0xff]   ;;  %v1416_v5 = vld [vmem:[#allocation7 + $0xb4] ss:$8 sps:$4 sm:$0xff]  }
  0x60   :  { %332 = vmatpush1.bf16.msra.mxu0 %v1352_v11  ;;  %690 = vmatprep.subr.bf16.mxu1 %v1395_v36  ;;  %v1702_v6 = vld [vmem:[#allocation2 + $0x40] sm:$0xff]  ;;  %v1704_v7 = vld [vmem:[#allocation2 + $0x50] sm:$0xff]  ;;  %v1706_v9 = vld [vmem:[#allocation2 + $0x68] sm:$0xff]  ;;  %p1558_p7 = por %p1557_p6, %p1556_p5 }
  0x61   :  { %333 = vmatprep.subr.bf16.mxu0 %v1353_v12  ;;  %v1418_v8 = vld [vmem:[#allocation7 + $0xb0] ss:$8 sps:$4 sm:$0xff]   ;;  %v1419_v11 = vld [vmem:[#allocation7 + $0xc4] ss:$8 sps:$4 sm:$0xff]   ;;  %v109_v12 = vpack.c.bf16 %v1704_v7, %v1702_v6 }
  0x62   :  { %v1708_v10 = vld [vmem:[#allocation2 + $0x78] sm:$0xff]  ;;  %v1728_v25 = vld [vmem:[#allocation2 + $0x90] sm:$0xff]  ;;  %v1742_v32 = vld [vmem:[#allocation2 + $0xc8] sm:$0xff]  ;;  %p1559_p8 = pnand %p1558_p7, %p1552_p4 }
  0x63   :  { %691 = vmatpush1.bf16.msra.mxu1 %v1397_v39  ;;  %v112_v15 = vpack.c.bf16 %v1708_v10, %v1706_v9  ;;  %v1732_v27 = vld [vmem:[#allocation2 + $0xb8] sm:$0xff]  ;;  %v1740_v31 = vld [vmem:[#allocation2 + $0xb0] sm:$0xff]  ;;  %v1750_v36 = vld [vmem:[#allocation2 + $0xc0] sm:$0xff] }
  0x64   :  { %334 = vmatpush1.bf16.msra.mxu0 %v1355_v16  ;;  %692 = vmatprep.subr.bf16.mxu1 %v1398_v40  ;;  %v1421_v16 = vld [vmem:[#allocation7 + $0xc0] ss:$8 sps:$4 sm:$0xff]   ;;  %v1756_v39 = vld [vmem:[#allocation2 + $0xf8] sm:$0xff] }
  0x65   :  { %335 = vmatprep.subr.bf16.mxu0 %v1356_v17  ;;  %v1422_v17 = vld [vmem:[#allocation7 + $0xd4] ss:$8 sps:$4 sm:$0xff]  }
  0x67   :  { %693 = vmatpush1.bf16.msra.mxu1 %v1400_v42  ;;  %v1762_v42 = vld [vmem:[#allocation2 + $0xe0] sm:$0xff] }
  0x68   :  { %336 = vmatpush1.bf16.msra.mxu0 %v1358_v18  ;;  %694 = vmatprep.subr.bf16.mxu1 %v1401_v44  ;;  %v1714_v18 = vld [vmem:[#allocation2 + $0x60] sm:$0xff] }
  0x69   :  { %337 = vmatprep.subr.bf16.mxu0 %v1359_v19  ;;  %v1716_v19 = vld [vmem:[#allocation2 + $0x70] sm:$0xff] }
  0x6a   :  { %v111_v22 = vpack.c.bf16 %v1716_v19, %v1714_v18 }
  0x6b   :  { %695 = vmatpush1.bf16.msra.mxu1 %v1403_v46  ;;  %v1425_v46 = vld [vmem:[#allocation7 + $0xe4] ss:$8 sps:$4 sm:$0xff]  }
  0x6c   :  { %338 = vmatpush1.bf16.msra.mxu0 %v1361_v20  ;;  %696 = vmatprep.subr.bf16.mxu1 %v1404_v48  ;;  %v1718_v20 = vld [vmem:[#allocation2 + $0x88] sm:$0xff]  ;;  %v1428_v48 = vld [vmem:[#allocation7 + $0xf4] ss:$8 sps:$4 sm:$0xff]  }
  0x6d   :  { %339 = vmatprep.subr.bf16.mxu0 %v1362_v21  ;;  %v1720_v21 = vld [vmem:[#allocation2 + $0x98] sm:$0xff] }
  0x6e   :  { %v114_v23 = vpack.c.bf16 %v1720_v21, %v1718_v20 }
  0x6f   :  { %697 = vmatpush1.bf16.msra.mxu1 %v1406_v52  ;;  %v153_v52 = vlaneseq }
  0x70   :  { %340 = vmatpush1.bf16.msra.mxu0 %v1364_v24  ;;  %698 = vmatprep.subr.bf16.mxu1 %v1407_v55  ;;  %v1726_v24 = vld [vmem:[#allocation2 + $0x80] sm:$0xff] }
  0x71   :  { %341 = vmatprep.subr.bf16.mxu0 %v1365_v26  ;;  %v1730_v26 = vld [vmem:[#allocation2 + $0xa8] sm:$0xff]  ;;  %v113_v28 = vpack.c.bf16 %v1728_v25, %v1726_v24  ;;  %v1768_v55 = vshrl.u32 %v153_v52, 7 }
  0x73   :  { %699 = vmatpush1.bf16.msra.mxu1 %v1409_v58  ;;  %v1773_v58 = vld [vmem:[#allocation8 + $0x8] sm:$0xff] }
  0x74   :  { %342 = vmatpush1.bf16.msra.mxu0 %v1367_v29  ;;  %700 = vmatprep.subr.bf16.mxu1 %v1410_v59  ;;  %v116_v29 = vpack.c.bf16 %v1732_v27, %v1730_v26 }
  0x75   :  { %343 = vmatprep.subr.bf16.mxu0 %v1368_v30  ;;  %v1738_v30 = vld [vmem:[#allocation2 + $0xa0] sm:$0xff] }
  0x77   :  { %701 = vmatpush1.bf16.msra.mxu1 %v1412_v62 }
  0x78   :  { %344 = vmatpush1.bf16.msra.mxu0 %v1370_v33  ;;  %702 = vmatprep.subr.bf16.mxu1 %v1413_v1  ;;  %v1744_v33 = vld [vmem:[#allocation2 + $0xd8] sm:$0xff] }
  0x79   :  { %345 = vmatprep.subr.bf16.mxu0 %v1371_v34  ;;  %v115_v34 = vpack.c.bf16 %v1740_v31, %v1738_v30  ;;  %v118_v35 = vpack.c.bf16 %v1744_v33, %v1742_v32 }
  0x7b   :  { %703 = vmatpush1.bf16.msra.mxu1 %v1415_v4 }
  0x7c   :  { %346 = vmatpush1.bf16.msra.mxu0 %v1373_v37  ;;  %704 = vmatprep.subr.bf16.mxu1 %v1416_v5  ;;  %v1752_v37 = vld [vmem:[#allocation2 + $0xd0] sm:$0xff] }
  0x7d   :  { %347 = vmatprep.subr.bf16.mxu0 %v1374_v38  ;;  %v1754_v38 = vld [vmem:[#allocation2 + $0xe8] sm:$0xff]  ;;  %v117_v40 = vpack.c.bf16 %v1752_v37, %v1750_v36 }
  0x7f   :  { %705 = vmatpush1.bf16.msra.mxu1 %v1418_v8 }
  0x80   :  { %348 = vmatpush1.bf16.msra.mxu0 %v1376_v41  ;;  %706 = vmatprep.subr.bf16.mxu1 %v1419_v11  ;;  %v120_v41 = vpack.c.bf16 %v1756_v39, %v1754_v38 }
  0x81   :  { %349 = vmatprep.subr.bf16.mxu0 %v1377_v43  ;;  %v1764_v43 = vld [vmem:[#allocation2 + $0xf0] sm:$0xff] }
  0x82   :  { %v119_v44 = vpack.c.bf16 %v1764_v43, %v1762_v42 }
  0x83   :  { %707 = vmatpush1.bf16.msra.mxu1 %v1421_v16 }
  0x84   :  { %350 = vmatpush1.bf16.msra.mxu0 %v1379_v45  ;;  %708 = vmatprep.subr.bf16.mxu1 %v1422_v17  ;;  %v1424_v45 = vld [vmem:[#allocation7 + $0xd0] ss:$8 sps:$4 sm:$0xff]  }
  0x85   :  { %351 = vmatprep.subr.bf16.mxu0 %v1380_v47  ;;  %v1427_v47 = vld [vmem:[#allocation7 + $0xe0] ss:$8 sps:$4 sm:$0xff]  }
  0x87   :  { %709 = vmatpush1.bf16.msra.mxu1 %v1424_v45 }
  0x88   :  { %352 = vmatpush1.bf16.msra.mxu0 %v1382_v49  ;;  %710 = vmatprep.subr.bf16.mxu1 %v1425_v46  ;;  %v1430_v49 = vld [vmem:[#allocation7 + $0xf0] ss:$8 sps:$4 sm:$0xff]  }
  0x8b   :  { %354 = vmatmul.mubr.bf16.vlgmr.msra.gmra.mrb[0].mxu0 %v105_v56  ;;  %711 = vmatpush1.bf16.msra.mxu1 %v1427_v47  ;;  %v155_v56 = vsub.s32 0, %v1768_v55 }
  0x8c   :  { %363 = vmatprep.mubr.bf16.mxu0 %v108_v57  ;;  %712 = vmatprep.subr.bf16.mxu1 %v1428_v48  ;;  %v1771_v57 = vld [vmem:[#allocation8] sm:$0xff] }
  0x8d   :  { %v1776_v59 = vrot.slane %v1771_v57, %v155_v56  ;;  %v1779_v62 = vrot.slane %v1773_v58, %v155_v56 }
  0x8f   :  { %713 = vmatpush1.bf16.msra.mxu1 %v1430_v49 }
  0x93   :  { %364 = vmatmul.mubr.bf16.gmra.mrb[4].mxu0 %v107_v2 }
  0x94   :  { %373 = vmatprep.mubr.bf16.mxu0 %v110_v3 }
  0x9b   :  { %374 = vmatmul.mubr.bf16.gmra.mrb[8].mxu0 %v109_v12 }
  0x9c   :  { %383 = vmatprep.mubr.bf16.mxu0 %v112_v15 }
  0xa3   :  { %384 = vmatmul.mubr.bf16.gmra.mrb[12].mxu0 %v111_v22 }
  0xa4   :  { %393 = vmatprep.mubr.bf16.mxu0 %v114_v23 }
  0xab   :  { %394 = vmatmul.mubr.bf16.gmra.mrb[16].mxu0 %v113_v28 }
  0xac   :  { %403 = vmatprep.mubr.bf16.mxu0 %v116_v29 }
  0xb3   :  { %404 = vmatmul.mubr.bf16.gmra.mrb[20].mxu0 %v115_v34 }
  0xb4   :  { %413 = vmatprep.mubr.bf16.mxu0 %v118_v35 }
  0xbb   :  { %414 = vmatmul.mubr.bf16.gmra.mrb[24].mxu0 %v117_v40 }
  0xbc   :  { %423 = vmatprep.mubr.bf16.mxu0 %v120_v41 }
  0xc3   :  { %424 = vmatmul.mubr.bf16.gmra.mrb[28].mxu0 %v119_v44 }
 0x15e   :  { %v355_v1 = vpop.f32.mrb[0].mxu0 }
 0x15f   :  { %v356_v2 = vadd.f32 %v355_v1, %v1776_v59  ;;  %v357_v3 = vpop.f32.mrb[1].mxu0 }
 0x160   :  { %v358_v4 = vadd.f32 %v357_v3, %v1779_v62  ;;  %v359_v5 = vpop.f32.mrb[2].mxu0 }
 0x161   :  { %v360_v8 = vadd.f32 %v359_v5, %v1776_v59  ;;  %v361_v11 = vpop.f32.mrb[3].mxu0  ;;  %v434_v15 = vmax.f32 %v356_v2, 0.0 }
 0x162   :  { %v362_v12 = vadd.f32 %v361_v11, %v1779_v62  ;;  %v435_v17 = vmax.f32 %v358_v4, 0.0 }
 0x163   :  { %v436_v16 = vmax.f32 %v360_v8, 0.0 }
 0x164   :  { %v437_v22 = vmax.f32 %v362_v12, 0.0 }
 0x165   :  { %v466_v23 = vpack.c.bf16 %v436_v16, %v434_v15 }
 0x166   :  { %v365_v28 = vpop.f32.mrb[4].mxu0  ;;  %v467_v29 = vpack.c.bf16 %v437_v22, %v435_v17 }
 0x167   :  { %v366_v34 = vadd.f32 %v365_v28, %v1776_v59  ;;  %v367_v35 = vpop.f32.mrb[5].mxu0 }
 0x168   :  { %v368_v40 = vadd.f32 %v367_v35, %v1779_v62  ;;  %v369_v41 = vpop.f32.mrb[6].mxu0  ;;  %714 = vmatprep.mubr.bf16.mxu1 %v467_v29 }
 0x169   :  { %v370_v44 = vadd.f32 %v369_v41, %v1776_v59  ;;  %v371_v45 = vpop.f32.mrb[7].mxu0  ;;  %715 = vmatmul.mubr.bf16.vlgmr.msra.gmra.mrb[0].mxu1 %v466_v23  ;;  %v438_v47 = vmax.f32 %v366_v34, 0.0 }
 0x16a   :  { %v372_v46 = vadd.f32 %v371_v45, %v1779_v62  ;;  %v439_v49 = vmax.f32 %v368_v40, 0.0 }
 0x16b   :  { %v440_v48 = vmax.f32 %v370_v44, 0.0 }
 0x16c   :  { %v441_v52 = vmax.f32 %v372_v46, 0.0 }
 0x16d   :  { %v468_v56 = vpack.c.bf16 %v440_v48, %v438_v47 }
 0x16e   :  { %v469_v1 = vpack.c.bf16 %v441_v52, %v439_v49  ;;  %v375_v2 = vpop.f32.mrb[8].mxu0 }
 0x16f   :  { %v376_v3 = vadd.f32 %v375_v2, %v1776_v59  ;;  %v377_v4 = vpop.f32.mrb[9].mxu0 }
 0x170   :  { %v378_v5 = vadd.f32 %v377_v4, %v1779_v62  ;;  %v379_v8 = vpop.f32.mrb[10].mxu0  ;;  %724 = vmatprep.mubr.bf16.mxu1 %v469_v1 }
 0x171   :  { %v442_v11 = vmax.f32 %v376_v3, 0.0  ;;  %v380_v12 = vadd.f32 %v379_v8, %v1776_v59  ;;  %v381_v15 = vpop.f32.mrb[11].mxu0  ;;  %725 = vmatmul.mubr.bf16.gmra.mrb[4].mxu1 %v468_v56 }
 0x172   :  { %v443_v16 = vmax.f32 %v378_v5, 0.0  ;;  %v382_v17 = vadd.f32 %v381_v15, %v1779_v62 }
 0x173   :  { %v444_v22 = vmax.f32 %v380_v12, 0.0 }
 0x174   :  { %v445_v23 = vmax.f32 %v382_v17, 0.0 }
 0x175   :  { %v470_v28 = vpack.c.bf16 %v444_v22, %v442_v11 }
 0x176   :  { %v471_v29 = vpack.c.bf16 %v445_v23, %v443_v16  ;;  %v385_v34 = vpop.f32.mrb[12].mxu0 }
 0x177   :  { %v386_v35 = vadd.f32 %v385_v34, %v1776_v59  ;;  %v387_v40 = vpop.f32.mrb[13].mxu0 }
 0x178   :  { %v388_v41 = vadd.f32 %v387_v40, %v1779_v62  ;;  %v389_v44 = vpop.f32.mrb[14].mxu0  ;;  %734 = vmatprep.mubr.bf16.mxu1 %v471_v29 }
 0x179   :  { %v446_v45 = vmax.f32 %v386_v35, 0.0  ;;  %v390_v46 = vadd.f32 %v389_v44, %v1776_v59  ;;  %v391_v47 = vpop.f32.mrb[15].mxu0  ;;  %735 = vmatmul.mubr.bf16.gmra.mrb[8].mxu1 %v470_v28 }
 0x17a   :  { %v447_v48 = vmax.f32 %v388_v41, 0.0  ;;  %v392_v49 = vadd.f32 %v391_v47, %v1779_v62 }
 0x17b   :  { %v448_v52 = vmax.f32 %v390_v46, 0.0 }
 0x17c   :  { %v449_v56 = vmax.f32 %v392_v49, 0.0 }
 0x17d   :  { %v472_v1 = vpack.c.bf16 %v448_v52, %v446_v45 }
 0x17e   :  { %v473_v2 = vpack.c.bf16 %v449_v56, %v447_v48  ;;  %v395_v3 = vpop.f32.mrb[16].mxu0 }
 0x17f   :  { %v396_v4 = vadd.f32 %v395_v3, %v1776_v59  ;;  %v397_v5 = vpop.f32.mrb[17].mxu0 }
 0x180   :  { %v398_v8 = vadd.f32 %v397_v5, %v1779_v62  ;;  %v399_v11 = vpop.f32.mrb[18].mxu0  ;;  %744 = vmatprep.mubr.bf16.mxu1 %v473_v2 }
 0x181   :  { %v450_v12 = vmax.f32 %v396_v4, 0.0  ;;  %v400_v15 = vadd.f32 %v399_v11, %v1776_v59  ;;  %v401_v16 = vpop.f32.mrb[19].mxu0  ;;  %745 = vmatmul.mubr.bf16.gmra.mrb[12].mxu1 %v472_v1 }
 0x182   :  { %v451_v17 = vmax.f32 %v398_v8, 0.0  ;;  %v402_v22 = vadd.f32 %v401_v16, %v1779_v62 }
 0x183   :  { %v452_v23 = vmax.f32 %v400_v15, 0.0 }
 0x184   :  { %v453_v28 = vmax.f32 %v402_v22, 0.0 }
 0x185   :  { %v474_v29 = vpack.c.bf16 %v452_v23, %v450_v12 }
 0x186   :  { %v475_v34 = vpack.c.bf16 %v453_v28, %v451_v17  ;;  %v405_v35 = vpop.f32.mrb[20].mxu0 }
 0x187   :  { %v406_v40 = vadd.f32 %v405_v35, %v1776_v59  ;;  %v407_v41 = vpop.f32.mrb[21].mxu0 }
 0x188   :  { %v408_v44 = vadd.f32 %v407_v41, %v1779_v62  ;;  %v409_v45 = vpop.f32.mrb[22].mxu0  ;;  %754 = vmatprep.mubr.bf16.mxu1 %v475_v34 }
 0x189   :  { %v454_v46 = vmax.f32 %v406_v40, 0.0  ;;  %v410_v47 = vadd.f32 %v409_v45, %v1776_v59  ;;  %v411_v48 = vpop.f32.mrb[23].mxu0  ;;  %755 = vmatmul.mubr.bf16.gmra.mrb[16].mxu1 %v474_v29 }
 0x18a   :  { %v455_v49 = vmax.f32 %v408_v44, 0.0  ;;  %v412_v52 = vadd.f32 %v411_v48, %v1779_v62 }
 0x18b   :  { %v456_v56 = vmax.f32 %v410_v47, 0.0 }
 0x18c   :  { %v457_v1 = vmax.f32 %v412_v52, 0.0 }
 0x18d   :  { %v476_v2 = vpack.c.bf16 %v456_v56, %v454_v46 }
 0x18e   :  { %v477_v3 = vpack.c.bf16 %v457_v1, %v455_v49  ;;  %v415_v4 = vpop.f32.mrb[24].mxu0 }
 0x18f   :  { %v416_v5 = vadd.f32 %v415_v4, %v1776_v59  ;;  %v417_v8 = vpop.f32.mrb[25].mxu0 }
 0x190   :  { %v418_v11 = vadd.f32 %v417_v8, %v1779_v62  ;;  %v419_v12 = vpop.f32.mrb[26].mxu0  ;;  %764 = vmatprep.mubr.bf16.mxu1 %v477_v3 }
 0x191   :  { %v458_v15 = vmax.f32 %v416_v5, 0.0  ;;  %v420_v16 = vadd.f32 %v419_v12, %v1776_v59  ;;  %v421_v17 = vpop.f32.mrb[27].mxu0  ;;  %765 = vmatmul.mubr.bf16.gmra.mrb[20].mxu1 %v476_v2  ;;  %v516_v5 = vsub.s32 1, %v1768_v55 }
 0x192   :  { %v459_v22 = vmax.f32 %v418_v11, 0.0  ;;  %v422_v23 = vadd.f32 %v421_v17, %v1779_v62 }
 0x193   :  { %v460_v28 = vmax.f32 %v420_v16, 0.0  ;;  %v1815_v8 = vrot.slane %v1771_v57, %v516_v5  ;;  %v1818_v11 = vrot.slane %v1773_v58, %v516_v5 }
 0x194   :  { %v461_v29 = vmax.f32 %v422_v23, 0.0 }
 0x195   :  { %v478_v34 = vpack.c.bf16 %v460_v28, %v458_v15 }
 0x196   :  { %v479_v35 = vpack.c.bf16 %v461_v29, %v459_v22  ;;  %v425_v40 = vpop.f32.mrb[28].mxu0 }
 0x197   :  { %v426_v41 = vadd.f32 %v425_v40, %v1776_v59  ;;  %v427_v44 = vpop.f32.mrb[29].mxu0 }
 0x198   :  { %v428_v45 = vadd.f32 %v427_v44, %v1779_v62  ;;  %v429_v46 = vpop.f32.mrb[30].mxu0  ;;  %774 = vmatprep.mubr.bf16.mxu1 %v479_v35 }
 0x199   :  { %v462_v47 = vmax.f32 %v426_v41, 0.0  ;;  %v430_v48 = vadd.f32 %v429_v46, %v1776_v59  ;;  %v431_v49 = vpop.f32.mrb[31].mxu0  ;;  %775 = vmatmul.mubr.bf16.gmra.mrb[24].mxu1 %v478_v34 }
 0x19a   :  { %v463_v52 = vmax.f32 %v428_v45, 0.0  ;;  %v432_v56 = vadd.f32 %v431_v49, %v1779_v62 }
 0x19b   :  { %v464_v1 = vmax.f32 %v430_v48, 0.0 }
 0x19c   :  { %v465_v2 = vmax.f32 %v432_v56, 0.0 }
 0x19d   :  { %v480_v3 = vpack.c.bf16 %v464_v1, %v462_v47 }
 0x19e   :  { %v481_v4 = vpack.c.bf16 %v465_v2, %v463_v52 }
 0x1a0   :  { %784 = vmatprep.mubr.bf16.mxu1 %v481_v4 }
 0x1a1   :  { %785 = vmatmul.mubr.bf16.gmra.mrb[28].mxu1 %v480_v3 }
 0x23c   :  { %v716_v59 = vpop.f32.mrb[0].mxu1 }
 0x23d   :  { %v717_v12 = vadd.f32 %v716_v59, %v1815_v8  ;;  %v718_v15 = vpop.f32.mrb[1].mxu1 }
 0x23e   :  { %v719_v62 = vadd.f32 %v718_v15, %v1818_v11  ;;  %v720_v16 = vpop.f32.mrb[2].mxu1 }
 0x23f   :  { %v1823_v17 = vadd.f32 %v717_v12, %v1678_v50  ;;  %v721_v22 = vadd.f32 %v720_v16, %v1815_v8  ;;  %v722_v23 = vpop.f32.mrb[3].mxu1 }
 0x240   :  { %v1827_v28 = vadd.f32 %v719_v62, %v1672_v13  ;;  %v723_v29 = vadd.f32 %v722_v23, %v1818_v11 }
 0x241   :  { %v1831_v34 = vadd.f32 %v721_v22, %v1680_v51  ;;  %v891_v51 = vmul.f32 %v1823_v17, %v1823_v17 }
 0x242   :  { %v1834_v35 = vadd.f32 %v723_v29, %v1674_v14  ;;  %v827_v40 = vadd.f32 %v1827_v28, %v1823_v17  ;;  %v892_v14 = vmul.f32 %v1827_v28, %v1827_v28 }
 0x243   :  { %v893_v50 = vmul.f32 %v1831_v34, %v1831_v34 }
 0x244   :  { %v726_v41 = vpop.f32.mrb[4].mxu1  ;;  %828 = vadd.xlane.f32.xlu0 %v827_v40  ;;  %v894_v13 = vmul.f32 %v1834_v35, %v1834_v35  ;;  %v830_v49 = vadd.f32 %v1834_v35, %v1831_v34  ;;  %v923_v5 = vadd.f32 %v892_v14, %v891_v51 }
 0x245   :  { %v727_v44 = vadd.f32 %v726_v41, %v1815_v8  ;;  %v728_v45 = vpop.f32.mrb[5].mxu1 }
 0x246   :  { %v729_v46 = vadd.f32 %v728_v45, %v1818_v11  ;;  %v730_v47 = vpop.f32.mrb[6].mxu1  ;;  %v926_v48 = vadd.f32 %v894_v13, %v893_v50 }
 0x247   :  { %v1851_v52 = vadd.f32 %v727_v44, %v1690_v60  ;;  %v731_v56 = vadd.f32 %v730_v47, %v1815_v8  ;;  %v732_v1 = vpop.f32.mrb[7].mxu1 }
 0x248   :  { %v1855_v2 = vadd.f32 %v729_v46, %v1682_v53  ;;  %v733_v3 = vadd.f32 %v732_v1, %v1818_v11  ;;  %927 = vadd.xlane.f32.xlu1 %v926_v48  ;;  %831 = vadd.xlane.f32.xlu0 %v830_v49 }
 0x249   :  { %v1859_v4 = vadd.f32 %v731_v56, %v1692_v61  ;;  %v895_v12 = vmul.f32 %v1851_v52, %v1851_v52 }
 0x24a   :  { %v1862_v59 = vadd.f32 %v733_v3, %v1684_v54  ;;  %v833_v60 = vadd.f32 %v1855_v2, %v1851_v52  ;;  %v896_v53 = vmul.f32 %v1855_v2, %v1855_v2 }
 0x24b   :  { %v897_v16 = vmul.f32 %v1859_v4, %v1859_v4 }
 0x24c   :  { %v736_v15 = vpop.f32.mrb[8].mxu1  ;;  %834 = vadd.xlane.f32.xlu1 %v833_v60  ;;  %924 = vadd.xlane.f32.xlu0 %v923_v5  ;;  %v898_v54 = vmul.f32 %v1862_v59, %v1862_v59  ;;  %v836_v29 = vadd.f32 %v1862_v59, %v1859_v4  ;;  %v929_v40 = vadd.f32 %v896_v53, %v895_v12 }
 0x24d   :  { %v737_v62 = vadd.f32 %v736_v15, %v1815_v8  ;;  %v738_v61 = vpop.f32.mrb[9].mxu1 }
 0x24e   :  { %v739_v22 = vadd.f32 %v738_v61, %v1818_v11  ;;  %v740_v23 = vpop.f32.mrb[10].mxu1  ;;  %v932_v14 = vadd.f32 %v898_v54, %v897_v16 }
 0x24f   :  { %v1879_v50 = vadd.f32 %v737_v62, %v1702_v6  ;;  %v741_v41 = vadd.f32 %v740_v23, %v1815_v8  ;;  %v742_v13 = vpop.f32.mrb[11].mxu1 }
 0x250   :  { %v1883_v44 = vadd.f32 %v739_v22, %v1694_v63  ;;  %v743_v45 = vadd.f32 %v742_v13, %v1818_v11  ;;  %837 = vadd.xlane.f32.xlu1 %v836_v29  ;;  %930 = vadd.xlane.f32.xlu0 %v929_v40 }
 0x251   :  { %v1887_v51 = vadd.f32 %v741_v41, %v1704_v7  ;;  %v899_v47 = vmul.f32 %v1879_v50, %v1879_v50 }
 0x252   :  { %v1890_v46 = vadd.f32 %v743_v45, %v1696_v0  ;;  %v839_v6 = vadd.f32 %v1883_v44, %v1879_v50  ;;  %v900_v63 = vmul.f32 %v1883_v44, %v1883_v44 }
 0x253   :  { %v901_v56 = vmul.f32 %v1887_v51, %v1887_v51 }
 0x254   :  { %v746_v48 = vpop.f32.mrb[12].mxu1  ;;  %933 = vadd.xlane.f32.xlu1 %v932_v14  ;;  %840 = vadd.xlane.f32.xlu0 %v839_v6  ;;  %v902_v0 = vmul.f32 %v1890_v46, %v1890_v46  ;;  %v842_v5 = vadd.f32 %v1890_v46, %v1887_v51  ;;  %v935_v60 = vadd.f32 %v900_v63, %v899_v47 }
 0x255   :  { %v747_v49 = vadd.f32 %v746_v48, %v1815_v8  ;;  %v748_v7 = vpop.f32.mrb[13].mxu1 }
 0x256   :  { %v749_v1 = vadd.f32 %v748_v7, %v1818_v11  ;;  %v750_v3 = vpop.f32.mrb[14].mxu1  ;;  %v938_v54 = vadd.f32 %v902_v0, %v901_v56 }
 0x257   :  { %v1907_v12 = vadd.f32 %v747_v49, %v1714_v18  ;;  %v751_v53 = vadd.f32 %v750_v3, %v1815_v8  ;;  %v752_v15 = vpop.f32.mrb[15].mxu1 }
 0x258   :  { %v1911_v62 = vadd.f32 %v749_v1, %v1706_v9  ;;  %v753_v61 = vadd.f32 %v752_v15, %v1818_v11  ;;  %843 = vadd.xlane.f32.xlu1 %v842_v5  ;;  %936 = vadd.xlane.f32.xlu0 %v935_v60 }
 0x259   :  { %v1915_v16 = vadd.f32 %v751_v53, %v1716_v19  ;;  %v903_v23 = vmul.f32 %v1907_v12, %v1907_v12 }
 0x25a   :  { %v1918_v22 = vadd.f32 %v753_v61, %v1708_v10  ;;  %v845_v18 = vadd.f32 %v1911_v62, %v1907_v12  ;;  %v904_v9 = vmul.f32 %v1911_v62, %v1911_v62 }
 0x25b   :  { %v905_v41 = vmul.f32 %v1915_v16, %v1915_v16 }
 0x25c   :  { %v756_v29 = vpop.f32.mrb[16].mxu1  ;;  %939 = vadd.xlane.f32.xlu1 %v938_v54  ;;  %846 = vadd.xlane.f32.xlu0 %v845_v18  ;;  %v906_v10 = vmul.f32 %v1918_v22, %v1918_v22  ;;  %v848_v14 = vadd.f32 %v1918_v22, %v1915_v16  ;;  %v941_v6 = vadd.f32 %v904_v9, %v903_v23 }
 0x25d   :  { %v757_v40 = vadd.f32 %v756_v29, %v1815_v8  ;;  %v758_v19 = vpop.f32.mrb[17].mxu1 }
 0x25e   :  { %v759_v13 = vadd.f32 %v758_v19, %v1818_v11  ;;  %v760_v45 = vpop.f32.mrb[18].mxu1  ;;  %v944_v0 = vadd.f32 %v906_v10, %v905_v41 }
 0x25f   :  { %v1935_v47 = vadd.f32 %v757_v40, %v1726_v24  ;;  %v761_v63 = vadd.f32 %v760_v45, %v1815_v8  ;;  %v762_v48 = vpop.f32.mrb[19].mxu1 }
 0x260   :  { %v1939_v49 = vadd.f32 %v759_v13, %v1718_v20  ;;  %v763_v7 = vadd.f32 %v762_v48, %v1818_v11  ;;  %849 = vadd.xlane.f32.xlu1 %v848_v14  ;;  %942 = vadd.xlane.f32.xlu0 %v941_v6 }
 0x261   :  { %v1943_v56 = vadd.f32 %v761_v63, %v1728_v25  ;;  %v907_v3 = vmul.f32 %v1935_v47, %v1935_v47 }
 0x262   :  { %v1946_v1 = vadd.f32 %v763_v7, %v1720_v21  ;;  %v851_v24 = vadd.f32 %v1939_v49, %v1935_v47  ;;  %v908_v20 = vmul.f32 %v1939_v49, %v1939_v49 }
 0x263   :  { %v909_v53 = vmul.f32 %v1943_v56, %v1943_v56 }
 0x264   :  { %v766_v5 = vpop.f32.mrb[20].mxu1  ;;  %945 = vadd.xlane.f32.xlu1 %v944_v0  ;;  %852 = vadd.xlane.f32.xlu0 %v851_v24  ;;  %v910_v21 = vmul.f32 %v1946_v1, %v1946_v1  ;;  %v854_v54 = vadd.f32 %v1946_v1, %v1943_v56  ;;  %v947_v18 = vadd.f32 %v908_v20, %v907_v3 }
 0x265   :  { %v767_v60 = vadd.f32 %v766_v5, %v1815_v8  ;;  %v768_v25 = vpop.f32.mrb[21].mxu1 }
 0x266   :  { %v769_v15 = vadd.f32 %v768_v25, %v1818_v11  ;;  %v770_v61 = vpop.f32.mrb[22].mxu1  ;;  %v950_v10 = vadd.f32 %v910_v21, %v909_v53 }
 0x267   :  { %v1963_v23 = vadd.f32 %v767_v60, %v1738_v30  ;;  %v771_v9 = vadd.f32 %v770_v61, %v1815_v8  ;;  %v772_v29 = vpop.f32.mrb[23].mxu1 }
 0x268   :  { %v1967_v40 = vadd.f32 %v769_v15, %v1730_v26  ;;  %v773_v19 = vadd.f32 %v772_v29, %v1818_v11  ;;  %855 = vadd.xlane.f32.xlu1 %v854_v54  ;;  %948 = vadd.xlane.f32.xlu0 %v947_v18 }
 0x269   :  { %v1971_v41 = vadd.f32 %v771_v9, %v1740_v31  ;;  %v911_v45 = vmul.f32 %v1963_v23, %v1963_v23 }
 0x26a   :  { %v1974_v13 = vadd.f32 %v773_v19, %v1732_v27  ;;  %v857_v30 = vadd.f32 %v1967_v40, %v1963_v23  ;;  %v912_v26 = vmul.f32 %v1967_v40, %v1967_v40 }
 0x26b   :  { %v913_v63 = vmul.f32 %v1971_v41, %v1971_v41 }
 0x26c   :  { %v776_v14 = vpop.f32.mrb[24].mxu1  ;;  %951 = vadd.xlane.f32.xlu1 %v950_v10  ;;  %858 = vadd.xlane.f32.xlu0 %v857_v30  ;;  %v914_v27 = vmul.f32 %v1974_v13, %v1974_v13  ;;  %v860_v0 = vadd.f32 %v1974_v13, %v1971_v41  ;;  %v953_v24 = vadd.f32 %v912_v26, %v911_v45 }
 0x26d   :  { %v777_v6 = vadd.f32 %v776_v14, %v1815_v8  ;;  %v778_v31 = vpop.f32.mrb[25].mxu1 }
 0x26e   :  { %v779_v48 = vadd.f32 %v778_v31, %v1818_v11  ;;  %v780_v7 = vpop.f32.mrb[26].mxu1  ;;  %v956_v21 = vadd.f32 %v914_v27, %v913_v63 }
 0x26f   :  { %v1991_v3 = vadd.f32 %v777_v6, %v1750_v36  ;;  %v781_v20 = vadd.f32 %v780_v7, %v1815_v8  ;;  %v782_v5 = vpop.f32.mrb[27].mxu1 }
 0x270   :  { %v1995_v60 = vadd.f32 %v779_v48, %v1742_v32  ;;  %v783_v25 = vadd.f32 %v782_v5, %v1818_v11  ;;  %861 = vadd.xlane.f32.xlu1 %v860_v0  ;;  %954 = vadd.xlane.f32.xlu0 %v953_v24 }
 0x271   :  { %v1999_v53 = vadd.f32 %v781_v20, %v1752_v37  ;;  %v915_v61 = vmul.f32 %v1991_v3, %v1991_v3 }
 0x272   :  { %v2002_v15 = vadd.f32 %v783_v25, %v1744_v33  ;;  %v863_v36 = vadd.f32 %v1995_v60, %v1991_v3  ;;  %v916_v32 = vmul.f32 %v1995_v60, %v1995_v60 }
 0x273   :  { %v917_v9 = vmul.f32 %v1999_v53, %v1999_v53 }
 0x274   :  { %v786_v54 = vpop.f32.mrb[28].mxu1  ;;  %957 = vadd.xlane.f32.xlu1 %v956_v21  ;;  %864 = vadd.xlane.f32.xlu0 %v863_v36  ;;  %v918_v33 = vmul.f32 %v2002_v15, %v2002_v15  ;;  %v866_v10 = vadd.f32 %v2002_v15, %v1999_v53  ;;  %v959_v30 = vadd.f32 %v916_v32, %v915_v61 }
 0x275   :  { %v787_v18 = vadd.f32 %v786_v54, %v1815_v8  ;;  %v788_v37 = vpop.f32.mrb[29].mxu1 }
 0x276   :  { %v789_v29 = vadd.f32 %v788_v37, %v1818_v11  ;;  %v790_v19 = vpop.f32.mrb[30].mxu1  ;;  %v962_v27 = vadd.f32 %v918_v33, %v917_v9 }
 0x277   :  { %v2019_v45 = vadd.f32 %v787_v18, %v1762_v42  ;;  %v791_v26 = vadd.f32 %v790_v19, %v1815_v8  ;;  %v792_v14 = vpop.f32.mrb[31].mxu1 }
 0x278   :  { %v2023_v6 = vadd.f32 %v789_v29, %v1754_v38  ;;  %v793_v31 = vadd.f32 %v792_v14, %v1818_v11  ;;  %867 = vadd.xlane.f32.xlu1 %v866_v10  ;;  %960 = vadd.xlane.f32.xlu0 %v959_v30 }
 0x279   :  { %v2027_v63 = vadd.f32 %v791_v26, %v1764_v43  ;;  %v919_v8 = vmul.f32 %v2019_v45, %v2019_v45 }
 0x27a   :  { %v2030_v48 = vadd.f32 %v793_v31, %v1756_v39  ;;  %v869_v42 = vadd.f32 %v2023_v6, %v2019_v45  ;;  %v920_v38 = vmul.f32 %v2023_v6, %v2023_v6 }
 0x27b   :  { %v921_v7 = vmul.f32 %v2027_v63, %v2027_v63 }
 0x27c   :  { %963 = vadd.xlane.f32.xlu1 %v962_v27  ;;  %870 = vadd.xlane.f32.xlu0 %v869_v42  ;;  %v872_v11 = vadd.f32 %v2030_v48, %v2027_v63  ;;  %v965_v43 = vadd.f32 %v920_v38, %v919_v8  ;;  %v922_v39 = vmul.f32 %v2030_v48, %v2030_v48 }
 0x27e   :  { %v968_v0 = vadd.f32 %v922_v39, %v921_v7 }
 0x280   :  { %873 = vadd.xlane.f32.xlu1 %v872_v11  ;;  %966 = vadd.xlane.f32.xlu0 %v965_v43 }
 0x284   :  { %969 = vadd.xlane.f32.xlu1 %v968_v0 }
 0x2d1   :  { %v829_v24 = vpop.xlane.xlu0 %828 }
 0x2d2   :  { %v2044_v25 = vmul.f32 0.03125, %v829_v24 }
 0x2d4   :  { %v987_v37 = vmul.f32 %v2044_v25, %v2044_v25 }
 0x2d5   :  { %v928_v20 = vpop.xlane.xlu1 %927  ;;  %v832_v5 = vpop.xlane.xlu0 %831 }
 0x2d6   :  { %v876_v21 = vmul.f32 0.03125, %v832_v5  ;;  %v972_v36 = vmul.f32 0.03125, %v928_v20  ;;  %v1133_v20 = vsub.s32 2, %v1768_v55  ;;  %v1173_v5 = vsub.s32 3, %v1768_v55 }
 0x2d8   :  { %v988_v61 = vmul.f32 %v876_v21, %v876_v21 }
 0x2d9   :  { %v835_v32 = vpop.xlane.xlu1 %834  ;;  %v925_v54 = vpop.xlane.xlu0 %924 }
 0x2da   :  { %v1004_v18 = vsub.f32 %v972_v36, %v988_v61  ;;  %v971_v9 = vmul.f32 0.03125, %v925_v54  ;;  %v2048_v33 = vmul.f32 0.03125, %v835_v32 }
 0x2dc   :  { %v1020_v29 = vmax.f32 %v1004_v18, 0.0  ;;  %v1003_v19 = vsub.f32 %v971_v9, %v987_v37  ;;  %v989_v42 = vmul.f32 %v2048_v33, %v2048_v33 }
 0x2dd   :  { %v838_v10 = vpop.xlane.xlu1 %837  ;;  %v931_v30 = vpop.xlane.xlu0 %930 }
 0x2de   :  { %v1068_v26 = vadd.f32 1e-05, %v1020_v29  ;;  %v1019_v14 = vmax.f32 %v1003_v19, 0.0  ;;  %v2050_v31 = vmul.f32 0.03125, %v838_v10  ;;  %v973_v27 = vmul.f32 0.03125, %v931_v30 }
 0x2df   :  { %v2065_v19 = vrot.slane %v1771_v57, %v1133_v20  ;;  %v2068_v10 = vrot.slane %v1771_v57, %v1173_v5 }
 0x2e0   :  { %1431 = vrsqrt.f32 %v1068_v26  ;;  %v1067_v8 = vadd.f32 1e-05, %v1019_v14  ;;  %v1005_v38 = vsub.f32 %v973_v27, %v989_v42  ;;  %v990_v7 = vmul.f32 %v2050_v31, %v2050_v31 }
 0x2e1   :  { %v934_v11 = vpop.xlane.xlu1 %933  ;;  %v841_v43 = vpop.xlane.xlu0 %840  ;;  %v2071_v26 = vrot.slane %v1773_v58, %v1133_v20  ;;  %v2074_v14 = vrot.slane %v1773_v58, %v1173_v5  ;;  %v1037_v27 = vsub.f32 %v1831_v34, %v876_v21  ;;  %v1038_v42 = vsub.f32 %v1834_v35, %v876_v21 }
 0x2e2   :  { %1433 = vrsqrt.f32 %v1067_v8  ;;  %v974_v39 = vmul.f32 0.03125, %v934_v11  ;;  %v2056_v0 = vmul.f32 0.03125, %v841_v43  ;;  %v1021_v24 = vmax.f32 %v1005_v38, 0.0 }
 0x2e3   :  { %v1036_v58 = vsub.f32 %v1827_v28, %v2044_v25 }
 0x2e4   :  { %v1006_v36 = vsub.f32 %v974_v39, %v990_v7  ;;  %v1069_v61 = vadd.f32 1e-05, %v1021_v24  ;;  %v991_v9 = vmul.f32 %v2056_v0, %v2056_v0  ;;  %v1035_v39 = vsub.f32 %v1823_v17, %v2044_v25 }
 0x2e5   :  { %v844_v32 = vpop.xlane.xlu1 %843  ;;  %v937_v54 = vpop.xlane.xlu0 %936  ;;  %v1039_v17 = vsub.f32 %v1851_v52, %v2048_v33 }
 0x2e6   :  { %v1022_v18 = vmax.f32 %v1006_v36, 0.0  ;;  %v2060_v37 = vmul.f32 0.03125, %v844_v32  ;;  %v975_v29 = vmul.f32 0.03125, %v937_v54  ;;  %1435 = vrsqrt.f32 %v1069_v61 }
 0x2e8   :  { %v1070_v30 = vadd.f32 1e-05, %v1022_v18  ;;  %v1007_v55 = vsub.f32 %v975_v29, %v991_v9  ;;  %v992_v57 = vmul.f32 %v2060_v37, %v2060_v37 }
 0x2e9   :  { %v940_v8 = vpop.xlane.xlu1 %939  ;;  %v847_v38 = vpop.xlane.xlu0 %846 }
 0x2ea   :  { %v1432_v11 = vpop.eup %1431  ;;  %1437 = vrsqrt.f32 %v1070_v30  ;;  %v1023_v43 = vmax.f32 %v1007_v55, 0.0  ;;  %v976_v7 = vmul.f32 0.03125, %v940_v8  ;;  %v2084_v21 = vmul.f32 0.03125, %v847_v38 }
 0x2eb   :  { %v1101_v24 = vmul.f32 %v1432_v11, %v1037_v27  ;;  %v1102_v20 = vmul.f32 %v1432_v11, %v1038_v42  ;;  %v1040_v42 = vsub.f32 %v1855_v2, %v2048_v33  ;;  %v1041_v2 = vsub.f32 %v1859_v4, %v2050_v31 }
 0x2ec   :  { %v1434_v34 = vpop.eup %1433  ;;  %v1071_v5 = vadd.f32 1e-05, %v1023_v43  ;;  %v1008_v35 = vsub.f32 %v976_v7, %v992_v57  ;;  %v993_v38 = vmul.f32 %v2084_v21, %v2084_v21  ;;  %v1042_v33 = vsub.f32 %v1862_v59, %v2050_v31 }
 0x2ed   :  { %v1141_v36 = vmul.f32 %v2065_v19, %v1101_v24  ;;  %v1142_v61 = vmul.f32 %v2071_v26, %v1102_v20  ;;  %v1099_v32 = vmul.f32 %v1434_v34, %v1035_v39  ;;  %v1100_v54 = vmul.f32 %v1434_v34, %v1036_v58  ;;  %v850_v18 = vpop.xlane.xlu1 %849  ;;  %v943_v9 = vpop.xlane.xlu0 %942 }
 0x2ee   :  { %1439 = vrsqrt.f32 %v1071_v5  ;;  %v1024_v28 = vmax.f32 %v1008_v35, 0.0  ;;  %v2090_v25 = vmul.f32 0.03125, %v850_v18  ;;  %v977_v52 = vmul.f32 0.03125, %v943_v9 }
 0x2ef   :  { %v1181_v29 = vadd.f32 %v2068_v10, %v1141_v36  ;;  %v1182_v30 = vadd.f32 %v2074_v14, %v1142_v61  ;;  %v1139_v55 = vmul.f32 %v2065_v19, %v1099_v32  ;;  %v1140_v27 = vmul.f32 %v2071_v26, %v1100_v54 }
 0x2f0   :  { %v1072_v8 = vadd.f32 1e-05, %v1024_v28  ;;  %v1436_v11 = vpop.eup %1435  ;;  %v1009_v20 = vsub.f32 %v977_v52, %v993_v38  ;;  %v994_v34 = vmul.f32 %v2090_v25, %v2090_v25  ;;  %v1043_v31 = vsub.f32 %v1879_v50, %v2056_v0 }
 0x2f1   :  { %1213 = vst [vmem:[#allocation10 + $0x10] sm:$0xff] %v1181_v29  ;;  %1214 = vst [vmem:[#allocation10 + $0x18] sm:$0xff] %v1182_v30  ;;  %v1179_v43 = vadd.f32 %v2068_v10, %v1139_v55  ;;  %v1180_v57 = vadd.f32 %v2074_v14, %v1140_v27  ;;  %v946_v7 = vpop.xlane.xlu1 %945  ;;  %v853_v39 = vpop.xlane.xlu0 %852  ;;  %v1103_v58 = vmul.f32 %v1436_v11, %v1039_v17 }
 0x2f2   :  { %v1104_v24 = vmul.f32 %v1436_v11, %v1040_v42  ;;  %1441 = vrsqrt.f32 %v1072_v8  ;;  %v978_v5 = vmul.f32 0.03125, %v946_v7  ;;  %v1025_v32 = vmax.f32 %v1009_v20, 0.0 }
 0x2f3   :  { %1211 = vst [vmem:[#allocation10] sm:$0xff] %v1179_v43  ;;  %1212 = vst [vmem:[#allocation10 + $0x8] sm:$0xff] %v1180_v57  ;;  %v1143_v36 = vmul.f32 %v2065_v19, %v1103_v58  ;;  %v2110_v54 = vmul.f32 0.03125, %v853_v39  ;;  %v1044_v42 = vsub.f32 %v1883_v44, %v2056_v0  ;;  %v1045_v44 = vsub.f32 %v1887_v51, %v2060_v37 }
 0x2f4   :  { %v1438_v35 = vpop.eup %1437  ;;  %v1144_v61 = vmul.f32 %v2071_v26, %v1104_v24  ;;  %v1010_v17 = vsub.f32 %v978_v5, %v994_v34  ;;  %v1073_v30 = vadd.f32 1e-05, %v1025_v32 }
 0x2f5   :  { %v1105_v18 = vmul.f32 %v1438_v35, %v1041_v2  ;;  %v1106_v9 = vmul.f32 %v1438_v35, %v1042_v33  ;;  %v856_v28 = vpop.xlane.xlu1 %855  ;;  %v949_v4 = vpop.xlane.xlu0 %948  ;;  %v1183_v29 = vadd.f32 %v2068_v10, %v1143_v36  ;;  %v995_v11 = vmul.f32 %v2110_v54, %v2110_v54 }
 0x2f6   :  { %v1184_v59 = vadd.f32 %v2074_v14, %v1144_v61  ;;  %v1026_v8 = vmax.f32 %v1010_v17, 0.0  ;;  %1443 = vrsqrt.f32 %v1073_v30  ;;  %v2120_v52 = vmul.f32 0.03125, %v856_v28 }
 0x2f7   :  { %v1145_v55 = vmul.f32 %v2065_v19, %v1105_v18  ;;  %v1146_v27 = vmul.f32 %v2071_v26, %v1106_v9  ;;  %1215 = vst [vmem:[#allocation10 + $0x20] sm:$0xff] %v1183_v29  ;;  %v979_v43 = vmul.f32 0.03125, %v949_v4  ;;  %v1046_v2 = vsub.f32 %v1890_v46, %v2060_v37 }
 0x2f8   :  { %v1440_v38 = vpop.eup %1439  ;;  %1216 = vst [vmem:[#allocation10 + $0x28] sm:$0xff] %v1184_v59  ;;  %v1074_v0 = vadd.f32 1e-05, %v1026_v8  ;;  %v996_v61 = vmul.f32 %v2120_v52, %v2120_v52 }
 0x2f9   :  { %v1185_v50 = vadd.f32 %v2068_v10, %v1145_v55  ;;  %v1186_v57 = vadd.f32 %v2074_v14, %v1146_v27  ;;  %v1107_v7 = vmul.f32 %v1440_v38, %v1043_v31  ;;  %v1108_v39 = vmul.f32 %v1440_v38, %v1044_v42  ;;  %v952_v58 = vpop.xlane.xlu1 %951  ;;  %v859_v24 = vpop.xlane.xlu0 %858 }
 0x2fa   :  { %v1011_v20 = vsub.f32 %v979_v43, %v995_v11  ;;  %v980_v5 = vmul.f32 0.03125, %v952_v58  ;;  %1445 = vrsqrt.f32 %v1074_v0  ;;  %v2134_v32 = vmul.f32 0.03125, %v859_v24 }
 0x2fb   :  { %1217 = vst [vmem:[#allocation10 + $0x30] sm:$0xff] %v1185_v50  ;;  %1218 = vst [vmem:[#allocation10 + $0x38] sm:$0xff] %v1186_v57  ;;  %v1147_v33 = vmul.f32 %v2065_v19, %v1107_v7  ;;  %v1148_v34 = vmul.f32 %v2071_v26, %v1108_v39  ;;  %v1047_v38 = vsub.f32 %v1907_v12, %v2084_v21 }
 0x2fc   :  { %v1442_v35 = vpop.eup %1441  ;;  %v1027_v36 = vmax.f32 %v1011_v20, 0.0  ;;  %v1012_v4 = vsub.f32 %v980_v5, %v996_v61  ;;  %v997_v55 = vmul.f32 %v2134_v32, %v2134_v32  ;;  %v1048_v11 = vsub.f32 %v1911_v62, %v2084_v21 }
 0x2fd   :  { %v1187_v51 = vadd.f32 %v2068_v10, %v1147_v33  ;;  %v1188_v18 = vadd.f32 %v2074_v14, %v1148_v34  ;;  %v1109_v9 = vmul.f32 %v1442_v35, %v1045_v44  ;;  %v1110_v17 = vmul.f32 %v1442_v35, %v1046_v2  ;;  %v862_v46 = vpop.xlane.xlu1 %861  ;;  %v955_v37 = vpop.xlane.xlu0 %954 }
 0x2fe   :  { %v1075_v28 = vadd.f32 1e-05, %v1027_v36  ;;  %v2140_v31 = vmul.f32 0.03125, %v862_v46  ;;  %v1028_v30 = vmax.f32 %v1012_v4, 0.0  ;;  %v981_v27 = vmul.f32 0.03125, %v955_v37 }
 0x2ff   :  { %1219 = vst [vmem:[#allocation10 + $0x40] sm:$0xff] %v1187_v51  ;;  %1220 = vst [vmem:[#allocation10 + $0x48] sm:$0xff] %v1188_v18  ;;  %v1149_v29 = vmul.f32 %v2065_v19, %v1109_v9  ;;  %v1150_v59 = vmul.f32 %v2071_v26, %v1110_v17  ;;  %v1049_v20 = vsub.f32 %v1915_v16, %v2090_v25 }
 0x300   :  { %1447 = vrsqrt.f32 %v1075_v28  ;;  %v1444_v57 = vpop.eup %1443  ;;  %v1076_v7 = vadd.f32 1e-05, %v1028_v30  ;;  %v1013_v39 = vsub.f32 %v981_v27, %v997_v55  ;;  %v998_v58 = vmul.f32 %v2140_v31, %v2140_v31 }
 0x301   :  { %v1189_v42 = vadd.f32 %v2068_v10, %v1149_v29  ;;  %v1190_v8 = vadd.f32 %v2074_v14, %v1150_v59  ;;  %v958_v43 = vpop.xlane.xlu1 %957  ;;  %v865_v50 = vpop.xlane.xlu0 %864  ;;  %v1111_v44 = vmul.f32 %v1444_v57, %v1047_v38  ;;  %v1112_v0 = vmul.f32 %v1444_v57, %v1048_v11 }
 0x302   :  { %v982_v24 = vmul.f32 0.03125, %v958_v43  ;;  %1449 = vrsqrt.f32 %v1076_v7  ;;  %v1029_v12 = vmax.f32 %v1013_v39, 0.0  ;;  %v1050_v62 = vsub.f32 %v1918_v22, %v2090_v25 }
 0x303   :  { %1221 = vst [vmem:[#allocation10 + $0x50] sm:$0xff] %v1189_v42  ;;  %1222 = vst [vmem:[#allocation10 + $0x58] sm:$0xff] %v1190_v8  ;;  %v1151_v21 = vmul.f32 %v2065_v19, %v1111_v44  ;;  %v1152_v33 = vmul.f32 %v2071_v26, %v1112_v0  ;;  %v2158_v34 = vmul.f32 0.03125, %v865_v50  ;;  %v1051_v22 = vsub.f32 %v1935_v47, %v2110_v54 }
 0x304   :  { %v1014_v2 = vsub.f32 %v982_v24, %v998_v58  ;;  %v1446_v36 = vpop.eup %1445  ;;  %v1077_v61 = vadd.f32 1e-05, %v1029_v12  ;;  %v1052_v25 = vsub.f32 %v1939_v49, %v2110_v54  ;;  %v1053_v43 = vsub.f32 %v1943_v56, %v2120_v52 }
 0x305   :  { %v868_v5 = vpop.xlane.xlu1 %867  ;;  %v961_v35 = vpop.xlane.xlu0 %960  ;;  %v1191_v16 = vadd.f32 %v2068_v10, %v1151_v21  ;;  %v1192_v9 = vadd.f32 %v2074_v14, %v1152_v33  ;;  %v1113_v17 = vmul.f32 %v1446_v36, %v1049_v20  ;;  %v1114_v46 = vmul.f32 %v1446_v36, %v1050_v62 }
 0x306   :  { %v1030_v51 = vmax.f32 %v1014_v2, 0.0  ;;  %v2160_v18 = vmul.f32 0.03125, %v868_v5  ;;  %1451 = vrsqrt.f32 %v1077_v61  ;;  %v999_v29 = vmul.f32 %v2158_v34, %v2158_v34 }
 0x307   :  { %1223 = vst [vmem:[#allocation10 + $0x60] sm:$0xff] %v1191_v16  ;;  %1224 = vst [vmem:[#allocation10 + $0x68] sm:$0xff] %v1192_v9  ;;  %v1153_v28 = vmul.f32 %v2065_v19, %v1113_v17  ;;  %v1154_v4 = vmul.f32 %v2071_v26, %v1114_v46  ;;  %v983_v59 = vmul.f32 0.03125, %v961_v35  ;;  %v1054_v7 = vsub.f32 %v1946_v1, %v2120_v52 }
 0x308   :  { %v1078_v37 = vadd.f32 1e-05, %v1030_v51  ;;  %v1000_v47 = vmul.f32 %v2160_v18, %v2160_v18  ;;  %v1055_v5 = vsub.f32 %v1963_v23, %v2134_v32  ;;  %v1056_v35 = vsub.f32 %v1967_v40, %v2134_v32 }
 0x309   :  { %v964_v30 = vpop.xlane.xlu1 %963  ;;  %v871_v55 = vpop.xlane.xlu0 %870  ;;  %v1193_v42 = vadd.f32 %v2068_v10, %v1153_v28  ;;  %v1194_v8 = vadd.f32 %v2074_v14, %v1154_v4  ;;  %v1015_v50 = vsub.f32 %v983_v59, %v999_v29  ;;  %v1057_v9 = vsub.f32 %v1971_v41, %v2140_v31 }
 0x30a   :  { %v1448_v27 = vpop.eup %1447  ;;  %1453 = vrsqrt.f32 %v1078_v37  ;;  %v984_v49 = vmul.f32 0.03125, %v964_v30  ;;  %v2174_v54 = vmul.f32 0.03125, %v871_v55  ;;  %v1058_v23 = vsub.f32 %v1974_v13, %v2140_v31 }
 0x30b   :  { %v1115_v38 = vmul.f32 %v1448_v27, %v1051_v22  ;;  %v1116_v11 = vmul.f32 %v1448_v27, %v1052_v25  ;;  %1225 = vst [vmem:[#allocation10 + $0x70] sm:$0xff] %v1193_v42  ;;  %1226 = vst [vmem:[#allocation10 + $0x78] sm:$0xff] %v1194_v8  ;;  %v1031_v12 = vmax.f32 %v1015_v50, 0.0 }
 0x30c   :  { %v1016_v57 = vsub.f32 %v984_v49, %v1000_v47  ;;  %v1001_v44 = vmul.f32 %v2174_v54, %v2174_v54  ;;  %v1450_v20 = vpop.eup %1449 }
 0x30d   :  { %v1155_v39 = vmul.f32 %v2065_v19, %v1115_v38  ;;  %v1156_v58 = vmul.f32 %v2071_v26, %v1116_v11  ;;  %v874_v24 = vpop.xlane.xlu1 %873  ;;  %v967_v0 = vpop.xlane.xlu0 %966  ;;  %v1117_v1 = vmul.f32 %v1450_v20, %v1053_v43  ;;  %v1118_v52 = vmul.f32 %v1450_v20, %v1054_v7 }
 0x30e   :  { %v1032_v2 = vmax.f32 %v1016_v57, 0.0  ;;  %v2186_v56 = vmul.f32 0.03125, %v874_v24  ;;  %v985_v62 = vmul.f32 0.03125, %v967_v0  ;;  %v1079_v36 = vadd.f32 1e-05, %v1031_v12 }
 0x30f   :  { %v1195_v21 = vadd.f32 %v2068_v10, %v1155_v39  ;;  %v1196_v33 = vadd.f32 %v2074_v14, %v1156_v58  ;;  %v1157_v51 = vmul.f32 %v2065_v19, %v1117_v1  ;;  %v1158_v16 = vmul.f32 %v2071_v26, %v1118_v52 }
 0x310   :  { %v1080_v61 = vadd.f32 1e-05, %v1032_v2  ;;  %v1017_v17 = vsub.f32 %v985_v62, %v1001_v44  ;;  %v1452_v22 = vpop.eup %1451  ;;  %1455 = vrsqrt.f32 %v1079_v36  ;;  %v1002_v40 = vmul.f32 %v2186_v56, %v2186_v56 }
 0x311   :  { %1227 = vst [vmem:[#allocation10 + $0x80] sm:$0xff] %v1195_v21  ;;  %1228 = vst [vmem:[#allocation10 + $0x88] sm:$0xff] %v1196_v33  ;;  %v970_v46 = vpop.xlane.xlu1 %969  ;;  %v1197_v25 = vadd.f32 %v2068_v10, %v1157_v51  ;;  %v1198_v37 = vadd.f32 %v2074_v14, %v1158_v16  ;;  %v1119_v28 = vmul.f32 %v1452_v22, %v1055_v5 }
 0x312   :  { %v986_v32 = vmul.f32 0.03125, %v970_v46  ;;  %v1120_v4 = vmul.f32 %v1452_v22, %v1056_v35  ;;  %1457 = vrsqrt.f32 %v1080_v61  ;;  %v1033_v41 = vmax.f32 %v1017_v17, 0.0 }
 0x313   :  { %1229 = vst [vmem:[#allocation10 + $0x90] sm:$0xff] %v1197_v25  ;;  %1230 = vst [vmem:[#allocation10 + $0x98] sm:$0xff] %v1198_v37  ;;  %v1159_v30 = vmul.f32 %v2065_v19, %v1119_v28  ;;  %v1059_v57 = vsub.f32 %v1991_v3, %v2158_v34  ;;  %v1060_v7 = vsub.f32 %v1995_v60, %v2158_v34 }
 0x314   :  { %v1454_v29 = vpop.eup %1453  ;;  %v1018_v59 = vsub.f32 %v986_v32, %v1002_v40  ;;  %v1160_v13 = vmul.f32 %v2071_v26, %v1120_v4  ;;  %v1081_v27 = vadd.f32 1e-05, %v1033_v41  ;;  %v1061_v58 = vsub.f32 %v1999_v53, %v2160_v18 }
 0x315   :  { %v1121_v31 = vmul.f32 %v1454_v29, %v1057_v9  ;;  %v1122_v55 = vmul.f32 %v1454_v29, %v1058_v23  ;;  %v1199_v49 = vadd.f32 %v2068_v10, %v1159_v30  ;;  %v1062_v24 = vsub.f32 %v2002_v15, %v2160_v18 }
 0x316   :  { %v1034_v47 = vmax.f32 %v1018_v59, 0.0  ;;  %v1200_v42 = vadd.f32 %v2074_v14, %v1160_v13  ;;  %1459 = vrsqrt.f32 %v1081_v27  ;;  %v1063_v3 = vsub.f32 %v2019_v45, %v2174_v54 }
 0x317   :  { %v1161_v8 = vmul.f32 %v2065_v19, %v1121_v31  ;;  %v1162_v38 = vmul.f32 %v2071_v26, %v1122_v55  ;;  %1231 = vst [vmem:[#allocation10 + $0xa0] sm:$0xff] %v1199_v49  ;;  %v1064_v60 = vsub.f32 %v2023_v6, %v2174_v54  ;;  %v1065_v1 = vsub.f32 %v2027_v63, %v2186_v56 }
 0x318   :  { %v1082_v11 = vadd.f32 1e-05, %v1034_v47  ;;  %1232 = vst [vmem:[#allocation10 + $0xa8] sm:$0xff] %v1200_v42  ;;  %v1066_v52 = vsub.f32 %v2030_v48, %v2186_v56 }
 0x319   :  { %v1201_v43 = vadd.f32 %v2068_v10, %v1161_v8  ;;  %v1202_v50 = vadd.f32 %v2074_v14, %v1162_v38 }
 0x31a   :  { %1461 = vrsqrt.f32 %v1082_v11  ;;  %v1456_v39 = vpop.eup %1455 }
 0x31b   :  { %1233 = vst [vmem:[#allocation10 + $0xb0] sm:$0xff] %v1201_v43  ;;  %1234 = vst [vmem:[#allocation10 + $0xb8] sm:$0xff] %v1202_v50  ;;  %v1123_v44 = vmul.f32 %v1456_v39, %v1059_v57  ;;  %v1124_v0 = vmul.f32 %v1456_v39, %v1060_v7 }
 0x31c   :  { %v1458_v20 = vpop.eup %1457 }
 0x31d   :  { %v1163_v12 = vmul.f32 %v2065_v19, %v1123_v44  ;;  %v1164_v2 = vmul.f32 %v2071_v26, %v1124_v0  ;;  %v1125_v62 = vmul.f32 %v1458_v20, %v1061_v58  ;;  %v1126_v21 = vmul.f32 %v1458_v20, %v1062_v24 }
 0x31f   :  { %v1203_v53 = vadd.f32 %v2068_v10, %v1163_v12  ;;  %v1204_v34 = vadd.f32 %v2074_v14, %v1164_v2  ;;  %v1165_v15 = vmul.f32 %v2065_v19, %v1125_v62  ;;  %v1166_v18 = vmul.f32 %v2071_v26, %v1126_v21 }
 0x320   :  { %v1460_v33 = vpop.eup %1459 }
 0x321   :  { %1235 = vst [vmem:[#allocation10 + $0xc0] sm:$0xff] %v1203_v53  ;;  %1236 = vst [vmem:[#allocation10 + $0xc8] sm:$0xff] %v1204_v34  ;;  %v1205_v45 = vadd.f32 %v2068_v10, %v1165_v15  ;;  %v1206_v6 = vadd.f32 %v2074_v14, %v1166_v18  ;;  %v1127_v54 = vmul.f32 %v1460_v33, %v1063_v3 }
 0x322   :  { %v1128_v5 = vmul.f32 %v1460_v33, %v1064_v60 }
 0x323   :  { %1237 = vst [vmem:[#allocation10 + $0xd0] sm:$0xff] %v1205_v45  ;;  %1238 = vst [vmem:[#allocation10 + $0xd8] sm:$0xff] %v1206_v6  ;;  %v1167_v36 = vmul.f32 %v2065_v19, %v1127_v54 }
 0x324   :  { %v1462_v35 = vpop.eup %1461  ;;  %v1168_v61 = vmul.f32 %v2071_v26, %v1128_v5 }
 0x325   :  { %v1129_v51 = vmul.f32 %v1462_v35, %v1065_v1  ;;  %v1130_v63 = vmul.f32 %v1462_v35, %v1066_v52  ;;  %v1207_v48 = vadd.f32 %v2068_v10, %v1167_v36 }
 0x326   :  { %v1208_v56 = vadd.f32 %v2074_v14, %v1168_v61 }
 0x327   :  { %v1169_v16 = vmul.f32 %v2065_v19, %v1129_v51  ;;  %v1170_v9 = vmul.f32 %v2071_v26, %v1130_v63  ;;  %1239 = vst [vmem:[#allocation10 + $0xe0] sm:$0xff] %v1207_v48 }
 0x328   :  { %1240 = vst [vmem:[#allocation10 + $0xe8] sm:$0xff] %v1208_v56 }
 0x329   :  { %v1209_v17 = vadd.f32 %v2068_v10, %v1169_v16  ;;  %v1210_v46 = vadd.f32 %v2074_v14, %v1170_v9 }
 0x32b   :  { %1241 = vst [vmem:[#allocation10 + $0xf0] sm:$0xff] %v1209_v17  ;;  %1242 = vst [vmem:[#allocation10 + $0xf8] sm:$0xff] %v1210_v46 }
 0x32c   :  { %1562 = shalt.err (!%p1559_p8)
}
 0x32d   :  { %s1563_s17 = scalar_lea.hbm %s2263_s4, 4096 }
 0x32e   :  { %p1564_p9 = scmp.ne.s32.totalorder %s2263_s4, %s1563_s17  ;;  %p1567_p10 = scmp.lt.u32.totalorder %s1563_s17, %s2263_s4 }
 0x330   :  { %p1569_p11 = pnand %p1567_p10, %p1564_p9 }
 0x332   :  { %1572 = shalt.err (!%p1569_p11)
}
 0x333   :  { %1254 = dma.vmem_to_hbm [thread:$0]  %s1249_s26, 4096, %s2263_s4, [#allocation4], %s1585_s1, %s1585_s1, %s1586_s13  }
 0x334   :  { %1579 = dma.done.wait [#allocation4], 4096  }
 0x335   :  { %1580 = vsyncadd [#allocation4], 4294963200 }
 0x336   :  { %1258 = vsyncpa [#allocation3], 1 }
 0x337   :  { %1259 = vsyncpa [#allocation6], 1 }
 0x338   :  { %1260 = vsyncpa [#allocation9], 1 }
 0x339   :  { %1261 = vsyncpa [#allocation4], 1 }

</bundles_post_ra>
